<compile_context>
chip_gen: v5e
topology: v5e:2x2
jax: 0.10.0
libtpu: 0.0.40
codegen_flags: <defaults>
</compile_context>

<pallas_src>
import jax
import jax.numpy as jnp
from jax.experimental import pallas as pl
from jax.experimental.pallas import tpu as pltpu

EPS = 1e-5
LANE = 128
VMEM_LIMIT = 48 * 1024 * 1024  # headroom under v7x's 64 MiB physical VMEM


# ------------------------------ helpers -------------------------------------

def _round_up(x, m):
    return (x + m - 1) // m * m


def _pick_tile(m, target=256):
    # Largest multiple-of-8 divisor of m that is <= target. (512-1024 rows is
    # the production sweet spot; 256 keeps a multi-step grid at demo shapes.)
    for cand in range(min(target, m), 7, -1):
        if cand % 8 == 0 and m % cand == 0:
            return cand
    raise ValueError(f"M={m} must be divisible by 8")


def _pad_axis(a, axis, size):
    pad = size - a.shape[axis]
    if pad == 0:
        return a
    cfg = [(0, 0)] * a.ndim
    cfg[axis] = (0, pad)
    return jnp.pad(a, cfg)


def _folded_affine(partial_stats, gamma, beta, count):
    # partial_stats: (T, 2, C) per-tile [sum, sum_sq]  -> (scale, shift) (1, C)
    ssum = jnp.sum(partial_stats[:, 0, :], axis=0)
    ssq = jnp.sum(partial_stats[:, 1, :], axis=0)
    mu = ssum / count
    var = ssq / count - mu * mu
    scale = gamma * jax.lax.rsqrt(var + EPS)
    shift = beta - mu * scale
    return scale.reshape(1, -1), shift.reshape(1, -1)


def _cparams():
    return pltpu.CompilerParams(dimension_semantics=("parallel",),
                                vmem_limit_bytes=VMEM_LIMIT)


# ------------------------------ kernels -------------------------------------

def _conv1_kernel(x_ref, w_ref, y_ref, st_ref):
    """1x1 conv (matmul) + per-tile BN partial stats."""
    y = jnp.dot(x_ref[...].astype(jnp.bfloat16), w_ref[...],
                preferred_element_type=jnp.float32)
    y_ref[...] = y
    ssum = jnp.sum(y, axis=0, keepdims=True)
    ssq = jnp.sum(y * y, axis=0, keepdims=True)
    st_ref[...] = jnp.concatenate([ssum, ssq], axis=0).reshape(st_ref.shape)


def _conv2_kernel(y1_ref, sc_ref, sh_ref, w_ref, y2_ref, st_ref, apad_ref):
    """BN1+ReLU then 3x3 conv as 9 shifted matmuls over a zero-halo scratch."""
    _, H, W, P = y1_ref.shape
    a = jnp.maximum(y1_ref[0] * sc_ref[...] + sh_ref[...], 0.0)   # (H, W, P)
    apad_ref[...] = jnp.zeros_like(apad_ref)                      # zero halo
    apad_ref[1:H + 1, 1:W + 1, :] = a
    acc = jnp.zeros((H * W, P), jnp.float32)
    for t in range(9):                                            # 3x3 taps
        dh, dw = t // 3, t % 3
        patch = apad_ref[dh:dh + H, dw:dw + W, :].reshape(H * W, P)
        acc = acc + jnp.dot(patch.astype(jnp.bfloat16), w_ref[t],
                            preferred_element_type=jnp.float32)
    y2_ref[...] = acc.reshape(1, H, W, P)
    ssum = jnp.sum(acc, axis=0, keepdims=True)
    ssq = jnp.sum(acc * acc, axis=0, keepdims=True)
    st_ref[...] = jnp.concatenate([ssum, ssq], axis=0).reshape(st_ref.shape)


def _conv3_kernel(y2_ref, sc_ref, sh_ref, w_ref, z_ref, st_ref):
    """BN2+ReLU then 1x1 conv + per-tile BN3 partial stats."""
    a = jnp.maximum(y2_ref[...] * sc_ref[...] + sh_ref[...], 0.0)
    z = jnp.dot(a.astype(jnp.bfloat16), w_ref[...],
                preferred_element_type=jnp.float32)
    z_ref[...] = z
    ssum = jnp.sum(z, axis=0, keepdims=True)
    ssq = jnp.sum(z * z, axis=0, keepdims=True)
    st_ref[...] = jnp.concatenate([ssum, ssq], axis=0).reshape(st_ref.shape)


def _residual_kernel(z_ref, res_ref, sc_ref, sh_ref, o_ref):
    """BN3 (folded affine) + residual add + final ReLU."""
    o_ref[...] = jnp.maximum(
        z_ref[...] * sc_ref[...] + sh_ref[...] + res_ref[...], 0.0)


# ------------------------------ wrapper -------------------------------------

def bottleneck_forward(x_nchw, params):
    w1, g1, b1, w2, g2, b2, w3, g3, b3 = params
    N, Cin, H, W = x_nchw.shape
    P = w1.shape[1]
    Cout = w3.shape[1]
    assert Cin == Cout, "downsample is None => residual channels must match"
    M = N * H * W
    countf = float(M)

    Cp = max(LANE, _round_up(Cin, LANE))   # padded residual / output channels
    Pp = max(LANE, _round_up(P, LANE))     # padded bottleneck channels
    tm = _pick_tile(M)
    nt = M // tm

    # ---- layout & channel-padding glue (XLA) --------------------------------
    x_flat = _pad_axis(jnp.transpose(x_nchw, (0, 2, 3, 1)).reshape(M, Cin), 1, Cp)
    w1p = _pad_axis(_pad_axis(w1, 0, Cp), 1, Pp).astype(jnp.bfloat16)
    w2p = _pad_axis(_pad_axis(w2, 2, Pp), 3, Pp).reshape(9, Pp, Pp).astype(jnp.bfloat16)
    w3p = _pad_axis(_pad_axis(w3, 0, Pp), 1, Cp).astype(jnp.bfloat16)
    g1p, b1p = _pad_axis(g1.reshape(-1), 0, Pp), _pad_axis(b1.reshape(-1), 0, Pp)
    g2p, b2p = _pad_axis(g2.reshape(-1), 0, Pp), _pad_axis(b2.reshape(-1), 0, Pp)
    g3p, b3p = _pad_axis(g3.reshape(-1), 0, Cp), _pad_axis(b3.reshape(-1), 0, Cp)

    # ---- pass A: conv1 (1x1) + partial BN1 stats, tiled over M --------------
    y1, st1 = pl.pallas_call(
        _conv1_kernel,
        grid=(nt,),
        in_specs=[pl.BlockSpec((tm, Cp), lambda i: (i, 0)),
                  pl.BlockSpec((Cp, Pp), lambda i: (0, 0))],
        out_specs=[pl.BlockSpec((tm, Pp), lambda i: (i, 0)),
                   pl.BlockSpec((1, 2, Pp), lambda i: (i, 0, 0))],
        out_shape=[jax.ShapeDtypeStruct((M, Pp), jnp.float32),
                   jax.ShapeDtypeStruct((nt, 2, Pp), jnp.float32)],
        compiler_params=_cparams(),
        cost_estimate=pl.CostEstimate(
            flops=2 * M * Cp * Pp, transcendentals=0,
            bytes_accessed=4 * M * (Cp + Pp) + 2 * Cp * Pp),
    )(x_flat, w1p)
    sc1, sh1 = _folded_affine(st1, g1p, b1p, countf)

    # ---- pass B: BN1+ReLU + 3x3 conv (halo scratch) + partial BN2 stats -----
    y1_img = y1.reshape(N, H, W, Pp)
    y2, st2 = pl.pallas_call(
        _conv2_kernel,
        grid=(N,),
        in_specs=[pl.BlockSpec((1, H, W, Pp), lambda n: (n, 0, 0, 0)),
                  pl.BlockSpec((1, Pp), lambda n: (0, 0)),
                  pl.BlockSpec((1, Pp), lambda n: (0, 0)),
                  pl.BlockSpec((9, Pp, Pp), lambda n: (0, 0, 0))],
        out_specs=[pl.BlockSpec((1, H, W, Pp), lambda n: (n, 0, 0, 0)),
                   pl.BlockSpec((1, 2, Pp), lambda n: (n, 0, 0))],
        out_shape=[jax.ShapeDtypeStruct((N, H, W, Pp), jnp.float32),
                   jax.ShapeDtypeStruct((N, 2, Pp), jnp.float32)],
        scratch_shapes=[pltpu.VMEM((H + 2, W + 2, Pp), jnp.float32)],
        compiler_params=_cparams(),
        cost_estimate=pl.CostEstimate(
            flops=2 * M * 9 * Pp * Pp, transcendentals=0,
            bytes_accessed=8 * M * Pp + 2 * 9 * Pp * Pp),
    )(y1_img, sc1, sh1, w2p)
    sc2, sh2 = _folded_affine(st2, g2p, b2p, countf)

    # ---- pass C: BN2+ReLU + conv3 (1x1) + partial BN3 stats, tiled over M ---
    y2_flat = y2.reshape(M, Pp)
    z, st3 = pl.pallas_call(
        _conv3_kernel,
        grid=(nt,),
        in_specs=[pl.BlockSpec((tm, Pp), lambda i: (i, 0)),
                  pl.BlockSpec((1, Pp), lambda i: (0, 0)),
                  pl.BlockSpec((1, Pp), lambda i: (0, 0)),
                  pl.BlockSpec((Pp, Cp), lambda i: (0, 0))],
        out_specs=[pl.BlockSpec((tm, Cp), lambda i: (i, 0)),
                   pl.BlockSpec((1, 2, Cp), lambda i: (i, 0, 0))],
        out_shape=[jax.ShapeDtypeStruct((M, Cp), jnp.float32),
                   jax.ShapeDtypeStruct((nt, 2, Cp), jnp.float32)],
        compiler_params=_cparams(),
        cost_estimate=pl.CostEstimate(
            flops=2 * M * Pp * Cp, transcendentals=0,
            bytes_accessed=4 * M * (Pp + Cp) + 2 * Pp * Cp),
    )(y2_flat, sc2, sh2, w3p)
    sc3, sh3 = _folded_affine(st3, g3p, b3p, countf)

    # ---- pass D: BN3 + residual add + final ReLU, tiled over M --------------
    out_flat = pl.pallas_call(
        _residual_kernel,
        grid=(nt,),
        in_specs=[pl.BlockSpec((tm, Cp), lambda i: (i, 0)),
                  pl.BlockSpec((tm, Cp), lambda i: (i, 0)),
                  pl.BlockSpec((1, Cp), lambda i: (0, 0)),
                  pl.BlockSpec((1, Cp), lambda i: (0, 0))],
        out_specs=pl.BlockSpec((tm, Cp), lambda i: (i, 0)),
        out_shape=jax.ShapeDtypeStruct((M, Cp), jnp.float32),
        compiler_params=_cparams(),
        cost_estimate=pl.CostEstimate(
            flops=3 * M * Cp, transcendentals=0,
            bytes_accessed=12 * M * Cp),
    )(z, x_flat, sc3, sh3)

    out = out_flat.reshape(N, H, W, Cp)[..., :Cout]
    return jnp.transpose(out, (0, 3, 1, 2))


# ---------------- Pure-JAX reference (for verification) ---------------------
# Matches the PyTorch forward (train-mode BN with batch stats) except that
# matmul/conv inputs are cast to bf16 exactly like the kernel's MXU path, so
# the comparison can be tight; the bf16 cast is the only deliberate deviation
# from pure-f32 semantics (~1e-2 absolute).

def reference_forward(x_nchw, params, mxu_bf16=True):
    w1, g1, b1, w2, g2, b2, w3, g3, b3 = params
    cast = (lambda t: t.astype(jnp.bfloat16)) if mxu_bf16 else (lambda t: t)

    def bn(y, g, b):
        mu = y.mean(axis=(0, 1, 2), keepdims=True)
        var = ((y - mu) ** 2).mean(axis=(0, 1, 2), keepdims=True)
        return (y - mu) * (g.reshape(1, 1, 1, -1) * jax.lax.rsqrt(var + EPS)) \
            + b.reshape(1, 1, 1, -1)

    x = jnp.transpose(x_nchw, (0, 2, 3, 1))  # NHWC
    y = jnp.einsum('nhwc,cp->nhwp', cast(x), cast(w1),
                   preferred_element_type=jnp.float32)
    a = jax.nn.relu(bn(y, g1, b1))
    y = jax.lax.conv_general_dilated(
        cast(a), cast(w2), window_strides=(1, 1), padding='SAME',
        dimension_numbers=('NHWC', 'HWIO', 'NHWC'),
        preferred_element_type=jnp.float32)
    a = jax.nn.relu(bn(y, g2, b2))
    z = jnp.einsum('nhwp,pc->nhwc', cast(a), cast(w3),
                   preferred_element_type=jnp.float32)
    z = bn(z, g3, b3)
    return jnp.transpose(jax.nn.relu(z + x), (0, 3, 1, 2))


if __name__ == "__main__":
    key = jax.random.PRNGKey(0)
    N, H, W = 2, 16, 16
    planes = 4
    inplanes = planes * 4        # expansion = 4; Cin == Cout (no downsample)

    ks = jax.random.split(key, 10)
    # Conv weights stored pre-transposed for matmul use:
    #   PyTorch conv1.weight (planes, inplanes, 1, 1)  -> (inplanes, planes)
    #   PyTorch conv2.weight (planes, planes, 3, 3)    -> (3, 3, ci, co) HWIO
    #   PyTorch conv3.weight (4*planes, planes, 1, 1)  -> (planes, 4*planes)
    w1 = jax.random.normal(ks[0], (inplanes, planes), jnp.float32) * 0.1
    w2 = jax.random.normal(ks[1], (3, 3, planes, planes), jnp.float32) * 0.1
    w3 = jax.random.normal(ks[2], (planes, inplanes), jnp.float32) * 0.1
    g1 = 1.0 + 0.1 * jax.random.normal(ks[3], (planes,), jnp.float32)
    b1 = 0.1 * jax.random.normal(ks[4], (planes,), jnp.float32)
    g2 = 1.0 + 0.1 * jax.random.normal(ks[5], (planes,), jnp.float32)
    b2 = 0.1 * jax.random.normal(ks[6], (planes,), jnp.float32)
    g3 = 1.0 + 0.1 * jax.random.normal(ks[7], (inplanes,), jnp.float32)
    b3 = 0.1 * jax.random.normal(ks[8], (inplanes,), jnp.float32)
    x = jax.random.normal(ks[9], (N, inplanes, H, W), jnp.float32)  # NCHW

    params = (w1, g1, b1, w2, g2, b2, w3, g3, b3)

    fwd = jax.jit(bottleneck_forward)
    out = jax.block_until_ready(fwd(x, params))
    ref = jax.block_until_ready(reference_forward(x, params, mxu_bf16=True))

    assert out.shape == x.shape
    if not jnp.allclose(out, ref, atol=5e-3, rtol=5e-3):
        raise AssertionError("Pallas Bottleneck output mismatch vs JAX reference")
    print("KERNEL_OK")
</pallas_src>

<mosaic_0001>
module attributes {stable_mosaic.version = 11 : i64} {
  func.func @_conv2_kernel(%arg0: i32, %arg1: memref<1x16x16x128xf32, #tpu.memory_space<vmem>>, %arg2: memref<1x128xf32, #tpu.memory_space<vmem>>, %arg3: memref<1x128xf32, #tpu.memory_space<vmem>>, %arg4: memref<9x128x128xbf16, #tpu.memory_space<vmem>>, %arg5: memref<1x16x16x128xf32, #tpu.memory_space<vmem>>, %arg6: memref<1x2x128xf32, #tpu.memory_space<vmem>>, %arg7: memref<18x18x128xf32, #tpu.memory_space<vmem>>) attributes {dimension_semantics = [#tpu.dimension_semantics<parallel>], iteration_bounds = array<i64: 2>, scalar_prefetch = 0 : i64, scratch_operands = 1 : i64, tpu.core_type = #tpu.core_type<tc>, window_params = [{transform_indices = @transform_0, window_bounds = array<i64: 1, 16, 16, 128>}, {pipeline_mode = #tpu.pipeline_mode<synchronous>, transform_indices = @transform_1, window_bounds = array<i64: 1, 128>}, {pipeline_mode = #tpu.pipeline_mode<synchronous>, transform_indices = @transform_2, window_bounds = array<i64: 1, 128>}, {pipeline_mode = #tpu.pipeline_mode<synchronous>, transform_indices = @transform_3, window_bounds = array<i64: 9, 128, 128>}, {transform_indices = @transform_4, window_bounds = array<i64: 1, 16, 16, 128>}, {transform_indices = @transform_5, window_bounds = array<i64: 1, 2, 128>}]} {
    %c0 = arith.constant 0 : index
    %c0_0 = arith.constant 0 : index
    %c0_1 = arith.constant 0 : index
    %c0_2 = arith.constant 0 : index
    %0 = vector.load %arg1[%c0, %c0_0, %c0_1, %c0_2] : memref<1x16x16x128xf32, #tpu.memory_space<vmem>>, vector<1x16x16x128xf32>
    %1 = vector.shape_cast %0 : vector<1x16x16x128xf32> to vector<16x16x128xf32>
    %c0_3 = arith.constant 0 : index
    %c0_4 = arith.constant 0 : index
    %2 = vector.load %arg2[%c0_3, %c0_4] : memref<1x128xf32, #tpu.memory_space<vmem>>, vector<1x128xf32>
    %3 = vector.shape_cast %2 : vector<1x128xf32> to vector<1x1x128xf32>
    %4 = vector.broadcast %3 : vector<1x1x128xf32> to vector<16x16x128xf32>
    %5 = arith.mulf %1, %4 : vector<16x16x128xf32>
    %c0_5 = arith.constant 0 : index
    %c0_6 = arith.constant 0 : index
    %6 = vector.load %arg3[%c0_5, %c0_6] : memref<1x128xf32, #tpu.memory_space<vmem>>, vector<1x128xf32>
    %7 = vector.shape_cast %6 : vector<1x128xf32> to vector<1x1x128xf32>
    %8 = vector.broadcast %7 : vector<1x1x128xf32> to vector<16x16x128xf32>
    %9 = arith.addf %5, %8 : vector<16x16x128xf32>
    %cst = arith.constant 0.000000e+00 : f32
    %10 = vector.broadcast %cst : f32 to vector<16x16x128xf32>
    %11 = arith.maximumf %9, %10 : vector<16x16x128xf32>
    %cst_7 = arith.constant 0.000000e+00 : f32
    %12 = vector.broadcast %cst_7 : f32 to vector<18x18x128xf32>
    %c0_8 = arith.constant 0 : index
    %c0_9 = arith.constant 0 : index
    %c0_10 = arith.constant 0 : index
    %13 = vector.load %arg7[%c0_8, %c0_9, %c0_10] : memref<18x18x128xf32, #tpu.memory_space<vmem>>, vector<18x18x128xf32>
    tpu.vector_store %arg7[%c0_8, %c0_9, %c0_10], %12 {strides = array<i32>} : memref<18x18x128xf32, #tpu.memory_space<vmem>>, vector<18x18x128xf32>,
    %c1 = arith.constant 1 : index
    %c1_11 = arith.constant 1 : index
    %c0_12 = arith.constant 0 : index
    %14 = vector.load %arg7[%c1, %c1_11, %c0_12] : memref<18x18x128xf32, #tpu.memory_space<vmem>>, vector<16x16x128xf32>
    tpu.vector_store %arg7[%c1, %c1_11, %c0_12], %11 {strides = array<i32>} : memref<18x18x128xf32, #tpu.memory_space<vmem>>, vector<16x16x128xf32>,
    %cst_13 = arith.constant 0.000000e+00 : f32
    %15 = vector.broadcast %cst_13 : f32 to vector<256x128xf32>
    %c0_14 = arith.constant 0 : index
    %c0_15 = arith.constant 0 : index
    %c0_16 = arith.constant 0 : index
    %16 = vector.load %arg7[%c0_14, %c0_15, %c0_16] : memref<18x18x128xf32, #tpu.memory_space<vmem>>, vector<16x16x128xf32>
    %17 = vector.shape_cast %16 : vector<16x16x128xf32> to vector<256x128xf32>
    %18 = arith.truncf %17 : vector<256x128xf32> to vector<256x128xbf16>
    %c0_17 = arith.constant 0 : index
    %c0_18 = arith.constant 0 : index
    %c0_19 = arith.constant 0 : index
    %19 = vector.load %arg4[%c0_17, %c0_18, %c0_19] : memref<9x128x128xbf16, #tpu.memory_space<vmem>>, vector<1x128x128xbf16>
    %20 = vector.shape_cast %19 : vector<1x128x128xbf16> to vector<128x128xbf16>
    %cst_20 = arith.constant dense<0.000000e+00> : vector<256x128xf32>
    %21 = tpu.matmul %18, %20, %cst_20 {dimension_numbers = #tpu.dot_dimension_numbers<[1], [0], [0], [1], [0, 0, 1, 1], [], []>} : vector<256x128xbf16>, vector<128x128xbf16>, vector<256x128xf32> -> vector<256x128xf32>
    %22 = arith.addf %15, %21 : vector<256x128xf32>
    %c0_21 = arith.constant 0 : index
    %c1_22 = arith.constant 1 : index
    %c0_23 = arith.constant 0 : index
    %23 = vector.load %arg7[%c0_21, %c1_22, %c0_23] : memref<18x18x128xf32, #tpu.memory_space<vmem>>, vector<16x16x128xf32>
    %24 = vector.shape_cast %23 : vector<16x16x128xf32> to vector<256x128xf32>
    %25 = arith.truncf %24 : vector<256x128xf32> to vector<256x128xbf16>
    %c1_24 = arith.constant 1 : index
    %c0_25 = arith.constant 0 : index
    %c0_26 = arith.constant 0 : index
    %26 = vector.load %arg4[%c1_24, %c0_25, %c0_26] : memref<9x128x128xbf16, #tpu.memory_space<vmem>>, vector<1x128x128xbf16>
    %27 = vector.shape_cast %26 : vector<1x128x128xbf16> to vector<128x128xbf16>
    %cst_27 = arith.constant dense<0.000000e+00> : vector<256x128xf32>
    %28 = tpu.matmul %25, %27, %cst_27 {dimension_numbers = #tpu.dot_dimension_numbers<[1], [0], [0], [1], [0, 0, 1, 1], [], []>} : vector<256x128xbf16>, vector<128x128xbf16>, vector<256x128xf32> -> vector<256x128xf32>
    %29 = arith.addf %22, %28 : vector<256x128xf32>
    %c0_28 = arith.constant 0 : index
    %c2 = arith.constant 2 : index
    %c0_29 = arith.constant 0 : index
    %30 = vector.load %arg7[%c0_28, %c2, %c0_29] : memref<18x18x128xf32, #tpu.memory_space<vmem>>, vector<16x16x128xf32>
    %31 = vector.shape_cast %30 : vector<16x16x128xf32> to vector<256x128xf32>
    %32 = arith.truncf %31 : vector<256x128xf32> to vector<256x128xbf16>
    %c2_30 = arith.constant 2 : index
    %c0_31 = arith.constant 0 : index
    %c0_32 = arith.constant 0 : index
    %33 = vector.load %arg4[%c2_30, %c0_31, %c0_32] : memref<9x128x128xbf16, #tpu.memory_space<vmem>>, vector<1x128x128xbf16>
    %34 = vector.shape_cast %33 : vector<1x128x128xbf16> to vector<128x128xbf16>
    %cst_33 = arith.constant dense<0.000000e+00> : vector<256x128xf32>
    %35 = tpu.matmul %32, %34, %cst_33 {dimension_numbers = #tpu.dot_dimension_numbers<[1], [0], [0], [1], [0, 0, 1, 1], [], []>} : vector<256x128xbf16>, vector<128x128xbf16>, vector<256x128xf32> -> vector<256x128xf32>
    %36 = arith.addf %29, %35 : vector<256x128xf32>
    %c1_34 = arith.constant 1 : index
    %c0_35 = arith.constant 0 : index
    %c0_36 = arith.constant 0 : index
    %37 = vector.load %arg7[%c1_34, %c0_35, %c0_36] : memref<18x18x128xf32, #tpu.memory_space<vmem>>, vector<16x16x128xf32>
    %38 = vector.shape_cast %37 : vector<16x16x128xf32> to vector<256x128xf32>
    %39 = arith.truncf %38 : vector<256x128xf32> to vector<256x128xbf16>
    %c3 = arith.constant 3 : index
    %c0_37 = arith.constant 0 : index
    %c0_38 = arith.constant 0 : index
    %40 = vector.load %arg4[%c3, %c0_37, %c0_38] : memref<9x128x128xbf16, #tpu.memory_space<vmem>>, vector<1x128x128xbf16>
    %41 = vector.shape_cast %40 : vector<1x128x128xbf16> to vector<128x128xbf16>
    %cst_39 = arith.constant dense<0.000000e+00> : vector<256x128xf32>
    %42 = tpu.matmul %39, %41, %cst_39 {dimension_numbers = #tpu.dot_dimension_numbers<[1], [0], [0], [1], [0, 0, 1, 1], [], []>} : vector<256x128xbf16>, vector<128x128xbf16>, vector<256x128xf32> -> vector<256x128xf32>
    %43 = arith.addf %36, %42 : vector<256x128xf32>
    %c1_40 = arith.constant 1 : index
    %c1_41 = arith.constant 1 : index
    %c0_42 = arith.constant 0 : index
    %44 = vector.load %arg7[%c1_40, %c1_41, %c0_42] : memref<18x18x128xf32, #tpu.memory_space<vmem>>, vector<16x16x128xf32>
    %45 = vector.shape_cast %44 : vector<16x16x128xf32> to vector<256x128xf32>
    %46 = arith.truncf %45 : vector<256x128xf32> to vector<256x128xbf16>
    %c4 = arith.constant 4 : index
    %c0_43 = arith.constant 0 : index
    %c0_44 = arith.constant 0 : index
    %47 = vector.load %arg4[%c4, %c0_43, %c0_44] : memref<9x128x128xbf16, #tpu.memory_space<vmem>>, vector<1x128x128xbf16>
    %48 = vector.shape_cast %47 : vector<1x128x128xbf16> to vector<128x128xbf16>
    %cst_45 = arith.constant dense<0.000000e+00> : vector<256x128xf32>
    %49 = tpu.matmul %46, %48, %cst_45 {dimension_numbers = #tpu.dot_dimension_numbers<[1], [0], [0], [1], [0, 0, 1, 1], [], []>} : vector<256x128xbf16>, vector<128x128xbf16>, vector<256x128xf32> -> vector<256x128xf32>
    %50 = arith.addf %43, %49 : vector<256x128xf32>
    %c1_46 = arith.constant 1 : index
    %c2_47 = arith.constant 2 : index
    %c0_48 = arith.constant 0 : index
    %51 = vector.load %arg7[%c1_46, %c2_47, %c0_48] : memref<18x18x128xf32, #tpu.memory_space<vmem>>, vector<16x16x128xf32>
    %52 = vector.shape_cast %51 : vector<16x16x128xf32> to vector<256x128xf32>
    %53 = arith.truncf %52 : vector<256x128xf32> to vector<256x128xbf16>
    %c5 = arith.constant 5 : index
    %c0_49 = arith.constant 0 : index
    %c0_50 = arith.constant 0 : index
    %54 = vector.load %arg4[%c5, %c0_49, %c0_50] : memref<9x128x128xbf16, #tpu.memory_space<vmem>>, vector<1x128x128xbf16>
    %55 = vector.shape_cast %54 : vector<1x128x128xbf16> to vector<128x128xbf16>
    %cst_51 = arith.constant dense<0.000000e+00> : vector<256x128xf32>
    %56 = tpu.matmul %53, %55, %cst_51 {dimension_numbers = #tpu.dot_dimension_numbers<[1], [0], [0], [1], [0, 0, 1, 1], [], []>} : vector<256x128xbf16>, vector<128x128xbf16>, vector<256x128xf32> -> vector<256x128xf32>
    %57 = arith.addf %50, %56 : vector<256x128xf32>
    %c2_52 = arith.constant 2 : index
    %c0_53 = arith.constant 0 : index
    %c0_54 = arith.constant 0 : index
    %58 = vector.load %arg7[%c2_52, %c0_53, %c0_54] : memref<18x18x128xf32, #tpu.memory_space<vmem>>, vector<16x16x128xf32>
    %59 = vector.shape_cast %58 : vector<16x16x128xf32> to vector<256x128xf32>
    %60 = arith.truncf %59 : vector<256x128xf32> to vector<256x128xbf16>
    %c6 = arith.constant 6 : index
    %c0_55 = arith.constant 0 : index
    %c0_56 = arith.constant 0 : index
    %61 = vector.load %arg4[%c6, %c0_55, %c0_56] : memref<9x128x128xbf16, #tpu.memory_space<vmem>>, vector<1x128x128xbf16>
    %62 = vector.shape_cast %61 : vector<1x128x128xbf16> to vector<128x128xbf16>
    %cst_57 = arith.constant dense<0.000000e+00> : vector<256x128xf32>
    %63 = tpu.matmul %60, %62, %cst_57 {dimension_numbers = #tpu.dot_dimension_numbers<[1], [0], [0], [1], [0, 0, 1, 1], [], []>} : vector<256x128xbf16>, vector<128x128xbf16>, vector<256x128xf32> -> vector<256x128xf32>
    %64 = arith.addf %57, %63 : vector<256x128xf32>
    %c2_58 = arith.constant 2 : index
    %c1_59 = arith.constant 1 : index
    %c0_60 = arith.constant 0 : index
    %65 = vector.load %arg7[%c2_58, %c1_59, %c0_60] : memref<18x18x128xf32, #tpu.memory_space<vmem>>, vector<16x16x128xf32>
    %66 = vector.shape_cast %65 : vector<16x16x128xf32> to vector<256x128xf32>
    %67 = arith.truncf %66 : vector<256x128xf32> to vector<256x128xbf16>
    %c7 = arith.constant 7 : index
    %c0_61 = arith.constant 0 : index
    %c0_62 = arith.constant 0 : index
    %68 = vector.load %arg4[%c7, %c0_61, %c0_62] : memref<9x128x128xbf16, #tpu.memory_space<vmem>>, vector<1x128x128xbf16>
    %69 = vector.shape_cast %68 : vector<1x128x128xbf16> to vector<128x128xbf16>
    %cst_63 = arith.constant dense<0.000000e+00> : vector<256x128xf32>
    %70 = tpu.matmul %67, %69, %cst_63 {dimension_numbers = #tpu.dot_dimension_numbers<[1], [0], [0], [1], [0, 0, 1, 1], [], []>} : vector<256x128xbf16>, vector<128x128xbf16>, vector<256x128xf32> -> vector<256x128xf32>
    %71 = arith.addf %64, %70 : vector<256x128xf32>
    %c2_64 = arith.constant 2 : index
    %c2_65 = arith.constant 2 : index
    %c0_66 = arith.constant 0 : index
    %72 = vector.load %arg7[%c2_64, %c2_65, %c0_66] : memref<18x18x128xf32, #tpu.memory_space<vmem>>, vector<16x16x128xf32>
    %73 = vector.shape_cast %72 : vector<16x16x128xf32> to vector<256x128xf32>
    %74 = arith.truncf %73 : vector<256x128xf32> to vector<256x128xbf16>
    %c8 = arith.constant 8 : index
    %c0_67 = arith.constant 0 : index
    %c0_68 = arith.constant 0 : index
    %75 = vector.load %arg4[%c8, %c0_67, %c0_68] : memref<9x128x128xbf16, #tpu.memory_space<vmem>>, vector<1x128x128xbf16>
    %76 = vector.shape_cast %75 : vector<1x128x128xbf16> to vector<128x128xbf16>
    %cst_69 = arith.constant dense<0.000000e+00> : vector<256x128xf32>
    %77 = tpu.matmul %74, %76, %cst_69 {dimension_numbers = #tpu.dot_dimension_numbers<[1], [0], [0], [1], [0, 0, 1, 1], [], []>} : vector<256x128xbf16>, vector<128x128xbf16>, vector<256x128xf32> -> vector<256x128xf32>
    %78 = arith.addf %71, %77 : vector<256x128xf32>
    %79 = vector.shape_cast %78 : vector<256x128xf32> to vector<1x16x16x128xf32>
    %c0_70 = arith.constant 0 : index
    %c0_71 = arith.constant 0 : index
    %c0_72 = arith.constant 0 : index
    %c0_73 = arith.constant 0 : index
    %80 = vector.load %arg5[%c0_70, %c0_71, %c0_72, %c0_73] : memref<1x16x16x128xf32, #tpu.memory_space<vmem>>, vector<1x16x16x128xf32>
    tpu.vector_store %arg5[%c0_70, %c0_71, %c0_72, %c0_73], %79 {strides = array<i32>} : memref<1x16x16x128xf32, #tpu.memory_space<vmem>>, vector<1x16x16x128xf32>,
    %cst_74 = arith.constant dense<0.000000e+00> : vector<128xf32>
    %81 = vector.multi_reduction <add>, %78, %cst_74 [0] : vector<256x128xf32> to vector<128xf32>
    %82 = vector.shape_cast %81 : vector<128xf32> to vector<1x128xf32>
    %83 = arith.mulf %78, %78 : vector<256x128xf32>
    %cst_75 = arith.constant dense<0.000000e+00> : vector<128xf32>
    %84 = vector.multi_reduction <add>, %83, %cst_75 [0] : vector<256x128xf32> to vector<128xf32>
    %85 = vector.shape_cast %84 : vector<128xf32> to vector<1x128xf32>
    %86 = tpu.concatenate %82, %85 in 0 : vector<1x128xf32>, vector<1x128xf32> -> vector<2x128xf32>
    %87 = vector.shape_cast %86 : vector<2x128xf32> to vector<1x2x128xf32>
    %c0_76 = arith.constant 0 : index
    %c0_77 = arith.constant 0 : index
    %c0_78 = arith.constant 0 : index
    %88 = vector.load %arg6[%c0_76, %c0_77, %c0_78] : memref<1x2x128xf32, #tpu.memory_space<vmem>>, vector<1x2x128xf32>
    tpu.vector_store %arg6[%c0_76, %c0_77, %c0_78], %87 {strides = array<i32>} : memref<1x2x128xf32, #tpu.memory_space<vmem>>, vector<1x2x128xf32>,
    return
  }
  func.func @transform_0(%arg0: i32) -> (i32, i32, i32, i32) {
    %c0_i32 = arith.constant 0 : i32
    %c0_i32_0 = arith.constant 0 : i32
    %c0_i32_1 = arith.constant 0 : i32
    %c0_i32_2 = arith.constant 0 : i32
    return %arg0, %c0_i32, %c0_i32_0, %c0_i32_1 : i32, i32, i32, i32
  }
  func.func @transform_1(%arg0: i32) -> (i32, i32) {
    %c0_i32 = arith.constant 0 : i32
    %c0_i32_0 = arith.constant 0 : i32
    %c0_i32_1 = arith.constant 0 : i32
    return %c0_i32, %c0_i32_0 : i32, i32
  }
  func.func @transform_2(%arg0: i32) -> (i32, i32) {
    %c0_i32 = arith.constant 0 : i32
    %c0_i32_0 = arith.constant 0 : i32
    %c0_i32_1 = arith.constant 0 : i32
    return %c0_i32, %c0_i32_0 : i32, i32
  }
  func.func @transform_3(%arg0: i32) -> (i32, i32, i32) {
    %c0_i32 = arith.constant 0 : i32
    %c0_i32_0 = arith.constant 0 : i32
    %c0_i32_1 = arith.constant 0 : i32
    %c0_i32_2 = arith.constant 0 : i32
    return %c0_i32, %c0_i32_0, %c0_i32_1 : i32, i32, i32
  }
  func.func @transform_4(%arg0: i32) -> (i32, i32, i32, i32) {
    %c0_i32 = arith.constant 0 : i32
    %c0_i32_0 = arith.constant 0 : i32
    %c0_i32_1 = arith.constant 0 : i32
    %c0_i32_2 = arith.constant 0 : i32
    return %arg0, %c0_i32, %c0_i32_0, %c0_i32_1 : i32, i32, i32, i32
  }
  func.func @transform_5(%arg0: i32) -> (i32, i32, i32) {
    %c0_i32 = arith.constant 0 : i32
    %c0_i32_0 = arith.constant 0 : i32
    %c0_i32_1 = arith.constant 0 : i32
    return %arg0, %c0_i32, %c0_i32_0 : i32, i32, i32
  }
}

module attributes {stable_mosaic.version = 11 : i64} {
  func.func @_conv1_kernel(%arg0: i32, %arg1: memref<256x128xf32, #tpu.memory_space<vmem>>, %arg2: memref<128x128xbf16, #tpu.memory_space<vmem>>, %arg3: memref<256x128xf32, #tpu.memory_space<vmem>>, %arg4: memref<1x2x128xf32, #tpu.memory_space<vmem>>) attributes {dimension_semantics = [#tpu.dimension_semantics<parallel>], iteration_bounds = array<i64: 2>, scalar_prefetch = 0 : i64, scratch_operands = 0 : i64, tpu.core_type = #tpu.core_type<tc>, window_params = [{transform_indices = @transform_0, window_bounds = array<i64: 256, 128>}, {pipeline_mode = #tpu.pipeline_mode<synchronous>, transform_indices = @transform_1, window_bounds = array<i64: 128, 128>}, {transform_indices = @transform_2, window_bounds = array<i64: 256, 128>}, {transform_indices = @transform_3, window_bounds = array<i64: 1, 2, 128>}]} {
    %c0 = arith.constant 0 : index
    %c0_0 = arith.constant 0 : index
    %0 = vector.load %arg1[%c0, %c0_0] : memref<256x128xf32, #tpu.memory_space<vmem>>, vector<256x128xf32>
    %1 = arith.truncf %0 : vector<256x128xf32> to vector<256x128xbf16>
    %c0_1 = arith.constant 0 : index
    %c0_2 = arith.constant 0 : index
    %2 = vector.load %arg2[%c0_1, %c0_2] : memref<128x128xbf16, #tpu.memory_space<vmem>>, vector<128x128xbf16>
    %cst = arith.constant dense<0.000000e+00> : vector<256x128xf32>
    %3 = tpu.matmul %1, %2, %cst {dimension_numbers = #tpu.dot_dimension_numbers<[1], [0], [0], [1], [0, 0, 1, 1], [], []>} : vector<256x128xbf16>, vector<128x128xbf16>, vector<256x128xf32> -> vector<256x128xf32>
    %c0_3 = arith.constant 0 : index
    %c0_4 = arith.constant 0 : index
    %4 = vector.load %arg3[%c0_3, %c0_4] : memref<256x128xf32, #tpu.memory_space<vmem>>, vector<256x128xf32>
    tpu.vector_store %arg3[%c0_3, %c0_4], %3 {strides = array<i32>} : memref<256x128xf32, #tpu.memory_space<vmem>>, vector<256x128xf32>,
    %cst_5 = arith.constant dense<0.000000e+00> : vector<128xf32>
    %5 = vector.multi_reduction <add>, %3, %cst_5 [0] : vector<256x128xf32> to vector<128xf32>
    %6 = vector.shape_cast %5 : vector<128xf32> to vector<1x128xf32>
    %7 = arith.mulf %3, %3 : vector<256x128xf32>
    %cst_6 = arith.constant dense<0.000000e+00> : vector<128xf32>
    %8 = vector.multi_reduction <add>, %7, %cst_6 [0] : vector<256x128xf32> to vector<128xf32>
    %9 = vector.shape_cast %8 : vector<128xf32> to vector<1x128xf32>
    %10 = tpu.concatenate %6, %9 in 0 : vector<1x128xf32>, vector<1x128xf32> -> vector<2x128xf32>
    %11 = vector.shape_cast %10 : vector<2x128xf32> to vector<1x2x128xf32>
    %c0_7 = arith.constant 0 : index
    %c0_8 = arith.constant 0 : index
    %c0_9 = arith.constant 0 : index
    %12 = vector.load %arg4[%c0_7, %c0_8, %c0_9] : memref<1x2x128xf32, #tpu.memory_space<vmem>>, vector<1x2x128xf32>
    tpu.vector_store %arg4[%c0_7, %c0_8, %c0_9], %11 {strides = array<i32>} : memref<1x2x128xf32, #tpu.memory_space<vmem>>, vector<1x2x128xf32>,
    return
  }
  func.func @transform_0(%arg0: i32) -> (i32, i32) {
    %c0_i32 = arith.constant 0 : i32
    %c0_i32_0 = arith.constant 0 : i32
    return %arg0, %c0_i32 : i32, i32
  }
  func.func @transform_1(%arg0: i32) -> (i32, i32) {
    %c0_i32 = arith.constant 0 : i32
    %c0_i32_0 = arith.constant 0 : i32
    %c0_i32_1 = arith.constant 0 : i32
    return %c0_i32, %c0_i32_0 : i32, i32
  }
  func.func @transform_2(%arg0: i32) -> (i32, i32) {
    %c0_i32 = arith.constant 0 : i32
    %c0_i32_0 = arith.constant 0 : i32
    return %arg0, %c0_i32 : i32, i32
  }
  func.func @transform_3(%arg0: i32) -> (i32, i32, i32) {
    %c0_i32 = arith.constant 0 : i32
    %c0_i32_0 = arith.constant 0 : i32
    %c0_i32_1 = arith.constant 0 : i32
    return %arg0, %c0_i32, %c0_i32_0 : i32, i32, i32
  }
}

module attributes {stable_mosaic.version = 11 : i64} {
  func.func @_conv3_kernel(%arg0: i32, %arg1: memref<256x128xf32, #tpu.memory_space<vmem>>, %arg2: memref<1x128xf32, #tpu.memory_space<vmem>>, %arg3: memref<1x128xf32, #tpu.memory_space<vmem>>, %arg4: memref<128x128xbf16, #tpu.memory_space<vmem>>, %arg5: memref<256x128xf32, #tpu.memory_space<vmem>>, %arg6: memref<1x2x128xf32, #tpu.memory_space<vmem>>) attributes {dimension_semantics = [#tpu.dimension_semantics<parallel>], iteration_bounds = array<i64: 2>, scalar_prefetch = 0 : i64, scratch_operands = 0 : i64, tpu.core_type = #tpu.core_type<tc>, window_params = [{transform_indices = @transform_0, window_bounds = array<i64: 256, 128>}, {pipeline_mode = #tpu.pipeline_mode<synchronous>, transform_indices = @transform_1, window_bounds = array<i64: 1, 128>}, {pipeline_mode = #tpu.pipeline_mode<synchronous>, transform_indices = @transform_2, window_bounds = array<i64: 1, 128>}, {pipeline_mode = #tpu.pipeline_mode<synchronous>, transform_indices = @transform_3, window_bounds = array<i64: 128, 128>}, {transform_indices = @transform_4, window_bounds = array<i64: 256, 128>}, {transform_indices = @transform_5, window_bounds = array<i64: 1, 2, 128>}]} {
    %c0 = arith.constant 0 : index
    %c0_0 = arith.constant 0 : index
    %0 = vector.load %arg1[%c0, %c0_0] : memref<256x128xf32, #tpu.memory_space<vmem>>, vector<256x128xf32>
    %c0_1 = arith.constant 0 : index
    %c0_2 = arith.constant 0 : index
    %1 = vector.load %arg2[%c0_1, %c0_2] : memref<1x128xf32, #tpu.memory_space<vmem>>, vector<1x128xf32>
    %2 = vector.broadcast %1 : vector<1x128xf32> to vector<256x128xf32>
    %3 = arith.mulf %0, %2 : vector<256x128xf32>
    %c0_3 = arith.constant 0 : index
    %c0_4 = arith.constant 0 : index
    %4 = vector.load %arg3[%c0_3, %c0_4] : memref<1x128xf32, #tpu.memory_space<vmem>>, vector<1x128xf32>
    %5 = vector.broadcast %4 : vector<1x128xf32> to vector<256x128xf32>
    %6 = arith.addf %3, %5 : vector<256x128xf32>
    %cst = arith.constant 0.000000e+00 : f32
    %7 = vector.broadcast %cst : f32 to vector<256x128xf32>
    %8 = arith.maximumf %6, %7 : vector<256x128xf32>
    %9 = arith.truncf %8 : vector<256x128xf32> to vector<256x128xbf16>
    %c0_5 = arith.constant 0 : index
    %c0_6 = arith.constant 0 : index
    %10 = vector.load %arg4[%c0_5, %c0_6] : memref<128x128xbf16, #tpu.memory_space<vmem>>, vector<128x128xbf16>
    %cst_7 = arith.constant dense<0.000000e+00> : vector<256x128xf32>
    %11 = tpu.matmul %9, %10, %cst_7 {dimension_numbers = #tpu.dot_dimension_numbers<[1], [0], [0], [1], [0, 0, 1, 1], [], []>} : vector<256x128xbf16>, vector<128x128xbf16>, vector<256x128xf32> -> vector<256x128xf32>
    %c0_8 = arith.constant 0 : index
    %c0_9 = arith.constant 0 : index
    %12 = vector.load %arg5[%c0_8, %c0_9] : memref<256x128xf32, #tpu.memory_space<vmem>>, vector<256x128xf32>
    tpu.vector_store %arg5[%c0_8, %c0_9], %11 {strides = array<i32>} : memref<256x128xf32, #tpu.memory_space<vmem>>, vector<256x128xf32>,
    %cst_10 = arith.constant dense<0.000000e+00> : vector<128xf32>
    %13 = vector.multi_reduction <add>, %11, %cst_10 [0] : vector<256x128xf32> to vector<128xf32>
    %14 = vector.shape_cast %13 : vector<128xf32> to vector<1x128xf32>
    %15 = arith.mulf %11, %11 : vector<256x128xf32>
    %cst_11 = arith.constant dense<0.000000e+00> : vector<128xf32>
    %16 = vector.multi_reduction <add>, %15, %cst_11 [0] : vector<256x128xf32> to vector<128xf32>
    %17 = vector.shape_cast %16 : vector<128xf32> to vector<1x128xf32>
    %18 = tpu.concatenate %14, %17 in 0 : vector<1x128xf32>, vector<1x128xf32> -> vector<2x128xf32>
    %19 = vector.shape_cast %18 : vector<2x128xf32> to vector<1x2x128xf32>
    %c0_12 = arith.constant 0 : index
    %c0_13 = arith.constant 0 : index
    %c0_14 = arith.constant 0 : index
    %20 = vector.load %arg6[%c0_12, %c0_13, %c0_14] : memref<1x2x128xf32, #tpu.memory_space<vmem>>, vector<1x2x128xf32>
    tpu.vector_store %arg6[%c0_12, %c0_13, %c0_14], %19 {strides = array<i32>} : memref<1x2x128xf32, #tpu.memory_space<vmem>>, vector<1x2x128xf32>,
    return
  }
  func.func @transform_0(%arg0: i32) -> (i32, i32) {
    %c0_i32 = arith.constant 0 : i32
    %c0_i32_0 = arith.constant 0 : i32
    return %arg0, %c0_i32 : i32, i32
  }
  func.func @transform_1(%arg0: i32) -> (i32, i32) {
    %c0_i32 = arith.constant 0 : i32
    %c0_i32_0 = arith.constant 0 : i32
    %c0_i32_1 = arith.constant 0 : i32
    return %c0_i32, %c0_i32_0 : i32, i32
  }
  func.func @transform_2(%arg0: i32) -> (i32, i32) {
    %c0_i32 = arith.constant 0 : i32
    %c0_i32_0 = arith.constant 0 : i32
    %c0_i32_1 = arith.constant 0 : i32
    return %c0_i32, %c0_i32_0 : i32, i32
  }
  func.func @transform_3(%arg0: i32) -> (i32, i32) {
    %c0_i32 = arith.constant 0 : i32
    %c0_i32_0 = arith.constant 0 : i32
    %c0_i32_1 = arith.constant 0 : i32
    return %c0_i32, %c0_i32_0 : i32, i32
  }
  func.func @transform_4(%arg0: i32) -> (i32, i32) {
    %c0_i32 = arith.constant 0 : i32
    %c0_i32_0 = arith.constant 0 : i32
    return %arg0, %c0_i32 : i32, i32
  }
  func.func @transform_5(%arg0: i32) -> (i32, i32, i32) {
    %c0_i32 = arith.constant 0 : i32
    %c0_i32_0 = arith.constant 0 : i32
    %c0_i32_1 = arith.constant 0 : i32
    return %arg0, %c0_i32, %c0_i32_0 : i32, i32, i32
  }
}

module attributes {stable_mosaic.version = 11 : i64} {
  func.func @_residual_kernel(%arg0: i32, %arg1: memref<256x128xf32, #tpu.memory_space<vmem>>, %arg2: memref<256x128xf32, #tpu.memory_space<vmem>>, %arg3: memref<1x128xf32, #tpu.memory_space<vmem>>, %arg4: memref<1x128xf32, #tpu.memory_space<vmem>>, %arg5: memref<256x128xf32, #tpu.memory_space<vmem>>) attributes {dimension_semantics = [#tpu.dimension_semantics<parallel>], iteration_bounds = array<i64: 2>, scalar_prefetch = 0 : i64, scratch_operands = 0 : i64, tpu.core_type = #tpu.core_type<tc>, window_params = [{transform_indices = @transform_0, window_bounds = array<i64: 256, 128>}, {transform_indices = @transform_1, window_bounds = array<i64: 256, 128>}, {pipeline_mode = #tpu.pipeline_mode<synchronous>, transform_indices = @transform_2, window_bounds = array<i64: 1, 128>}, {pipeline_mode = #tpu.pipeline_mode<synchronous>, transform_indices = @transform_3, window_bounds = array<i64: 1, 128>}, {transform_indices = @transform_4, window_bounds = array<i64: 256, 128>}]} {
    %c0 = arith.constant 0 : index
    %c0_0 = arith.constant 0 : index
    %0 = vector.load %arg1[%c0, %c0_0] : memref<256x128xf32, #tpu.memory_space<vmem>>, vector<256x128xf32>
    %c0_1 = arith.constant 0 : index
    %c0_2 = arith.constant 0 : index
    %1 = vector.load %arg3[%c0_1, %c0_2] : memref<1x128xf32, #tpu.memory_space<vmem>>, vector<1x128xf32>
    %2 = vector.broadcast %1 : vector<1x128xf32> to vector<256x128xf32>
    %3 = arith.mulf %0, %2 : vector<256x128xf32>
    %c0_3 = arith.constant 0 : index
    %c0_4 = arith.constant 0 : index
    %4 = vector.load %arg4[%c0_3, %c0_4] : memref<1x128xf32, #tpu.memory_space<vmem>>, vector<1x128xf32>
    %5 = vector.broadcast %4 : vector<1x128xf32> to vector<256x128xf32>
    %6 = arith.addf %3, %5 : vector<256x128xf32>
    %c0_5 = arith.constant 0 : index
    %c0_6 = arith.constant 0 : index
    %7 = vector.load %arg2[%c0_5, %c0_6] : memref<256x128xf32, #tpu.memory_space<vmem>>, vector<256x128xf32>
    %8 = arith.addf %6, %7 : vector<256x128xf32>
    %cst = arith.constant 0.000000e+00 : f32
    %9 = vector.broadcast %cst : f32 to vector<256x128xf32>
    %10 = arith.maximumf %8, %9 : vector<256x128xf32>
    %c0_7 = arith.constant 0 : index
    %c0_8 = arith.constant 0 : index
    %11 = vector.load %arg5[%c0_7, %c0_8] : memref<256x128xf32, #tpu.memory_space<vmem>>, vector<256x128xf32>
    tpu.vector_store %arg5[%c0_7, %c0_8], %10 {strides = array<i32>} : memref<256x128xf32, #tpu.memory_space<vmem>>, vector<256x128xf32>,
    return
  }
  func.func @transform_0(%arg0: i32) -> (i32, i32) {
    %c0_i32 = arith.constant 0 : i32
    %c0_i32_0 = arith.constant 0 : i32
    return %arg0, %c0_i32 : i32, i32
  }
  func.func @transform_1(%arg0: i32) -> (i32, i32) {
    %c0_i32 = arith.constant 0 : i32
    %c0_i32_0 = arith.constant 0 : i32
    return %arg0, %c0_i32 : i32, i32
  }
  func.func @transform_2(%arg0: i32) -> (i32, i32) {
    %c0_i32 = arith.constant 0 : i32
    %c0_i32_0 = arith.constant 0 : i32
    %c0_i32_1 = arith.constant 0 : i32
    return %c0_i32, %c0_i32_0 : i32, i32
  }
  func.func @transform_3(%arg0: i32) -> (i32, i32) {
    %c0_i32 = arith.constant 0 : i32
    %c0_i32_0 = arith.constant 0 : i32
    %c0_i32_1 = arith.constant 0 : i32
    return %c0_i32, %c0_i32_0 : i32, i32
  }
  func.func @transform_4(%arg0: i32) -> (i32, i32) {
    %c0_i32 = arith.constant 0 : i32
    %c0_i32_0 = arith.constant 0 : i32
    return %arg0, %c0_i32 : i32, i32
  }
}

</mosaic_0001>

<bundles_post_ra>
// kernel: bottleneck_forward.4
= control target key start
LH: loop header
LB: loop body
LE: loop exit
PB: predicated region body
PF: predicated region fallthrough
CT: control target
= control target key end

     0   :  { %s726_s12 = smov 0   ;;  %s964_s0 = inlined_call_operand.vmem [shape: f32[512,128], index: 0, kind: input, shape index: {}]   ;;  %s965_s1 = inlined_call_operand.vmem [shape: bf16[128,128], index: 1, kind: input, shape index: {}]   ;;  %s966_s2 = inlined_call_operand.vmem [shape: f32[512,128], index: 2, kind: output, shape index: {0}]   ;;  %s967_s3 = inlined_call_operand.vmem [shape: f32[2,2,128], index: 3, kind: output, shape index: {1}]  }
   0x1 LB: > { %s732_s13 = sadd.s32 4294967295, %s704_s12   ;;  %p618_p0 = scmp.ge.s32.totalorder %s704_s12, 1  ;;  %s704_s12 = sphi %s726_s12, %s14_s12  }
   0x2   : > { %p141_p1 = scmp.lt.s32.totalorder %s704_s12, 3 }
   0x4   : > { %p142_p2 = pnand %p618_p0, %p141_p1 }
   0x5   : > { %s619_s20 = sshll.u32 (!%p142_p2), %s732_s13, 5  ;;  %p181_p4 = scmp.lt.s32.totalorder (!%p142_p2), %s732_s13, 1 }
   0x6   : > { %145 = sbr.rel (%p142_p2) target bundleno = 291 (0x123), region = 28  ;;  %p170_p3 = scmp.lt.s32.totalorder (!%p142_p2), %s619_s20, 63 }
   0xb   : > { %v665_v0 = vld [vmem:[%s965_s1 + $0x38] sm:$0xff]  ;;  %v664_v1 = vld [vmem:[%s965_s1 + $0x30] sm:$0xff]  ;;  %v663_v2 = vld [vmem:[%s965_s1 + $0x28] sm:$0xff]  ;;  %s969_s20 = smov (!%p170_p3, %s619_s20), 63  ;;  %s971_s13 = smov (!%p181_p4, %s732_s13), 1  ;;  %vm524_vm0 = vcmask 1040384  }
   0xc   : > { %297 = vmatpush.bf16.msra.mxu0 %v665_v0  ;;  %666 = vmatpush.bf16.msra.mxu1 %v665_v0  ;;  %v662_v3 = vld [vmem:[%s965_s1 + $0x20] sm:$0xff]  ;;  %v661_v4 = vld [vmem:[%s965_s1 + $0x18] sm:$0xff]  ;;  %v660_v5 = vld [vmem:[%s965_s1 + $0x10] sm:$0xff]  ;;  %s620_s27 = sshll.u32 %s969_s20, 3  ;;  %s623_s11 = sshll.u32 %s971_s13, 1 }
   0xd   : > { %667 = vmatpush.bf16.msra.mxu2 %v665_v0  ;;  %668 = vmatpush.bf16.msra.mxu3 %v665_v0  ;;  %v659_v6 = vld [vmem:[%s965_s1 + $0x8] sm:$0xff]  ;;  %s766_s5 = scalar_lea.vmem %s964_s0, %s620_s27  ;;  %v658_v7 = vld [vmem:[%s965_s1] sm:$0xff]  ;;  %s808_s10 = scalar_lea.vmem %s966_s2, %s620_s27 }
   0xe   : > { %v185_v8 = vld [vmem:[%s766_s5] sm:$0xff]  ;;  %v186_v9 = vld [vmem:[%s766_s5 + $0x8] sm:$0xff]  ;;  %v187_v20 = vld [vmem:[%s766_s5 + $0x10] sm:$0xff]  ;;  %s184_s16 = scalar_lea.vmem %s967_s3, %s623_s11 }
   0xf   : > { %v193_v10 = vld [vmem:[%s766_s5 + $0x40] sm:$0xff]  ;;  %v194_v11 = vld [vmem:[%s766_s5 + $0x48] sm:$0xff]  ;;  %v217_v14 = vpack.c.bf16 %v186_v9, %v185_v8  ;;  %v188_v21 = vld [vmem:[%s766_s5 + $0x18] sm:$0xff] }
  0x10   : > { %298 = vmatpush.bf16.msra.mxu0 %v664_v1  ;;  %669 = vmatpush.bf16.msra.mxu1 %v664_v1  ;;  %v201_v12 = vld [vmem:[%s766_s5 + $0x80] sm:$0xff]  ;;  %v202_v13 = vld [vmem:[%s766_s5 + $0x88] sm:$0xff]  ;;  %v221_v15 = vpack.c.bf16 %v194_v11, %v193_v10  ;;  %v195_v22 = vld [vmem:[%s766_s5 + $0x50] sm:$0xff]  ;;  %v218_v26 = vpack.c.bf16 %v188_v21, %v187_v20 }
  0x11   : > { %670 = vmatpush.bf16.msra.mxu2 %v664_v1  ;;  %671 = vmatpush.bf16.msra.mxu3 %v664_v1  ;;  %v225_v16 = vpack.c.bf16 %v202_v13, %v201_v12  ;;  %v209_v17 = vld [vmem:[%s766_s5 + $0xc0] sm:$0xff]  ;;  %v210_v18 = vld [vmem:[%s766_s5 + $0xc8] sm:$0xff]  ;;  %v196_v23 = vld [vmem:[%s766_s5 + $0x58] sm:$0xff] }
  0x12   : > { %v229_v19 = vpack.c.bf16 %v210_v18, %v209_v17  ;;  %v203_v24 = vld [vmem:[%s766_s5 + $0x90] sm:$0xff]  ;;  %v204_v25 = vld [vmem:[%s766_s5 + $0x98] sm:$0xff]  ;;  %v222_v27 = vpack.c.bf16 %v196_v23, %v195_v22  ;;  %v189_v32 = vld [vmem:[%s766_s5 + $0x20] sm:$0xff] }
  0x13   : > { %v226_v28 = vpack.c.bf16 %v204_v25, %v203_v24  ;;  %v211_v29 = vld [vmem:[%s766_s5 + $0xd0] sm:$0xff]  ;;  %v212_v30 = vld [vmem:[%s766_s5 + $0xd8] sm:$0xff]  ;;  %v190_v33 = vld [vmem:[%s766_s5 + $0x28] sm:$0xff] }
  0x14   : > { %299 = vmatpush.bf16.msra.mxu0 %v663_v2  ;;  %672 = vmatpush.bf16.msra.mxu1 %v663_v2  ;;  %v230_v31 = vpack.c.bf16 %v212_v30, %v211_v29  ;;  %v197_v34 = vld [vmem:[%s766_s5 + $0x60] sm:$0xff]  ;;  %v198_v35 = vld [vmem:[%s766_s5 + $0x68] sm:$0xff]  ;;  %v219_v38 = vpack.c.bf16 %v190_v33, %v189_v32  ;;  %v191_v44 = vld [vmem:[%s766_s5 + $0x30] sm:$0xff] }
  0x15   : > { %673 = vmatpush.bf16.msra.mxu2 %v663_v2  ;;  %674 = vmatpush.bf16.msra.mxu3 %v663_v2  ;;  %v205_v36 = vld [vmem:[%s766_s5 + $0xa0] sm:$0xff]  ;;  %v206_v37 = vld [vmem:[%s766_s5 + $0xa8] sm:$0xff]  ;;  %v223_v39 = vpack.c.bf16 %v198_v35, %v197_v34  ;;  %v192_v45 = vld [vmem:[%s766_s5 + $0x38] sm:$0xff] }
  0x16   : > { %v213_v40 = vld [vmem:[%s766_s5 + $0xe0] sm:$0xff]  ;;  %v214_v41 = vld [vmem:[%s766_s5 + $0xe8] sm:$0xff]  ;;  %v227_v42 = vpack.c.bf16 %v206_v37, %v205_v36  ;;  %v199_v46 = vld [vmem:[%s766_s5 + $0x70] sm:$0xff]  ;;  %v220_v50 = vpack.c.bf16 %v192_v45, %v191_v44 }
  0x17   : > { %v231_v43 = vpack.c.bf16 %v214_v41, %v213_v40  ;;  %v200_v47 = vld [vmem:[%s766_s5 + $0x78] sm:$0xff]  ;;  %v207_v48 = vld [vmem:[%s766_s5 + $0xb0] sm:$0xff] }
  0x18   : > { %300 = vmatpush.bf16.msra.mxu0 %v662_v3  ;;  %675 = vmatpush.bf16.msra.mxu1 %v662_v3  ;;  %v208_v49 = vld [vmem:[%s766_s5 + $0xb8] sm:$0xff]  ;;  %v224_v51 = vpack.c.bf16 %v200_v47, %v199_v46  ;;  %v215_v52 = vld [vmem:[%s766_s5 + $0xf0] sm:$0xff] }
  0x19   : > { %676 = vmatpush.bf16.msra.mxu2 %v662_v3  ;;  %677 = vmatpush.bf16.msra.mxu3 %v662_v3  ;;  %v216_v53 = vld [vmem:[%s766_s5 + $0xf8] sm:$0xff]  ;;  %v228_v54 = vpack.c.bf16 %v208_v49, %v207_v48 }
  0x1a   : > { %v232_v55 = vpack.c.bf16 %v216_v53, %v215_v52 }
  0x1c   : > { %301 = vmatpush.bf16.msra.mxu0 %v661_v4  ;;  %678 = vmatpush.bf16.msra.mxu1 %v661_v4 }
  0x1d   : > { %679 = vmatpush.bf16.msra.mxu2 %v661_v4  ;;  %680 = vmatpush.bf16.msra.mxu3 %v661_v4 }
  0x20   : > { %302 = vmatpush.bf16.msra.mxu0 %v660_v5  ;;  %681 = vmatpush.bf16.msra.mxu1 %v660_v5 }
  0x21   : > { %682 = vmatpush.bf16.msra.mxu2 %v660_v5  ;;  %683 = vmatpush.bf16.msra.mxu3 %v660_v5 }
  0x24   : > { %303 = vmatpush.bf16.msra.mxu0 %v659_v6  ;;  %684 = vmatpush.bf16.msra.mxu1 %v659_v6 }
  0x25   : > { %685 = vmatpush.bf16.msra.mxu2 %v659_v6  ;;  %686 = vmatpush.bf16.msra.mxu3 %v659_v6 }
  0x28   : > { %304 = vmatpush.bf16.msra.mxu0 %v658_v7  ;;  %687 = vmatpush.bf16.msra.mxu1 %v658_v7 }
  0x29   : > { %688 = vmatpush.bf16.msra.mxu2 %v658_v7  ;;  %689 = vmatpush.bf16.msra.mxu3 %v658_v7 }
  0x2b   : > { %305 = vmatmul.bf16.vlgmr.msra.gmra.mxu0 %v217_v14  ;;  %325 = vmatmul.bf16.vlgmr.msra.gmra.mxu1 %v221_v15 }
  0x2c   : > { %345 = vmatmul.bf16.vlgmr.msra.gmra.mxu2 %v225_v16  ;;  %365 = vmatmul.bf16.vlgmr.msra.gmra.mxu3 %v229_v19 }
  0x3b   : > { %310 = vmatmul.bf16.gmra.mxu0 %v218_v26  ;;  %330 = vmatmul.bf16.gmra.mxu1 %v222_v27 }
  0x3c   : > { %350 = vmatmul.bf16.gmra.mxu2 %v226_v28  ;;  %370 = vmatmul.bf16.gmra.mxu3 %v230_v31 }
  0x4b   : > { %315 = vmatmul.bf16.gmra.mxu0 %v219_v38  ;;  %335 = vmatmul.bf16.gmra.mxu1 %v223_v39 }
  0x4c   : > { %355 = vmatmul.bf16.gmra.mxu2 %v227_v42  ;;  %375 = vmatmul.bf16.gmra.mxu3 %v231_v43 }
  0x5b   : > { %320 = vmatmul.bf16.gmra.mxu0 %v220_v50  ;;  %340 = vmatmul.bf16.gmra.mxu1 %v224_v51 }
  0x5c   : > { %360 = vmatmul.bf16.gmra.mxu2 %v228_v54  ;;  %380 = vmatmul.bf16.gmra.mxu3 %v232_v55 }
  0xa8   : > { %v306_v56 = vpop.f32.mrf.mxu0  ;;  %v810_v57 = vpop.f32.mrf.mxu1 }
  0xa9   : > { %386 = vst [vmem:[%s808_s10] sm:$0xff] %v306_v56  ;;  %v455_v15 = vmul.f32 %v306_v56, %v306_v56  ;;  %v463_v43 = vmul.f32 %v810_v57, %v810_v57 }
  0xaa   : > { %394 = vst [vmem:[%s808_s10 + $0x40] sm:$0xff] %v810_v57 }
  0xaf   : > { %v815_v58 = vpop.f32.mrf.mxu2  ;;  %v822_v61 = vpop.f32.mrf.mxu3 }
  0xb0   : > { %v308_v59 = vpop.f32.mrf.mxu0  ;;  %v817_v60 = vpop.f32.mrf.mxu1  ;;  %402 = vst [vmem:[%s808_s10 + $0x80] sm:$0xff] %v815_v58 }
  0xb1   : > { %387 = vst [vmem:[%s808_s10 + $0x8] sm:$0xff] %v308_v59  ;;  %v456_v14 = vmul.f32 %v308_v59, %v308_v59  ;;  %v418_v16 = vadd.f32 %v308_v59, %v306_v56  ;;  %v464_v46 = vmul.f32 %v817_v60, %v817_v60 }
  0xb2   : > { %395 = vst [vmem:[%s808_s10 + $0x48] sm:$0xff] %v817_v60 }
  0xb3   : > { %410 = vst [vmem:[%s808_s10 + $0xc0] sm:$0xff] %v822_v61  ;;  %v487_v18 = vadd.f32 %v456_v14, %v455_v15 }
  0xb7   : > { %v828_v62 = vpop.f32.mrf.mxu2  ;;  %v835_v1 = vpop.f32.mrf.mxu3 }
  0xb8   : > { %v311_v63 = vpop.f32.mrf.mxu0  ;;  %v830_v0 = vpop.f32.mrf.mxu1  ;;  %403 = vst [vmem:[%s808_s10 + $0x88] sm:$0xff] %v828_v62 }
  0xb9   : > { %388 = vst [vmem:[%s808_s10 + $0x10] sm:$0xff] %v311_v63  ;;  %v457_v17 = vmul.f32 %v311_v63, %v311_v63  ;;  %v419_v19 = vadd.f32 %v418_v16, %v311_v63  ;;  %v465_v49 = vmul.f32 %v830_v0, %v830_v0 }
  0xba   : > { %396 = vst [vmem:[%s808_s10 + $0x50] sm:$0xff] %v830_v0 }
  0xbb   : > { %411 = vst [vmem:[%s808_s10 + $0xc8] sm:$0xff] %v835_v1  ;;  %v488_v24 = vadd.f32 %v487_v18, %v457_v17  ;;  %v471_v17 = vmul.f32 %v815_v58, %v815_v58 }
  0xbf   : > { %v841_v2 = vpop.f32.mrf.mxu2  ;;  %v848_v5 = vpop.f32.mrf.mxu3 }
  0xc0   : > { %v313_v3 = vpop.f32.mrf.mxu0  ;;  %v843_v4 = vpop.f32.mrf.mxu1  ;;  %404 = vst [vmem:[%s808_s10 + $0x90] sm:$0xff] %v841_v2 }
  0xc1   : > { %389 = vst [vmem:[%s808_s10 + $0x18] sm:$0xff] %v313_v3  ;;  %v458_v20 = vmul.f32 %v313_v3, %v313_v3  ;;  %v420_v25 = vadd.f32 %v419_v19, %v313_v3  ;;  %v466_v53 = vmul.f32 %v843_v4, %v843_v4 }
  0xc2   : > { %397 = vst [vmem:[%s808_s10 + $0x58] sm:$0xff] %v843_v4 }
  0xc3   : > { %412 = vst [vmem:[%s808_s10 + $0xd0] sm:$0xff] %v848_v5  ;;  %v489_v28 = vadd.f32 %v488_v24, %v458_v20 }
  0xc7   : > { %v854_v6 = vpop.f32.mrf.mxu2  ;;  %v861_v9 = vpop.f32.mrf.mxu3 }
  0xc8   : > { %v316_v7 = vpop.f32.mrf.mxu0  ;;  %v856_v8 = vpop.f32.mrf.mxu1  ;;  %405 = vst [vmem:[%s808_s10 + $0x98] sm:$0xff] %v854_v6 }
  0xc9   : > { %390 = vst [vmem:[%s808_s10 + $0x20] sm:$0xff] %v316_v7  ;;  %v459_v26 = vmul.f32 %v316_v7, %v316_v7  ;;  %v421_v29 = vadd.f32 %v420_v25, %v316_v7  ;;  %v474_v25 = vmul.f32 %v854_v6, %v854_v6 }
  0xca   : > { %398 = vst [vmem:[%s808_s10 + $0x60] sm:$0xff] %v856_v8 }
  0xcb   : > { %413 = vst [vmem:[%s808_s10 + $0xd8] sm:$0xff] %v861_v9  ;;  %v490_v31 = vadd.f32 %v489_v28, %v459_v26 }
  0xcf   : > { %v867_v10 = vpop.f32.mrf.mxu2  ;;  %v874_v13 = vpop.f32.mrf.mxu3 }
  0xd0   : > { %v318_v11 = vpop.f32.mrf.mxu0  ;;  %v869_v12 = vpop.f32.mrf.mxu1  ;;  %406 = vst [vmem:[%s808_s10 + $0xa0] sm:$0xff] %v867_v10 }
  0xd1   : > { %391 = vst [vmem:[%s808_s10 + $0x28] sm:$0xff] %v318_v11  ;;  %v460_v30 = vmul.f32 %v318_v11, %v318_v11  ;;  %v422_v32 = vadd.f32 %v421_v29, %v318_v11  ;;  %v468_v63 = vmul.f32 %v869_v12, %v869_v12 }
  0xd2   : > { %399 = vst [vmem:[%s808_s10 + $0x68] sm:$0xff] %v869_v12 }
  0xd3   : > { %414 = vst [vmem:[%s808_s10 + $0xe0] sm:$0xff] %v874_v13  ;;  %v491_v34 = vadd.f32 %v490_v31, %v460_v30 }
  0xd7   : > { %v880_v21 = vpop.f32.mrf.mxu2  ;;  %v885_v27 = vpop.f32.mrf.mxu3 }
  0xd8   : > { %v321_v22 = vpop.f32.mrf.mxu0  ;;  %v341_v23 = vpop.f32.mrf.mxu1  ;;  %407 = vst [vmem:[%s808_s10 + $0xa8] sm:$0xff] %v880_v21  ;;  %v476_v31 = vmul.f32 %v880_v21, %v880_v21 }
  0xd9   : > { %392 = vst [vmem:[%s808_s10 + $0x30] sm:$0xff] %v321_v22  ;;  %v461_v33 = vmul.f32 %v321_v22, %v321_v22  ;;  %v423_v35 = vadd.f32 %v422_v32, %v321_v22  ;;  %v469_v11 = vmul.f32 %v341_v23, %v341_v23 }
  0xda   : > { %400 = vst [vmem:[%s808_s10 + $0x70] sm:$0xff] %v341_v23 }
  0xdb   : > { %415 = vst [vmem:[%s808_s10 + $0xe8] sm:$0xff] %v885_v27  ;;  %v492_v39 = vadd.f32 %v491_v34, %v461_v33 }
  0xdf   : > { %v361_v36 = vpop.f32.mrf.mxu2  ;;  %v892_v42 = vpop.f32.mrf.mxu3 }
  0xe0   : > { %v323_v37 = vpop.f32.mrf.mxu0  ;;  %v343_v38 = vpop.f32.mrf.mxu1  ;;  %408 = vst [vmem:[%s808_s10 + $0xb0] sm:$0xff] %v361_v36  ;;  %v477_v34 = vmul.f32 %v361_v36, %v361_v36 }
  0xe1   : > { %393 = vst [vmem:[%s808_s10 + $0x38] sm:$0xff] %v323_v37  ;;  %v424_v40 = vadd.f32 %v423_v35, %v323_v37  ;;  %v462_v41 = vmul.f32 %v323_v37, %v323_v37 }
  0xe2   : > { %401 = vst [vmem:[%s808_s10 + $0x78] sm:$0xff] %v343_v38 }
  0xe3   : > { %v425_v44 = vadd.f32 %v424_v40, %v810_v57  ;;  %v493_v45 = vadd.f32 %v492_v39, %v462_v41  ;;  %416 = vst [vmem:[%s808_s10 + $0xf0] sm:$0xff] %v892_v42  ;;  %v467_v57 = vmul.f32 %v856_v8, %v856_v8 }
  0xe5   : > { %v426_v47 = vadd.f32 %v425_v44, %v817_v60  ;;  %v494_v48 = vadd.f32 %v493_v45, %v463_v43  ;;  %v482_v45 = vmul.f32 %v861_v9, %v861_v9 }
  0xe7   : > { %v427_v50 = vadd.f32 %v426_v47, %v830_v0  ;;  %v495_v51 = vadd.f32 %v494_v48, %v464_v46  ;;  %v363_v52 = vpop.f32.mrf.mxu2  ;;  %v383_v56 = vpop.f32.mrf.mxu3  ;;  %v483_v47 = vmul.f32 %v874_v13, %v874_v13 }
  0xe8   : > { %409 = vst [vmem:[%s808_s10 + $0xb8] sm:$0xff] %v363_v52 }
  0xe9   : > { %v496_v54 = vadd.f32 %v495_v51, %v465_v49  ;;  %v428_v55 = vadd.f32 %v427_v50, %v843_v4  ;;  %417 = vst [vmem:[%s808_s10 + $0xf8] sm:$0xff] %v383_v56  ;;  %v470_v4 = vmul.f32 %v343_v38, %v343_v38 }
  0xeb   : > { %v429_v59 = vadd.f32 %v428_v55, %v856_v8  ;;  %v497_v60 = vadd.f32 %v496_v54, %v466_v53  ;;  %v472_v8 = vmul.f32 %v828_v62, %v828_v62  ;;  %v485_v53 = vmul.f32 %v892_v42, %v892_v42 }
  0xec   : > { %v486_v55 = vmul.f32 %v383_v56, %v383_v56 }
  0xed   : > { %v430_v0 = vadd.f32 %v429_v59, %v869_v12  ;;  %v498_v3 = vadd.f32 %v497_v60, %v467_v57  ;;  %v473_v12 = vmul.f32 %v841_v2, %v841_v2 }
  0xef   : > { %v431_v7 = vadd.f32 %v430_v0, %v341_v23  ;;  %v499_v14 = vadd.f32 %v498_v3, %v468_v63 }
  0xf1   : > { %v500_v15 = vadd.f32 %v499_v14, %v469_v11  ;;  %v432_v16 = vadd.f32 %v431_v7, %v343_v38  ;;  %v478_v38 = vmul.f32 %v363_v52, %v363_v52 }
  0xf3   : > { %v433_v18 = vadd.f32 %v432_v16, %v815_v58  ;;  %v501_v19 = vadd.f32 %v500_v15, %v470_v4  ;;  %v475_v58 = vmul.f32 %v867_v10, %v867_v10 }
  0xf5   : > { %v434_v20 = vadd.f32 %v433_v18, %v828_v62  ;;  %v502_v22 = vadd.f32 %v501_v19, %v471_v17 }
  0xf7   : > { %v435_v23 = vadd.f32 %v434_v20, %v841_v2  ;;  %v503_v24 = vadd.f32 %v502_v22, %v472_v8 }
  0xf9   : > { %v504_v26 = vadd.f32 %v503_v24, %v473_v12  ;;  %v436_v28 = vadd.f32 %v435_v23, %v854_v6  ;;  %v479_v6 = vmul.f32 %v822_v61, %v822_v61 }
  0xfb   : > { %v437_v29 = vadd.f32 %v436_v28, %v867_v10  ;;  %v505_v30 = vadd.f32 %v504_v26, %v474_v25  ;;  %v480_v10 = vmul.f32 %v835_v1, %v835_v1 }
  0xfd   : > { %v438_v62 = vadd.f32 %v437_v29, %v880_v21  ;;  %v506_v32 = vadd.f32 %v505_v30, %v475_v58  ;;  %v481_v21 = vmul.f32 %v848_v5, %v848_v5 }
  0xff   : > { %v507_v2 = vadd.f32 %v506_v32, %v476_v31  ;;  %v439_v33 = vadd.f32 %v438_v62, %v361_v36 }
 0x101   : > { %v508_v35 = vadd.f32 %v507_v2, %v477_v34  ;;  %v440_v37 = vadd.f32 %v439_v33, %v363_v52 }
 0x103   : > { %v441_v39 = vadd.f32 %v440_v37, %v822_v61  ;;  %v509_v40 = vadd.f32 %v508_v35, %v478_v38 }
 0x105   : > { %v442_v41 = vadd.f32 %v441_v39, %v835_v1  ;;  %v510_v43 = vadd.f32 %v509_v40, %v479_v6 }
 0x107   : > { %v443_v36 = vadd.f32 %v442_v41, %v848_v5  ;;  %v511_v44 = vadd.f32 %v510_v43, %v480_v10  ;;  %v484_v5 = vmul.f32 %v885_v27, %v885_v27 }
 0x109   : > { %v512_v46 = vadd.f32 %v511_v44, %v481_v21  ;;  %v444_v61 = vadd.f32 %v443_v36, %v861_v9 }
 0x10b   : > { %v445_v48 = vadd.f32 %v444_v61, %v874_v13  ;;  %v513_v1 = vadd.f32 %v512_v46, %v482_v45 }
 0x10d   : > { %v446_v49 = vadd.f32 %v445_v48, %v885_v27  ;;  %v514_v50 = vadd.f32 %v513_v1, %v483_v47 }
 0x10f   : > { %v515_v51 = vadd.f32 %v514_v50, %v484_v5  ;;  %v447_v52 = vadd.f32 %v446_v49, %v892_v42 }
 0x111   : > { %v516_v9 = vadd.f32 %v515_v51, %v485_v53  ;;  %v448_v54 = vadd.f32 %v447_v52, %v383_v56 }
 0x113   : > { %v449_v57 = vrot.slane %v448_v54, 4  ;;  %v517_v59 = vadd.f32 %v516_v9, %v486_v55 }
 0x115   : > { %v450_v13 = vadd.f32 %v449_v57, %v448_v54  ;;  %v518_v60 = vrot.slane %v517_v59, 4 }
 0x117   : > { %v451_v63 = vrot.slane %v450_v13, 2  ;;  %v519_v0 = vadd.f32 %v518_v60, %v517_v59 }
 0x119   : > { %v452_v3 = vadd.f32 %v451_v63, %v450_v13  ;;  %v520_v27 = vrot.slane %v519_v0, 2 }
 0x11b   : > { %v453_v7 = vrot.slane %v452_v3, 1  ;;  %v521_v11 = vadd.f32 %v520_v27, %v519_v0 }
 0x11d   : > { %v522_v14 = vrot.slane %v521_v11, 1  ;;  %v454_v42 = vadd.f32 %v453_v7, %v452_v3 }
 0x11f   : > { %v523_v56 = vadd.f32 %v522_v14, %v521_v11 }
 0x121   : > { %v525_v15 = vsel %vm524_vm0, %v454_v42, %v523_v56 }
 0x122   : > { %526 = vst [vmem:[%s184_s16] sm:$0x3] %v525_v15 }
 0x123 PF: > { %s14_s12 = sadd.s32 1, %s704_s12  }
 0x124   : > { %p11_p5 = scmp.ge.s32.totalorder %s14_s12, 4  }
 0x126   :  { %13 = sbr.rel (!%p11_p5) target bundleno = 1 (0x1), region = 70 }

// kernel: bottleneck_forward.6
= control target key start
LH: loop header
LB: loop body
LE: loop exit
PB: predicated region body
PF: predicated region fallthrough
CT: control target
= control target key end

     0   :  { %s896_s18 = smov 0   ;;  %s1208_s0 = inlined_call_operand.vmem [shape: f32[512,128], index: 0, kind: input, shape index: {}]   ;;  %s1209_s1 = inlined_call_operand.vmem [shape: f32[1,128], index: 1, kind: input, shape index: {}]   ;;  %s1210_s2 = inlined_call_operand.vmem [shape: f32[1,128], index: 2, kind: input, shape index: {}]   ;;  %s1211_s3 = inlined_call_operand.vmem [shape: bf16[128,128], index: 3, kind: input, shape index: {}]   ;;  %s1212_s4 = inlined_call_operand.vmem [shape: f32[512,128], index: 4, kind: output, shape index: {0}]   ;;  %s1213_s5 = inlined_call_operand.vmem [shape: f32[2,2,128], index: 5, kind: output, shape index: {1}]  }
   0x1 LB: > { %s902_s19 = sadd.s32 4294967295, %s864_s18   ;;  %p776_p0 = scmp.ge.s32.totalorder %s864_s18, 1  ;;  %s864_s18 = sphi %s896_s18, %s16_s18  }
   0x2   : > { %p191_p1 = scmp.lt.s32.totalorder %s864_s18, 3 }
   0x4   : > { %p192_p2 = pnand %p776_p0, %p191_p1 }
   0x5   : > { %s777_s22 = sshll.u32 (!%p192_p2), %s902_s19, 5  ;;  %p235_p4 = scmp.lt.s32.totalorder (!%p192_p2), %s902_s19, 1 }
   0x6   : > { %195 = sbr.rel (%p192_p2) target bundleno = 291 (0x123), region = 36  ;;  %p224_p3 = scmp.lt.s32.totalorder (!%p192_p2), %s777_s22, 63 }
   0xb   : > { %v823_v0 = vld [vmem:[%s1211_s3 + $0x38] sm:$0xff]  ;;  %v822_v1 = vld [vmem:[%s1211_s3 + $0x30] sm:$0xff]  ;;  %s1215_s22 = smov (!%p224_p3, %s777_s22), 63  ;;  %v821_v2 = vld [vmem:[%s1211_s3 + $0x28] sm:$0xff]  ;;  %s1217_s19 = smov (!%p235_p4, %s902_s19), 1  ;;  %vm682_vm0 = vcmask 1040384  }
   0xc   : > { %455 = vmatpush.bf16.msra.mxu0 %v823_v0  ;;  %824 = vmatpush.bf16.msra.mxu1 %v823_v0  ;;  %s778_s27 = sshll.u32 %s1215_s22, 3  ;;  %v820_v3 = vld [vmem:[%s1211_s3 + $0x20] sm:$0xff]  ;;  %v819_v4 = vld [vmem:[%s1211_s3 + $0x18] sm:$0xff]  ;;  %v818_v17 = vld [vmem:[%s1211_s3 + $0x10] sm:$0xff]  ;;  %s781_s22 = sshll.u32 %s1217_s19, 1 }
   0xd   : > { %825 = vmatpush.bf16.msra.mxu2 %v823_v0  ;;  %826 = vmatpush.bf16.msra.mxu3 %v823_v0  ;;  %s927_s7 = scalar_lea.vmem %s1208_s0, %s778_s27  ;;  %v936_v6 = vld [vmem:[%s1209_s1] ss:$0 sm:$0xff]  ;;  %v817_v24 = vld [vmem:[%s1211_s3 + $0x8] sm:$0xff]  ;;  %s1052_s25 = scalar_lea.vmem %s1212_s4, %s778_s27 }
   0xe   : > { %v239_v5 = vld [vmem:[%s927_s7] sm:$0xff]  ;;  %v240_v7 = vld [vmem:[%s927_s7 + $0x8] sm:$0xff]  ;;  %v241_v40 = vld [vmem:[%s927_s7 + $0x10] sm:$0xff]  ;;  %s238_s28 = scalar_lea.vmem %s1213_s5, %s781_s22 }
   0xf   : > { %v247_v8 = vld [vmem:[%s927_s7 + $0x40] sm:$0xff]  ;;  %v248_v9 = vld [vmem:[%s927_s7 + $0x48] sm:$0xff]  ;;  %v275_v12 = vmul.f32 %v936_v6, %v239_v5  ;;  %v276_v13 = vmul.f32 %v936_v6, %v240_v7  ;;  %v242_v42 = vld [vmem:[%s927_s7 + $0x18] sm:$0xff]  ;;  %v277_v50 = vmul.f32 %v936_v6, %v241_v40 }
  0x10   : > { %456 = vmatpush.bf16.msra.mxu0 %v822_v1  ;;  %827 = vmatpush.bf16.msra.mxu1 %v822_v1  ;;  %v255_v10 = vld [vmem:[%s927_s7 + $0x80] sm:$0xff]  ;;  %v256_v11 = vld [vmem:[%s927_s7 + $0x88] sm:$0xff]  ;;  %v283_v15 = vmul.f32 %v936_v6, %v247_v8  ;;  %v284_v16 = vmul.f32 %v936_v6, %v248_v9  ;;  %v249_v44 = vld [vmem:[%s927_s7 + $0x50] sm:$0xff]  ;;  %v278_v52 = vmul.f32 %v936_v6, %v242_v42 }
  0x11   : > { %828 = vmatpush.bf16.msra.mxu2 %v822_v1  ;;  %829 = vmatpush.bf16.msra.mxu3 %v822_v1  ;;  %v948_v14 = vld [vmem:[%s1210_s2] ss:$0 sm:$0xff]  ;;  %v291_v18 = vmul.f32 %v936_v6, %v255_v10  ;;  %v292_v19 = vmul.f32 %v936_v6, %v256_v11  ;;  %v264_v35 = vld [vmem:[%s927_s7 + $0xc8] sm:$0xff]  ;;  %v250_v45 = vld [vmem:[%s927_s7 + $0x58] sm:$0xff]  ;;  %v285_v53 = vmul.f32 %v936_v6, %v249_v44 }
  0x12   : > { %v311_v20 = vadd.f32 %v948_v14, %v275_v12  ;;  %v312_v21 = vadd.f32 %v948_v14, %v276_v13  ;;  %v319_v22 = vadd.f32 %v948_v14, %v283_v15  ;;  %v320_v23 = vadd.f32 %v948_v14, %v284_v16  ;;  %v816_v31 = vld [vmem:[%s1211_s3] sm:$0xff]  ;;  %v257_v47 = vld [vmem:[%s927_s7 + $0x90] sm:$0xff]  ;;  %v258_v48 = vld [vmem:[%s927_s7 + $0x98] sm:$0xff] }
  0x13   : > { %v327_v25 = vadd.f32 %v948_v14, %v291_v18  ;;  %v328_v26 = vadd.f32 %v948_v14, %v292_v19  ;;  %v263_v34 = vld [vmem:[%s927_s7 + $0xc0] sm:$0xff]  ;;  %v300_v37 = vmul.f32 %v936_v6, %v264_v35  ;;  %v286_v54 = vmul.f32 %v936_v6, %v250_v45  ;;  %v265_v7 = vld [vmem:[%s927_s7 + $0xd0] sm:$0xff]  ;;  %v266_v8 = vld [vmem:[%s927_s7 + $0xd8] sm:$0xff] }
  0x14   : > { %457 = vmatpush.bf16.msra.mxu0 %v821_v2  ;;  %830 = vmatpush.bf16.msra.mxu1 %v821_v2  ;;  %v343_v27 = vmax.f32 %v311_v20, 0.0  ;;  %v344_v28 = vmax.f32 %v312_v21, 0.0  ;;  %v351_v29 = vmax.f32 %v319_v22, 0.0  ;;  %v352_v30 = vmax.f32 %v320_v23, 0.0  ;;  %v243_v13 = vld [vmem:[%s927_s7 + $0x20] sm:$0xff]  ;;  %v244_v16 = vld [vmem:[%s927_s7 + $0x28] sm:$0xff] }
  0x15   : > { %831 = vmatpush.bf16.msra.mxu2 %v821_v2  ;;  %832 = vmatpush.bf16.msra.mxu3 %v821_v2  ;;  %v359_v32 = vmax.f32 %v327_v25, 0.0  ;;  %v360_v33 = vmax.f32 %v328_v26, 0.0  ;;  %v299_v36 = vmul.f32 %v936_v6, %v263_v34  ;;  %v336_v46 = vadd.f32 %v948_v14, %v300_v37  ;;  %v251_v18 = vld [vmem:[%s927_s7 + $0x60] sm:$0xff]  ;;  %v252_v19 = vld [vmem:[%s927_s7 + $0x68] sm:$0xff] }
  0x16   : > { %v375_v38 = vpack.c.bf16 %v344_v28, %v343_v27  ;;  %v379_v39 = vpack.c.bf16 %v352_v30, %v351_v29  ;;  %v293_v55 = vmul.f32 %v936_v6, %v257_v47  ;;  %v294_v56 = vmul.f32 %v936_v6, %v258_v48  ;;  %v259_v21 = vld [vmem:[%s927_s7 + $0xa0] sm:$0xff]  ;;  %v260_v22 = vld [vmem:[%s927_s7 + $0xa8] sm:$0xff] }
  0x17   : > { %v335_v41 = vadd.f32 %v948_v14, %v299_v36  ;;  %v383_v43 = vpack.c.bf16 %v360_v33, %v359_v32  ;;  %v368_v51 = vmax.f32 %v336_v46, 0.0  ;;  %v313_v58 = vadd.f32 %v948_v14, %v277_v50  ;;  %v267_v32 = vld [vmem:[%s927_s7 + $0xe0] sm:$0xff]  ;;  %v268_v33 = vld [vmem:[%s927_s7 + $0xe8] sm:$0xff] }
  0x18   : > { %458 = vmatpush.bf16.msra.mxu0 %v820_v3  ;;  %833 = vmatpush.bf16.msra.mxu1 %v820_v3  ;;  %v314_v59 = vadd.f32 %v948_v14, %v278_v52  ;;  %v321_v60 = vadd.f32 %v948_v14, %v285_v53  ;;  %v322_v61 = vadd.f32 %v948_v14, %v286_v54  ;;  %v245_v54 = vld [vmem:[%s927_s7 + $0x30] sm:$0xff] }
  0x19   : > { %834 = vmatpush.bf16.msra.mxu2 %v820_v3  ;;  %835 = vmatpush.bf16.msra.mxu3 %v820_v3  ;;  %v367_v49 = vmax.f32 %v335_v41, 0.0  ;;  %v329_v62 = vadd.f32 %v948_v14, %v293_v55  ;;  %v330_v63 = vadd.f32 %v948_v14, %v294_v56  ;;  %v345_v0 = vmax.f32 %v313_v58, 0.0  ;;  %v246_v55 = vld [vmem:[%s927_s7 + $0x38] sm:$0xff] }
  0x1a   : > { %v346_v1 = vmax.f32 %v314_v59, 0.0  ;;  %v353_v2 = vmax.f32 %v321_v60, 0.0  ;;  %v354_v3 = vmax.f32 %v322_v61, 0.0  ;;  %v301_v9 = vmul.f32 %v936_v6, %v265_v7  ;;  %v254_v58 = vld [vmem:[%s927_s7 + $0x78] sm:$0xff]  ;;  %v261_v59 = vld [vmem:[%s927_s7 + $0xb0] sm:$0xff] }
  0x1b   : > { %v387_v57 = vpack.c.bf16 %v368_v51, %v367_v49  ;;  %v362_v5 = vmax.f32 %v330_v63, 0.0  ;;  %v302_v10 = vmul.f32 %v936_v6, %v266_v8  ;;  %v280_v26 = vmul.f32 %v936_v6, %v244_v16  ;;  %v262_v60 = vld [vmem:[%s927_s7 + $0xb8] sm:$0xff] }
  0x1c   : > { %459 = vmatpush.bf16.msra.mxu0 %v819_v4  ;;  %836 = vmatpush.bf16.msra.mxu1 %v819_v4  ;;  %v376_v11 = vpack.c.bf16 %v346_v1, %v345_v0  ;;  %v380_v12 = vpack.c.bf16 %v354_v3, %v353_v2  ;;  %v337_v15 = vadd.f32 %v948_v14, %v301_v9  ;;  %v269_v2 = vld [vmem:[%s927_s7 + $0xf0] sm:$0xff]  ;;  %v270_v3 = vld [vmem:[%s927_s7 + $0xf8] sm:$0xff] }
  0x1d   : > { %837 = vmatpush.bf16.msra.mxu2 %v819_v4  ;;  %838 = vmatpush.bf16.msra.mxu3 %v819_v4  ;;  %v361_v4 = vmax.f32 %v329_v62, 0.0  ;;  %v338_v20 = vadd.f32 %v948_v14, %v302_v10  ;;  %v287_v27 = vmul.f32 %v936_v6, %v251_v18  ;;  %v288_v28 = vmul.f32 %v936_v6, %v252_v19 }
  0x1e   : > { %v369_v23 = vmax.f32 %v337_v15, 0.0  ;;  %v295_v29 = vmul.f32 %v936_v6, %v259_v21  ;;  %v296_v30 = vmul.f32 %v936_v6, %v260_v22  ;;  %v303_v34 = vmul.f32 %v936_v6, %v267_v32 }
  0x1f   : > { %v370_v25 = vmax.f32 %v338_v20, 0.0  ;;  %v304_v35 = vmul.f32 %v936_v6, %v268_v33  ;;  %v316_v37 = vadd.f32 %v948_v14, %v280_v26  ;;  %v281_v61 = vmul.f32 %v936_v6, %v245_v54 }
  0x20   : > { %460 = vmatpush.bf16.msra.mxu0 %v818_v17  ;;  %839 = vmatpush.bf16.msra.mxu1 %v818_v17  ;;  %v331_v40 = vadd.f32 %v948_v14, %v295_v29  ;;  %v332_v41 = vadd.f32 %v948_v14, %v296_v30  ;;  %v339_v42 = vadd.f32 %v948_v14, %v303_v34 }
  0x21   : > { %840 = vmatpush.bf16.msra.mxu2 %v818_v17  ;;  %841 = vmatpush.bf16.msra.mxu3 %v818_v17  ;;  %v384_v17 = vpack.c.bf16 %v362_v5, %v361_v4  ;;  %v348_v45 = vmax.f32 %v316_v37, 0.0  ;;  %v282_v63 = vmul.f32 %v936_v6, %v246_v55  ;;  %v290_v1 = vmul.f32 %v936_v6, %v254_v58 }
  0x22   : > { %v363_v48 = vmax.f32 %v331_v40, 0.0  ;;  %v364_v49 = vmax.f32 %v332_v41, 0.0  ;;  %v371_v50 = vmax.f32 %v339_v42, 0.0  ;;  %v297_v4 = vmul.f32 %v936_v6, %v261_v59 }
  0x23   : > { %v298_v5 = vmul.f32 %v936_v6, %v262_v60  ;;  %v305_v7 = vmul.f32 %v936_v6, %v269_v2  ;;  %v306_v8 = vmul.f32 %v936_v6, %v270_v3  ;;  %v317_v9 = vadd.f32 %v948_v14, %v281_v61 }
  0x24   : > { %461 = vmatpush.bf16.msra.mxu0 %v817_v24  ;;  %842 = vmatpush.bf16.msra.mxu1 %v817_v24  ;;  %v385_v56 = vpack.c.bf16 %v364_v49, %v363_v48  ;;  %v318_v10 = vadd.f32 %v948_v14, %v282_v63 }
  0x25   : > { %843 = vmatpush.bf16.msra.mxu2 %v817_v24  ;;  %844 = vmatpush.bf16.msra.mxu3 %v817_v24  ;;  %v279_v24 = vmul.f32 %v936_v6, %v243_v13  ;;  %v333_v13 = vadd.f32 %v948_v14, %v297_v4  ;;  %v334_v15 = vadd.f32 %v948_v14, %v298_v5  ;;  %v349_v18 = vmax.f32 %v317_v9, 0.0 }
  0x26   : > { %v341_v16 = vadd.f32 %v948_v14, %v305_v7  ;;  %v350_v19 = vmax.f32 %v318_v10, 0.0 }
  0x27   : > { %v315_v36 = vadd.f32 %v948_v14, %v279_v24  ;;  %v365_v21 = vmax.f32 %v333_v13, 0.0  ;;  %v366_v22 = vmax.f32 %v334_v15, 0.0 }
  0x28   : > { %462 = vmatpush.bf16.msra.mxu0 %v816_v31  ;;  %845 = vmatpush.bf16.msra.mxu1 %v816_v31 }
  0x29   : > { %846 = vmatpush.bf16.msra.mxu2 %v816_v31  ;;  %847 = vmatpush.bf16.msra.mxu3 %v816_v31  ;;  %v388_v31 = vpack.c.bf16 %v370_v25, %v369_v23  ;;  %v347_v44 = vmax.f32 %v315_v36, 0.0  ;;  %v373_v23 = vmax.f32 %v341_v16, 0.0  ;;  %v378_v25 = vpack.c.bf16 %v350_v19, %v349_v18 }
  0x2b   : > { %463 = vmatmul.bf16.vlgmr.msra.gmra.mxu0 %v375_v38  ;;  %483 = vmatmul.bf16.vlgmr.msra.gmra.mxu1 %v379_v39  ;;  %v323_v38 = vadd.f32 %v948_v14, %v287_v27  ;;  %v324_v39 = vadd.f32 %v948_v14, %v288_v28  ;;  %v377_v52 = vpack.c.bf16 %v348_v45, %v347_v44 }
  0x2c   : > { %503 = vmatmul.bf16.vlgmr.msra.gmra.mxu2 %v383_v43  ;;  %523 = vmatmul.bf16.vlgmr.msra.gmra.mxu3 %v387_v57  ;;  %v340_v43 = vadd.f32 %v948_v14, %v304_v35  ;;  %v253_v57 = vld [vmem:[%s927_s7 + $0x70] sm:$0xff]  ;;  %v386_v27 = vpack.c.bf16 %v366_v22, %v365_v21 }
  0x2d   : > { %v355_v46 = vmax.f32 %v323_v38, 0.0  ;;  %v356_v47 = vmax.f32 %v324_v39, 0.0  ;;  %v289_v0 = vmul.f32 %v936_v6, %v253_v57 }
  0x2e   : > { %v372_v51 = vmax.f32 %v340_v43, 0.0 }
  0x2f   : > { %v381_v53 = vpack.c.bf16 %v356_v47, %v355_v46 }
  0x30   : > { %v389_v62 = vpack.c.bf16 %v372_v51, %v371_v50 }
  0x3b   : > { %468 = vmatmul.bf16.gmra.mxu0 %v376_v11  ;;  %488 = vmatmul.bf16.gmra.mxu1 %v380_v12  ;;  %v325_v11 = vadd.f32 %v948_v14, %v289_v0  ;;  %v326_v12 = vadd.f32 %v948_v14, %v290_v1 }
  0x3c   : > { %508 = vmatmul.bf16.gmra.mxu2 %v384_v17  ;;  %528 = vmatmul.bf16.gmra.mxu3 %v388_v31  ;;  %v342_v17 = vadd.f32 %v948_v14, %v306_v8 }
  0x3d   : > { %v357_v6 = vmax.f32 %v325_v11, 0.0  ;;  %v358_v20 = vmax.f32 %v326_v12, 0.0 }
  0x3e   : > { %v374_v24 = vmax.f32 %v342_v17, 0.0 }
  0x3f   : > { %v382_v26 = vpack.c.bf16 %v358_v20, %v357_v6 }
  0x40   : > { %v390_v28 = vpack.c.bf16 %v374_v24, %v373_v23 }
  0x4b   : > { %473 = vmatmul.bf16.gmra.mxu0 %v377_v52  ;;  %493 = vmatmul.bf16.gmra.mxu1 %v381_v53 }
  0x4c   : > { %513 = vmatmul.bf16.gmra.mxu2 %v385_v56  ;;  %533 = vmatmul.bf16.gmra.mxu3 %v389_v62 }
  0x5b   : > { %478 = vmatmul.bf16.gmra.mxu0 %v378_v25  ;;  %498 = vmatmul.bf16.gmra.mxu1 %v382_v26 }
  0x5c   : > { %518 = vmatmul.bf16.gmra.mxu2 %v386_v27  ;;  %538 = vmatmul.bf16.gmra.mxu3 %v390_v28 }
  0xa8   : > { %v464_v14 = vpop.f32.mrf.mxu0  ;;  %v1054_v29 = vpop.f32.mrf.mxu1 }
  0xa9   : > { %544 = vst [vmem:[%s1052_s25] sm:$0xff] %v464_v14  ;;  %v613_v51 = vmul.f32 %v464_v14, %v464_v14  ;;  %v621_v17 = vmul.f32 %v1054_v29, %v1054_v29 }
  0xaa   : > { %552 = vst [vmem:[%s1052_s25 + $0x40] sm:$0xff] %v1054_v29 }
  0xaf   : > { %v1059_v30 = vpop.f32.mrf.mxu2  ;;  %v1066_v33 = vpop.f32.mrf.mxu3 }
  0xb0   : > { %v466_v31 = vpop.f32.mrf.mxu0  ;;  %v1061_v32 = vpop.f32.mrf.mxu1  ;;  %560 = vst [vmem:[%s1052_s25 + $0x80] sm:$0xff] %v1059_v30 }
  0xb1   : > { %545 = vst [vmem:[%s1052_s25 + $0x8] sm:$0xff] %v466_v31  ;;  %v614_v50 = vmul.f32 %v466_v31, %v466_v31  ;;  %v576_v52 = vadd.f32 %v466_v31, %v464_v14  ;;  %v622_v6 = vmul.f32 %v1061_v32, %v1061_v32 }
  0xb2   : > { %553 = vst [vmem:[%s1052_s25 + $0x48] sm:$0xff] %v1061_v32 }
  0xb3   : > { %568 = vst [vmem:[%s1052_s25 + $0xc0] sm:$0xff] %v1066_v33  ;;  %v645_v54 = vadd.f32 %v614_v50, %v613_v51 }
  0xb7   : > { %v1072_v34 = vpop.f32.mrf.mxu2  ;;  %v1079_v37 = vpop.f32.mrf.mxu3 }
  0xb8   : > { %v469_v35 = vpop.f32.mrf.mxu0  ;;  %v1074_v36 = vpop.f32.mrf.mxu1  ;;  %561 = vst [vmem:[%s1052_s25 + $0x88] sm:$0xff] %v1072_v34 }
  0xb9   : > { %546 = vst [vmem:[%s1052_s25 + $0x10] sm:$0xff] %v469_v35  ;;  %v615_v53 = vmul.f32 %v469_v35, %v469_v35  ;;  %v577_v55 = vadd.f32 %v576_v52, %v469_v35  ;;  %v623_v22 = vmul.f32 %v1074_v36, %v1074_v36 }
  0xba   : > { %554 = vst [vmem:[%s1052_s25 + $0x50] sm:$0xff] %v1074_v36 }
  0xbb   : > { %569 = vst [vmem:[%s1052_s25 + $0xc8] sm:$0xff] %v1079_v37  ;;  %v646_v60 = vadd.f32 %v645_v54, %v615_v53  ;;  %v629_v53 = vmul.f32 %v1059_v30, %v1059_v30 }
  0xbf   : > { %v1085_v38 = vpop.f32.mrf.mxu2  ;;  %v1092_v41 = vpop.f32.mrf.mxu3 }
  0xc0   : > { %v471_v39 = vpop.f32.mrf.mxu0  ;;  %v1087_v40 = vpop.f32.mrf.mxu1  ;;  %562 = vst [vmem:[%s1052_s25 + $0x90] sm:$0xff] %v1085_v38 }
  0xc1   : > { %547 = vst [vmem:[%s1052_s25 + $0x18] sm:$0xff] %v471_v39  ;;  %v616_v56 = vmul.f32 %v471_v39, %v471_v39  ;;  %v578_v61 = vadd.f32 %v577_v55, %v471_v39  ;;  %v624_v26 = vmul.f32 %v1087_v40, %v1087_v40 }
  0xc2   : > { %555 = vst [vmem:[%s1052_s25 + $0x58] sm:$0xff] %v1087_v40 }
  0xc3   : > { %570 = vst [vmem:[%s1052_s25 + $0xd0] sm:$0xff] %v1092_v41  ;;  %v647_v0 = vadd.f32 %v646_v60, %v616_v56 }
  0xc7   : > { %v1098_v42 = vpop.f32.mrf.mxu2  ;;  %v1105_v45 = vpop.f32.mrf.mxu3 }
  0xc8   : > { %v474_v43 = vpop.f32.mrf.mxu0  ;;  %v1100_v44 = vpop.f32.mrf.mxu1  ;;  %563 = vst [vmem:[%s1052_s25 + $0x98] sm:$0xff] %v1098_v42 }
  0xc9   : > { %548 = vst [vmem:[%s1052_s25 + $0x20] sm:$0xff] %v474_v43  ;;  %v617_v62 = vmul.f32 %v474_v43, %v474_v43  ;;  %v579_v1 = vadd.f32 %v578_v61, %v474_v43  ;;  %v632_v61 = vmul.f32 %v1098_v42, %v1098_v42 }
  0xca   : > { %556 = vst [vmem:[%s1052_s25 + $0x60] sm:$0xff] %v1100_v44 }
  0xcb   : > { %571 = vst [vmem:[%s1052_s25 + $0xd8] sm:$0xff] %v1105_v45  ;;  %v648_v3 = vadd.f32 %v647_v0, %v617_v62 }
  0xcf   : > { %v1111_v46 = vpop.f32.mrf.mxu2  ;;  %v1118_v49 = vpop.f32.mrf.mxu3 }
  0xd0   : > { %v476_v47 = vpop.f32.mrf.mxu0  ;;  %v1113_v48 = vpop.f32.mrf.mxu1  ;;  %564 = vst [vmem:[%s1052_s25 + $0xa0] sm:$0xff] %v1111_v46 }
  0xd1   : > { %549 = vst [vmem:[%s1052_s25 + $0x28] sm:$0xff] %v476_v47  ;;  %v618_v2 = vmul.f32 %v476_v47, %v476_v47  ;;  %v580_v4 = vadd.f32 %v579_v1, %v476_v47  ;;  %v626_v35 = vmul.f32 %v1113_v48, %v1113_v48 }
  0xd2   : > { %557 = vst [vmem:[%s1052_s25 + $0x68] sm:$0xff] %v1113_v48 }
  0xd3   : > { %572 = vst [vmem:[%s1052_s25 + $0xe0] sm:$0xff] %v1118_v49  ;;  %v649_v7 = vadd.f32 %v648_v3, %v618_v2 }
  0xd7   : > { %v1124_v57 = vpop.f32.mrf.mxu2  ;;  %v1129_v63 = vpop.f32.mrf.mxu3 }
  0xd8   : > { %v479_v58 = vpop.f32.mrf.mxu0  ;;  %v499_v59 = vpop.f32.mrf.mxu1  ;;  %565 = vst [vmem:[%s1052_s25 + $0xa8] sm:$0xff] %v1124_v57  ;;  %v634_v3 = vmul.f32 %v1124_v57, %v1124_v57 }
  0xd9   : > { %550 = vst [vmem:[%s1052_s25 + $0x30] sm:$0xff] %v479_v58  ;;  %v619_v5 = vmul.f32 %v479_v58, %v479_v58  ;;  %v581_v8 = vadd.f32 %v580_v4, %v479_v58  ;;  %v627_v47 = vmul.f32 %v499_v59, %v499_v59 }
  0xda   : > { %558 = vst [vmem:[%s1052_s25 + $0x70] sm:$0xff] %v499_v59 }
  0xdb   : > { %573 = vst [vmem:[%s1052_s25 + $0xe8] sm:$0xff] %v1129_v63  ;;  %v650_v12 = vadd.f32 %v649_v7, %v619_v5 }
  0xdf   : > { %v519_v9 = vpop.f32.mrf.mxu2  ;;  %v1136_v16 = vpop.f32.mrf.mxu3 }
  0xe0   : > { %v481_v10 = vpop.f32.mrf.mxu0  ;;  %v501_v11 = vpop.f32.mrf.mxu1  ;;  %566 = vst [vmem:[%s1052_s25 + $0xb0] sm:$0xff] %v519_v9  ;;  %v635_v7 = vmul.f32 %v519_v9, %v519_v9 }
  0xe1   : > { %551 = vst [vmem:[%s1052_s25 + $0x38] sm:$0xff] %v481_v10  ;;  %v582_v13 = vadd.f32 %v581_v8, %v481_v10  ;;  %v620_v15 = vmul.f32 %v481_v10, %v481_v10 }
  0xe2   : > { %559 = vst [vmem:[%s1052_s25 + $0x78] sm:$0xff] %v501_v11 }
  0xe3   : > { %v583_v18 = vadd.f32 %v582_v13, %v1054_v29  ;;  %v651_v19 = vadd.f32 %v650_v12, %v620_v15  ;;  %574 = vst [vmem:[%s1052_s25 + $0xf0] sm:$0xff] %v1136_v16  ;;  %v625_v29 = vmul.f32 %v1100_v44, %v1100_v44 }
  0xe5   : > { %v584_v20 = vadd.f32 %v583_v18, %v1061_v32  ;;  %v652_v21 = vadd.f32 %v651_v19, %v621_v17  ;;  %v640_v19 = vmul.f32 %v1105_v45, %v1105_v45 }
  0xe7   : > { %v585_v23 = vadd.f32 %v584_v20, %v1074_v36  ;;  %v653_v24 = vadd.f32 %v652_v21, %v622_v6  ;;  %v521_v25 = vpop.f32.mrf.mxu2  ;;  %v541_v14 = vpop.f32.mrf.mxu3  ;;  %v641_v20 = vmul.f32 %v1118_v49, %v1118_v49 }
  0xe8   : > { %567 = vst [vmem:[%s1052_s25 + $0xb8] sm:$0xff] %v521_v25 }
  0xe9   : > { %v654_v27 = vadd.f32 %v653_v24, %v623_v22  ;;  %v586_v28 = vadd.f32 %v585_v23, %v1087_v40  ;;  %575 = vst [vmem:[%s1052_s25 + $0xf8] sm:$0xff] %v541_v14  ;;  %v628_v40 = vmul.f32 %v501_v11, %v501_v11 }
  0xeb   : > { %v587_v31 = vadd.f32 %v586_v28, %v1100_v44  ;;  %v655_v32 = vadd.f32 %v654_v27, %v624_v26  ;;  %v630_v44 = vmul.f32 %v1072_v34, %v1072_v34  ;;  %v643_v26 = vmul.f32 %v1136_v16, %v1136_v16 }
  0xec   : > { %v644_v28 = vmul.f32 %v541_v14, %v541_v14 }
  0xed   : > { %v588_v36 = vadd.f32 %v587_v31, %v1113_v48  ;;  %v656_v39 = vadd.f32 %v655_v32, %v625_v29  ;;  %v631_v48 = vmul.f32 %v1085_v38, %v1085_v38 }
  0xef   : > { %v589_v43 = vadd.f32 %v588_v36, %v499_v59  ;;  %v657_v50 = vadd.f32 %v656_v39, %v626_v35 }
  0xf1   : > { %v658_v51 = vadd.f32 %v657_v50, %v627_v47  ;;  %v590_v52 = vadd.f32 %v589_v43, %v501_v11  ;;  %v636_v11 = vmul.f32 %v521_v25, %v521_v25 }
  0xf3   : > { %v591_v54 = vadd.f32 %v590_v52, %v1059_v30  ;;  %v659_v55 = vadd.f32 %v658_v51, %v628_v40  ;;  %v633_v30 = vmul.f32 %v1111_v46, %v1111_v46 }
  0xf5   : > { %v592_v56 = vadd.f32 %v591_v54, %v1072_v34  ;;  %v660_v58 = vadd.f32 %v659_v55, %v629_v53 }
  0xf7   : > { %v593_v59 = vadd.f32 %v592_v56, %v1085_v38  ;;  %v661_v60 = vadd.f32 %v660_v58, %v630_v44 }
  0xf9   : > { %v662_v62 = vadd.f32 %v661_v60, %v631_v48  ;;  %v594_v0 = vadd.f32 %v593_v59, %v1098_v42  ;;  %v637_v42 = vmul.f32 %v1066_v33, %v1066_v33 }
  0xfb   : > { %v595_v1 = vadd.f32 %v594_v0, %v1111_v46  ;;  %v663_v2 = vadd.f32 %v662_v62, %v632_v61  ;;  %v638_v46 = vmul.f32 %v1079_v37, %v1079_v37 }
  0xfd   : > { %v596_v34 = vadd.f32 %v595_v1, %v1124_v57  ;;  %v664_v4 = vadd.f32 %v663_v2, %v633_v30  ;;  %v639_v57 = vmul.f32 %v1092_v41, %v1092_v41 }
  0xff   : > { %v665_v38 = vadd.f32 %v664_v4, %v634_v3  ;;  %v597_v5 = vadd.f32 %v596_v34, %v519_v9 }
 0x101   : > { %v666_v8 = vadd.f32 %v665_v38, %v635_v7  ;;  %v598_v10 = vadd.f32 %v597_v5, %v521_v25 }
 0x103   : > { %v599_v12 = vadd.f32 %v598_v10, %v1066_v33  ;;  %v667_v13 = vadd.f32 %v666_v8, %v636_v11 }
 0x105   : > { %v600_v15 = vadd.f32 %v599_v12, %v1079_v37  ;;  %v668_v17 = vadd.f32 %v667_v13, %v637_v42 }
 0x107   : > { %v601_v9 = vadd.f32 %v600_v15, %v1092_v41  ;;  %v669_v18 = vadd.f32 %v668_v17, %v638_v46  ;;  %v642_v41 = vmul.f32 %v1129_v63, %v1129_v63 }
 0x109   : > { %v670_v6 = vadd.f32 %v669_v18, %v639_v57  ;;  %v602_v33 = vadd.f32 %v601_v9, %v1105_v45 }
 0x10b   : > { %v603_v21 = vadd.f32 %v602_v33, %v1118_v49  ;;  %v671_v37 = vadd.f32 %v670_v6, %v640_v19 }
 0x10d   : > { %v604_v22 = vadd.f32 %v603_v21, %v1129_v63  ;;  %v672_v23 = vadd.f32 %v671_v37, %v641_v20 }
 0x10f   : > { %v673_v24 = vadd.f32 %v672_v23, %v642_v41  ;;  %v605_v25 = vadd.f32 %v604_v22, %v1136_v16 }
 0x111   : > { %v674_v45 = vadd.f32 %v673_v24, %v643_v26  ;;  %v606_v27 = vadd.f32 %v605_v25, %v541_v14 }
 0x113   : > { %v607_v29 = vrot.slane %v606_v27, 4  ;;  %v675_v31 = vadd.f32 %v674_v45, %v644_v28 }
 0x115   : > { %v608_v49 = vadd.f32 %v607_v29, %v606_v27  ;;  %v676_v32 = vrot.slane %v675_v31, 4 }
 0x117   : > { %v609_v35 = vrot.slane %v608_v49, 2  ;;  %v677_v36 = vadd.f32 %v676_v32, %v675_v31 }
 0x119   : > { %v610_v39 = vadd.f32 %v609_v35, %v608_v49  ;;  %v678_v63 = vrot.slane %v677_v36, 2 }
 0x11b   : > { %v611_v43 = vrot.slane %v610_v39, 1  ;;  %v679_v47 = vadd.f32 %v678_v63, %v677_v36 }
 0x11d   : > { %v680_v50 = vrot.slane %v679_v47, 1  ;;  %v612_v16 = vadd.f32 %v611_v43, %v610_v39 }
 0x11f   : > { %v681_v14 = vadd.f32 %v680_v50, %v679_v47 }
 0x121   : > { %v683_v51 = vsel %vm682_vm0, %v612_v16, %v681_v14 }
 0x122   : > { %684 = vst [vmem:[%s238_s28] sm:$0x3] %v683_v51 }
 0x123 PF: > { %s16_s18 = sadd.s32 1, %s864_s18  }
 0x124   : > { %p13_p5 = scmp.ge.s32.totalorder %s16_s18, 4  }
 0x126   :  { %15 = sbr.rel (!%p13_p5) target bundleno = 1 (0x1), region = 78 }

// kernel: bottleneck_forward.7
= control target key start
LH: loop header
LB: loop body
LE: loop exit
PB: predicated region body
PF: predicated region fallthrough
CT: control target
= control target key end

     0   :  { %s579_s15 = smov 0   ;;  %s780_s0 = inlined_call_operand.vmem [shape: f32[512,128], index: 0, kind: input, shape index: {}]   ;;  %s781_s1 = inlined_call_operand.vmem [shape: f32[512,128], index: 1, kind: input, shape index: {}]   ;;  %s782_s2 = inlined_call_operand.vmem [shape: f32[1,128], index: 2, kind: input, shape index: {}]   ;;  %s783_s3 = inlined_call_operand.vmem [shape: f32[1,128], index: 3, kind: input, shape index: {}]   ;;  %s784_s4 = inlined_call_operand.vmem [shape: f32[512,128], index: 4, kind: output, shape index: {}]  }
   0x1 LB: > { %s523_s16 = sadd.s32 4294967295, %s552_s15   ;;  %p527_p0 = scmp.ge.s32.totalorder %s552_s15, 1  ;;  %s552_s15 = sphi %s579_s15, %s14_s15  }
   0x2   : > { %p174_p1 = scmp.lt.s32.totalorder %s552_s15, 3 }
   0x4   : > { %p175_p2 = pnand %p527_p0, %p174_p1 }
   0x5   : > { %s528_s17 = sshll.u32 (!%p175_p2), %s523_s16, 5 }
   0x6   : > { %178 = sbr.rel (%p175_p2) target bundleno = 55 (0x37), region = 36  ;;  %p206_p3 = scmp.lt.s32.totalorder (!%p175_p2), %s528_s17, 63 }
   0xb   : > { %s786_s17 = smov (!%p206_p3, %s528_s17), 63  ;;  %v590_v0 = vld [vmem:[%s782_s2] ss:$0 sm:$0xff] }
   0xc   : > { %s592_s20 = sshll.u32 %s786_s17, 3  ;;  %v609_v1 = vld [vmem:[%s783_s3] ss:$0 sm:$0xff] }
   0xd   : > { %s598_s23 = scalar_lea.vmem %s780_s0, %s592_s20  ;;  %s604_s26 = scalar_lea.vmem %s781_s1, %s592_s20 }
   0xe   : > { %v223_v2 = vld [vmem:[%s598_s23] sm:$0xff]  ;;  %v224_v3 = vld [vmem:[%s598_s23 + $0x8] sm:$0xff]  ;;  %v225_v7 = vld [vmem:[%s598_s23 + $0x10] sm:$0xff]  ;;  %s640_s5 = scalar_lea.vmem %s784_s4, %s592_s20 }
   0xf   : > { %v259_v4 = vmul.f32 %v590_v0, %v223_v2  ;;  %v327_v5 = vld [vmem:[%s604_s26] sm:$0xff]  ;;  %v260_v6 = vmul.f32 %v590_v0, %v224_v3  ;;  %v328_v8 = vld [vmem:[%s604_s26 + $0x8] sm:$0xff]  ;;  %v261_v9 = vmul.f32 %v590_v0, %v225_v7  ;;  %v226_v10 = vld [vmem:[%s598_s23 + $0x18] sm:$0xff] }
  0x10   : > { %v227_v11 = vld [vmem:[%s598_s23 + $0x20] sm:$0xff]  ;;  %v329_v14 = vld [vmem:[%s604_s26 + $0x10] sm:$0xff]  ;;  %v262_v15 = vmul.f32 %v590_v0, %v226_v10  ;;  %v330_v16 = vld [vmem:[%s604_s26 + $0x18] sm:$0xff] }
  0x11   : > { %v295_v12 = vadd.f32 %v609_v1, %v259_v4  ;;  %v296_v13 = vadd.f32 %v609_v1, %v260_v6  ;;  %v263_v17 = vmul.f32 %v590_v0, %v227_v11  ;;  %v228_v18 = vld [vmem:[%s598_s23 + $0x28] sm:$0xff]  ;;  %v297_v19 = vadd.f32 %v609_v1, %v261_v9  ;;  %v331_v20 = vld [vmem:[%s604_s26 + $0x20] sm:$0xff]  ;;  %v229_v22 = vld [vmem:[%s598_s23 + $0x30] sm:$0xff] }
  0x12   : > { %v264_v21 = vmul.f32 %v590_v0, %v228_v18  ;;  %v230_v23 = vld [vmem:[%s598_s23 + $0x38] sm:$0xff]  ;;  %v298_v26 = vadd.f32 %v609_v1, %v262_v15  ;;  %v332_v28 = vld [vmem:[%s604_s26 + $0x28] sm:$0xff]  ;;  %v265_v31 = vmul.f32 %v590_v0, %v229_v22  ;;  %v231_v33 = vld [vmem:[%s598_s23 + $0x40] sm:$0xff] }
  0x13   : > { %v359_v24 = vadd.f32 %v327_v5, %v295_v12  ;;  %v360_v25 = vadd.f32 %v328_v8, %v296_v13  ;;  %v299_v27 = vadd.f32 %v609_v1, %v263_v17  ;;  %v361_v29 = vadd.f32 %v329_v14, %v297_v19  ;;  %v232_v34 = vld [vmem:[%s598_s23 + $0x48] sm:$0xff]  ;;  %v333_v39 = vld [vmem:[%s604_s26 + $0x30] sm:$0xff]  ;;  %v334_v40 = vld [vmem:[%s604_s26 + $0x38] sm:$0xff] }
  0x14   : > { %v300_v30 = vadd.f32 %v609_v1, %v264_v21  ;;  %v266_v32 = vmul.f32 %v590_v0, %v230_v23  ;;  %v362_v37 = vadd.f32 %v330_v16, %v298_v26  ;;  %v233_v41 = vld [vmem:[%s598_s23 + $0x50] sm:$0xff]  ;;  %v301_v44 = vadd.f32 %v609_v1, %v265_v31  ;;  %v234_v46 = vld [vmem:[%s598_s23 + $0x58] sm:$0xff]  ;;  %v235_v47 = vld [vmem:[%s598_s23 + $0x60] sm:$0xff] }
  0x15   : > { %v391_v35 = vmax.f32 %v359_v24, 0.0  ;;  %v392_v36 = vmax.f32 %v360_v25, 0.0  ;;  %v363_v38 = vadd.f32 %v331_v20, %v299_v27  ;;  %v393_v42 = vmax.f32 %v361_v29, 0.0  ;;  %v236_v52 = vld [vmem:[%s598_s23 + $0x68] sm:$0xff]  ;;  %v335_v56 = vld [vmem:[%s604_s26 + $0x40] sm:$0xff]  ;;  %v337_v61 = vld [vmem:[%s604_s26 + $0x50] sm:$0xff] }
  0x16   : > { %v364_v43 = vadd.f32 %v332_v28, %v300_v30  ;;  %v302_v45 = vadd.f32 %v609_v1, %v266_v32  ;;  %v394_v48 = vmax.f32 %v362_v37, 0.0  ;;  %v267_v50 = vmul.f32 %v590_v0, %v231_v33  ;;  %v336_v57 = vld [vmem:[%s604_s26 + $0x48] sm:$0xff]  ;;  %v237_v2 = vld [vmem:[%s598_s23 + $0x70] sm:$0xff]  ;;  %v238_v3 = vld [vmem:[%s598_s23 + $0x78] sm:$0xff] }
  0x17   : > { %423 = vst [vmem:[%s640_s5] sm:$0xff] %v391_v35  ;;  %v395_v49 = vmax.f32 %v363_v38, 0.0  ;;  %v268_v51 = vmul.f32 %v590_v0, %v232_v34  ;;  %v365_v54 = vadd.f32 %v333_v39, %v301_v44  ;;  %v269_v58 = vmul.f32 %v590_v0, %v233_v41  ;;  %v338_v7 = vld [vmem:[%s604_s26 + $0x58] sm:$0xff]  ;;  %v339_v8 = vld [vmem:[%s604_s26 + $0x60] sm:$0xff]  ;;  %v340_v14 = vld [vmem:[%s604_s26 + $0x68] sm:$0xff] }
  0x18   : > { %424 = vst [vmem:[%s640_s5 + $0x8] sm:$0xff] %v392_v36  ;;  %v396_v53 = vmax.f32 %v364_v43, 0.0  ;;  %v366_v55 = vadd.f32 %v334_v40, %v302_v45  ;;  %v303_v59 = vadd.f32 %v609_v1, %v267_v50  ;;  %v270_v62 = vmul.f32 %v590_v0, %v234_v46  ;;  %v239_v19 = vld [vmem:[%s598_s23 + $0x80] sm:$0xff]  ;;  %v240_v20 = vld [vmem:[%s598_s23 + $0x88] sm:$0xff]  ;;  %v341_v25 = vld [vmem:[%s604_s26 + $0x70] sm:$0xff] }
  0x19   : > { %425 = vst [vmem:[%s640_s5 + $0x10] sm:$0xff] %v393_v42  ;;  %v304_v60 = vadd.f32 %v609_v1, %v268_v51  ;;  %v271_v63 = vmul.f32 %v590_v0, %v235_v47  ;;  %v397_v4 = vmax.f32 %v365_v54, 0.0  ;;  %v305_v6 = vadd.f32 %v609_v1, %v269_v58  ;;  %v342_v26 = vld [vmem:[%s604_s26 + $0x78] sm:$0xff]  ;;  %v241_v27 = vld [vmem:[%s598_s23 + $0x90] sm:$0xff]  ;;  %v243_v33 = vld [vmem:[%s598_s23 + $0xa0] sm:$0xff] }
  0x1a   : > { %426 = vst [vmem:[%s640_s5 + $0x18] sm:$0xff] %v394_v48  ;;  %v398_v5 = vmax.f32 %v366_v55, 0.0  ;;  %v272_v9 = vmul.f32 %v590_v0, %v236_v52  ;;  %v367_v10 = vadd.f32 %v335_v56, %v303_v59  ;;  %v306_v12 = vadd.f32 %v609_v1, %v270_v62  ;;  %v242_v32 = vld [vmem:[%s598_s23 + $0x98] sm:$0xff]  ;;  %v244_v38 = vld [vmem:[%s598_s23 + $0xa8] sm:$0xff]  ;;  %v343_v42 = vld [vmem:[%s604_s26 + $0x80] sm:$0xff] }
  0x1b   : > { %427 = vst [vmem:[%s640_s5 + $0x20] sm:$0xff] %v395_v49  ;;  %v368_v11 = vadd.f32 %v336_v57, %v304_v60  ;;  %v307_v13 = vadd.f32 %v609_v1, %v271_v63  ;;  %v369_v15 = vadd.f32 %v337_v61, %v305_v6  ;;  %v273_v17 = vmul.f32 %v590_v0, %v237_v2  ;;  %v344_v43 = vld [vmem:[%s604_s26 + $0x88] sm:$0xff]  ;;  %v345_v47 = vld [vmem:[%s604_s26 + $0x90] sm:$0xff]  ;;  %v246_v51 = vld [vmem:[%s598_s23 + $0xb8] sm:$0xff] }
  0x1c   : > { %428 = vst [vmem:[%s640_s5 + $0x28] sm:$0xff] %v396_v53  ;;  %v308_v16 = vadd.f32 %v609_v1, %v272_v9  ;;  %v274_v18 = vmul.f32 %v590_v0, %v238_v3  ;;  %v399_v21 = vmax.f32 %v367_v10, 0.0  ;;  %v370_v23 = vadd.f32 %v338_v7, %v306_v12  ;;  %v245_v50 = vld [vmem:[%s598_s23 + $0xb0] sm:$0xff]  ;;  %v346_v55 = vld [vmem:[%s604_s26 + $0x98] sm:$0xff]  ;;  %v347_v56 = vld [vmem:[%s604_s26 + $0xa0] sm:$0xff] }
  0x1d   : > { %429 = vst [vmem:[%s640_s5 + $0x30] sm:$0xff] %v397_v4  ;;  %v400_v22 = vmax.f32 %v368_v11, 0.0  ;;  %v371_v24 = vadd.f32 %v339_v8, %v307_v13  ;;  %v401_v28 = vmax.f32 %v369_v15, 0.0  ;;  %v309_v30 = vadd.f32 %v609_v1, %v273_v17  ;;  %v348_v62 = vld [vmem:[%s604_s26 + $0xa8] sm:$0xff]  ;;  %v349_v11 = vld [vmem:[%s604_s26 + $0xb0] sm:$0xff]  ;;  %v350_v12 = vld [vmem:[%s604_s26 + $0xb8] sm:$0xff] }
  0x1e   : > { %430 = vst [vmem:[%s640_s5 + $0x38] sm:$0xff] %v398_v5  ;;  %v372_v29 = vadd.f32 %v340_v14, %v308_v16  ;;  %v310_v31 = vadd.f32 %v609_v1, %v274_v18  ;;  %v402_v34 = vmax.f32 %v370_v23, 0.0  ;;  %v275_v36 = vmul.f32 %v590_v0, %v239_v19  ;;  %v247_v5 = vld [vmem:[%s598_s23 + $0xc0] sm:$0xff]  ;;  %v248_v6 = vld [vmem:[%s598_s23 + $0xc8] sm:$0xff]  ;;  %v249_v13 = vld [vmem:[%s598_s23 + $0xd0] sm:$0xff] }
  0x1f   : > { %431 = vst [vmem:[%s640_s5 + $0x40] sm:$0xff] %v399_v21  ;;  %v403_v35 = vmax.f32 %v371_v24, 0.0  ;;  %v276_v37 = vmul.f32 %v590_v0, %v240_v20  ;;  %v373_v40 = vadd.f32 %v341_v25, %v309_v30  ;;  %v277_v44 = vmul.f32 %v590_v0, %v241_v27  ;;  %v250_v18 = vld [vmem:[%s598_s23 + $0xd8] sm:$0xff]  ;;  %v251_v19 = vld [vmem:[%s598_s23 + $0xe0] sm:$0xff]  ;;  %v252_v24 = vld [vmem:[%s598_s23 + $0xe8] sm:$0xff] }
  0x20   : > { %432 = vst [vmem:[%s640_s5 + $0x48] sm:$0xff] %v400_v22  ;;  %v404_v39 = vmax.f32 %v372_v29, 0.0  ;;  %v374_v41 = vadd.f32 %v342_v26, %v310_v31  ;;  %v311_v45 = vadd.f32 %v609_v1, %v275_v36  ;;  %v278_v48 = vmul.f32 %v590_v0, %v242_v32  ;;  %v352_v29 = vld [vmem:[%s604_s26 + $0xc8] sm:$0xff]  ;;  %v253_v36 = vld [vmem:[%s598_s23 + $0xf0] sm:$0xff] }
  0x21   : > { %433 = vst [vmem:[%s640_s5 + $0x50] sm:$0xff] %v401_v28  ;;  %v312_v46 = vadd.f32 %v609_v1, %v276_v37  ;;  %v279_v49 = vmul.f32 %v590_v0, %v243_v33  ;;  %v405_v52 = vmax.f32 %v373_v40, 0.0  ;;  %v313_v54 = vadd.f32 %v609_v1, %v277_v44  ;;  %v351_v28 = vld [vmem:[%s604_s26 + $0xc0] sm:$0xff]  ;;  %v353_v33 = vld [vmem:[%s604_s26 + $0xd0] sm:$0xff]  ;;  %v254_v37 = vld [vmem:[%s598_s23 + $0xf8] sm:$0xff] }
  0x22   : > { %434 = vst [vmem:[%s640_s5 + $0x58] sm:$0xff] %v402_v34  ;;  %v406_v53 = vmax.f32 %v374_v41, 0.0  ;;  %v280_v57 = vmul.f32 %v590_v0, %v244_v38  ;;  %v375_v58 = vadd.f32 %v343_v42, %v311_v45  ;;  %v314_v60 = vadd.f32 %v609_v1, %v278_v48  ;;  %v354_v41 = vld [vmem:[%s604_s26 + $0xd8] sm:$0xff]  ;;  %v355_v42 = vld [vmem:[%s604_s26 + $0xe0] sm:$0xff]  ;;  %v356_v48 = vld [vmem:[%s604_s26 + $0xe8] sm:$0xff] }
  0x23   : > { %435 = vst [vmem:[%s640_s5 + $0x60] sm:$0xff] %v403_v35  ;;  %v376_v59 = vadd.f32 %v344_v43, %v312_v46  ;;  %v315_v61 = vadd.f32 %v609_v1, %v279_v49  ;;  %v377_v63 = vadd.f32 %v345_v47, %v313_v54  ;;  %v281_v3 = vmul.f32 %v590_v0, %v245_v50 }
  0x24   : > { %436 = vst [vmem:[%s640_s5 + $0x68] sm:$0xff] %v404_v39  ;;  %v316_v2 = vadd.f32 %v609_v1, %v280_v57  ;;  %v282_v4 = vmul.f32 %v590_v0, %v246_v51  ;;  %v407_v7 = vmax.f32 %v375_v58, 0.0  ;;  %v378_v9 = vadd.f32 %v346_v55, %v314_v60  ;;  %v357_v57 = vld [vmem:[%s604_s26 + $0xf0] sm:$0xff]  ;;  %v358_v58 = vld [vmem:[%s604_s26 + $0xf8] sm:$0xff] }
  0x25   : > { %437 = vst [vmem:[%s640_s5 + $0x70] sm:$0xff] %v405_v52  ;;  %v408_v8 = vmax.f32 %v376_v59, 0.0  ;;  %v379_v10 = vadd.f32 %v347_v56, %v315_v61  ;;  %v409_v14 = vmax.f32 %v377_v63, 0.0  ;;  %v317_v16 = vadd.f32 %v609_v1, %v281_v3 }
  0x26   : > { %438 = vst [vmem:[%s640_s5 + $0x78] sm:$0xff] %v406_v53  ;;  %v380_v15 = vadd.f32 %v348_v62, %v316_v2  ;;  %v318_v17 = vadd.f32 %v609_v1, %v282_v4  ;;  %v410_v20 = vmax.f32 %v378_v9, 0.0  ;;  %v283_v22 = vmul.f32 %v590_v0, %v247_v5 }
  0x27   : > { %439 = vst [vmem:[%s640_s5 + $0x80] sm:$0xff] %v407_v7  ;;  %v411_v21 = vmax.f32 %v379_v10, 0.0  ;;  %v284_v23 = vmul.f32 %v590_v0, %v248_v6  ;;  %v381_v26 = vadd.f32 %v349_v11, %v317_v16  ;;  %v285_v30 = vmul.f32 %v590_v0, %v249_v13 }
  0x28   : > { %440 = vst [vmem:[%s640_s5 + $0x88] sm:$0xff] %v408_v8  ;;  %v412_v25 = vmax.f32 %v380_v15, 0.0  ;;  %v382_v27 = vadd.f32 %v350_v12, %v318_v17  ;;  %v319_v31 = vadd.f32 %v609_v1, %v283_v22  ;;  %v286_v34 = vmul.f32 %v590_v0, %v250_v18 }
  0x29   : > { %441 = vst [vmem:[%s640_s5 + $0x90] sm:$0xff] %v409_v14  ;;  %v320_v32 = vadd.f32 %v609_v1, %v284_v23  ;;  %v287_v35 = vmul.f32 %v590_v0, %v251_v19  ;;  %v413_v38 = vmax.f32 %v381_v26, 0.0  ;;  %v321_v40 = vadd.f32 %v609_v1, %v285_v30 }
  0x2a   : > { %442 = vst [vmem:[%s640_s5 + $0x98] sm:$0xff] %v410_v20  ;;  %v414_v39 = vmax.f32 %v382_v27, 0.0  ;;  %v288_v43 = vmul.f32 %v590_v0, %v252_v24  ;;  %v383_v44 = vadd.f32 %v351_v28, %v319_v31  ;;  %v322_v46 = vadd.f32 %v609_v1, %v286_v34 }
  0x2b   : > { %443 = vst [vmem:[%s640_s5 + $0xa0] sm:$0xff] %v411_v21  ;;  %v384_v45 = vadd.f32 %v352_v29, %v320_v32  ;;  %v323_v47 = vadd.f32 %v609_v1, %v287_v35  ;;  %v385_v49 = vadd.f32 %v353_v33, %v321_v40  ;;  %v289_v51 = vmul.f32 %v590_v0, %v253_v36 }
  0x2c   : > { %444 = vst [vmem:[%s640_s5 + $0xa8] sm:$0xff] %v412_v25  ;;  %v324_v50 = vadd.f32 %v609_v1, %v288_v43  ;;  %v290_v52 = vmul.f32 %v590_v0, %v254_v37  ;;  %v415_v53 = vmax.f32 %v383_v44, 0.0  ;;  %v386_v55 = vadd.f32 %v354_v41, %v322_v46 }
  0x2d   : > { %445 = vst [vmem:[%s640_s5 + $0xb0] sm:$0xff] %v413_v38  ;;  %v416_v54 = vmax.f32 %v384_v45, 0.0  ;;  %v387_v56 = vadd.f32 %v355_v42, %v323_v47  ;;  %v417_v59 = vmax.f32 %v385_v49, 0.0  ;;  %v325_v61 = vadd.f32 %v609_v1, %v289_v51 }
  0x2e   : > { %446 = vst [vmem:[%s640_s5 + $0xb8] sm:$0xff] %v414_v39  ;;  %v388_v60 = vadd.f32 %v356_v48, %v324_v50  ;;  %v326_v0 = vadd.f32 %v609_v1, %v290_v52  ;;  %v418_v62 = vmax.f32 %v386_v55, 0.0 }
  0x2f   : > { %447 = vst [vmem:[%s640_s5 + $0xc0] sm:$0xff] %v415_v53  ;;  %v419_v63 = vmax.f32 %v387_v56, 0.0  ;;  %v389_v3 = vadd.f32 %v357_v57, %v325_v61 }
  0x30   : > { %448 = vst [vmem:[%s640_s5 + $0xc8] sm:$0xff] %v416_v54  ;;  %v420_v2 = vmax.f32 %v388_v60, 0.0  ;;  %v390_v4 = vadd.f32 %v358_v58, %v326_v0 }
  0x31   : > { %449 = vst [vmem:[%s640_s5 + $0xd0] sm:$0xff] %v417_v59  ;;  %v421_v5 = vmax.f32 %v389_v3, 0.0 }
  0x32   : > { %450 = vst [vmem:[%s640_s5 + $0xd8] sm:$0xff] %v418_v62  ;;  %v422_v6 = vmax.f32 %v390_v4, 0.0 }
  0x33   : > { %451 = vst [vmem:[%s640_s5 + $0xe0] sm:$0xff] %v419_v63 }
  0x34   : > { %452 = vst [vmem:[%s640_s5 + $0xe8] sm:$0xff] %v420_v2 }
  0x35   : > { %453 = vst [vmem:[%s640_s5 + $0xf0] sm:$0xff] %v421_v5 }
  0x36   : > { %454 = vst [vmem:[%s640_s5 + $0xf8] sm:$0xff] %v422_v6 }
  0x37 PF: > { %s14_s15 = sadd.s32 1, %s552_s15  }
  0x38   : > { %p11_p4 = scmp.ge.s32.totalorder %s14_s15, 4  }
  0x3a   :  { %13 = sbr.rel (!%p11_p4) target bundleno = 1 (0x1), region = 69 }

// kernel: bottleneck_forward.5
= control target key start
LH: loop header
LB: loop body
LE: loop exit
PB: predicated region body
PF: predicated region fallthrough
CT: control target
= control target key end

     0   :  { %s3308_s18 = smov 0   ;;  %s4219_s0 = inlined_call_operand.vmem [shape: f32[2,16,16,128], index: 0, kind: input, shape index: {}]   ;;  %s4220_s1 = inlined_call_operand.vmem [shape: f32[1,128], index: 1, kind: input, shape index: {}]   ;;  %s4221_s2 = inlined_call_operand.vmem [shape: f32[1,128], index: 2, kind: input, shape index: {}]   ;;  %s4222_s3 = inlined_call_operand.vmem [shape: bf16[9,128,128], index: 3, kind: input, shape index: {}]   ;;  %s4223_s4 = inlined_call_operand.vmem [shape: f32[2,16,16,128], index: 4, kind: output, shape index: {0}]   ;;  %s4224_s5 = inlined_call_operand.vmem [shape: f32[2,2,128], index: 5, kind: output, shape index: {1}]  }
   0x1 LB: > { %s2728_s19 = sadd.s32 4294967295, %s3274_s18   ;;  %p2732_p0 = scmp.ge.s32.totalorder %s3274_s18, 1  ;;  %s3274_s18 = sphi %s3308_s18, %s16_s18  }
   0x2   : > { %p190_p1 = scmp.lt.s32.totalorder %s3274_s18, 3 }
   0x4   : > { %p191_p2 = pnand %p2732_p0, %p190_p1 }
   0x6   : > { %194 = sbr.rel (%p191_p2) target bundleno = 767 (0x2ff), region = 36 }
   0xb   : > { %v3173_v0 = vld [vmem:[%s4222_s3 + $0x78] sm:$0xff]  ;;  %p222_p3 = scmp.lt.s32.totalorder %s2728_s19, 1  ;;  %v3276_v1 = vmov 0.0   ;;  %v3172_v2 = vld [vmem:[%s4222_s3 + $0x70] sm:$0xff]  ;;  %v3329_v3 = vld [vmem:[%s4220_s1] ss:$0 sm:$0xff] }
   0xc   : > { %384 = vst [vmem:[#allocation2 + $0x60] sm:$0xff] %v3276_v1  ;;  %3230 = vmatpush.bf16.msra.mxu1 %v3173_v0  ;;  %3231 = vmatpush.bf16.msra.mxu2 %v3173_v0  ;;  %v3343_v4 = vld [vmem:[%s4221_s2] ss:$0 sm:$0xff]  ;;  %v3171_v5 = vld [vmem:[%s4222_s3 + $0x68] sm:$0xff]  ;;  %v3169_v15 = vld [vmem:[%s4222_s3 + $0x58] sm:$0xff]  ;;  %vm2639_vm0 = vcmask 1040384  }
   0xd   : > { %s4251_s19 = smov (!%p222_p3, %s2728_s19), 1  ;;  %385 = vst [vmem:[#allocation2 + $0x68] sm:$0xff] %v3276_v1  ;;  %3232 = vmatpush.bf16.msra.mxu3 %v3173_v0  ;;  %636 = vmatpush.bf16.msra.mxu0 %v3173_v0  ;;  %v3170_v12 = vld [vmem:[%s4222_s3 + $0x60] sm:$0xff]  ;;  %v3168_v22 = vld [vmem:[%s4222_s3 + $0x50] sm:$0xff]  ;;  %v3167_v27 = vld [vmem:[%s4222_s3 + $0x48] sm:$0xff] }
   0xe   : > { %s3156_s26 = sshll.u32 %s4251_s19, 8  ;;  %386 = vst [vmem:[#allocation2 + $0x70] sm:$0x3] %v3276_v1  ;;  %v3166_v32 = vld [vmem:[%s4222_s3 + $0x40] sm:$0xff]  ;;  %v3181_v42 = vld [vmem:[%s4222_s3 + $0xb8] sm:$0xff]  ;;  %v3180_v53 = vld [vmem:[%s4222_s3 + $0xb0] sm:$0xff] }
   0xf   : > { %s3338_s29 = scalar_lea.vmem %s4219_s0, %s3156_s26  ;;  %372 = vst [vmem:[#allocation2] sm:$0xff] %v3276_v1  ;;  %v3189_v43 = vld [vmem:[%s4222_s3 + $0xf8] sm:$0xff]  ;;  %v3188_v54 = vld [vmem:[%s4222_s3 + $0xf0] sm:$0xff]  ;;  %v3179_v0 = vld [vmem:[%s4222_s3 + $0xa8] sm:$0xff]  ;;  %s4139_s30 = scalar_lea.vmem %s4223_s4, %s3156_s26 }
  0x10   : > { %3233 = vmatpush.bf16.msra.mxu1 %v3172_v2  ;;  %3234 = vmatpush.bf16.msra.mxu2 %v3172_v2  ;;  %v242_v6 = vld [vmem:[%s3338_s29 + $0x30] sm:$0xff]  ;;  %v243_v7 = vld [vmem:[%s3338_s29 + $0x38] sm:$0xff]  ;;  %373 = vst [vmem:[#allocation2 + $0x8] sm:$0xff] %v3276_v1  ;;  %v244_v37 = vld [vmem:[%s3338_s29 + $0x40] sm:$0xff]  ;;  %s2737_s26 = sshll.u32 %s4251_s19, 1 }
  0x11   : > { %3235 = vmatpush.bf16.msra.mxu3 %v3172_v2  ;;  %637 = vmatpush.bf16.msra.mxu0 %v3172_v2  ;;  %v278_v8 = vmul.f32 %v3329_v3, %v242_v6  ;;  %v279_v9 = vmul.f32 %v3329_v3, %v243_v7  ;;  %374 = vst [vmem:[#allocation2 + $0x10] sm:$0x3] %v3276_v1  ;;  %v250_v16 = vld [vmem:[%s3338_s29 + $0x70] sm:$0xff]  ;;  %v251_v17 = vld [vmem:[%s3338_s29 + $0x78] sm:$0xff]  ;;  %v245_v38 = vld [vmem:[%s3338_s29 + $0x48] sm:$0xff]  ;;  %s235_s8 = scalar_lea.vmem %s4224_s5, %s2737_s26 }
  0x12   : > { %375 = vst [vmem:[#allocation2 + $0x18] sm:$0xff] %v3276_v1  ;;  %v258_v18 = vld [vmem:[%s3338_s29 + $0xb0] sm:$0xff]  ;;  %v259_v19 = vld [vmem:[%s3338_s29 + $0xb8] sm:$0xff]  ;;  %v286_v20 = vmul.f32 %v3329_v3, %v250_v16  ;;  %v287_v21 = vmul.f32 %v3329_v3, %v251_v17  ;;  %v252_v39 = vld [vmem:[%s3338_s29 + $0x80] sm:$0xff]  ;;  %v280_v55 = vmul.f32 %v3329_v3, %v244_v37  ;;  %v281_v56 = vmul.f32 %v3329_v3, %v245_v38 }
  0x13   : > { %v3357_v10 = vadd.f32 %v3343_v4, %v278_v8  ;;  %v3360_v11 = vadd.f32 %v3343_v4, %v279_v9  ;;  %376 = vst [vmem:[#allocation2 + $0x20] sm:$0xff] %v3276_v1  ;;  %v294_v23 = vmul.f32 %v3329_v3, %v258_v18  ;;  %v295_v24 = vmul.f32 %v3329_v3, %v259_v19  ;;  %v253_v44 = vld [vmem:[%s3338_s29 + $0x88] sm:$0xff]  ;;  %v260_v47 = vld [vmem:[%s3338_s29 + $0xc0] sm:$0xff]  ;;  %v3165_v50 = vld [vmem:[%s4222_s3 + $0x38] sm:$0xff] }
  0x14   : > { %3236 = vmatpush.bf16.msra.mxu1 %v3171_v5  ;;  %3237 = vmatpush.bf16.msra.mxu2 %v3171_v5  ;;  %377 = vst [vmem:[#allocation2 + $0x28] sm:$0x3] %v3276_v1  ;;  %v3393_v25 = vadd.f32 %v3343_v4, %v286_v20  ;;  %v3396_v26 = vadd.f32 %v3343_v4, %v287_v21  ;;  %v261_v48 = vld [vmem:[%s3338_s29 + $0xc8] sm:$0xff]  ;;  %v236_v49 = vld [vmem:[%s3338_s29] sm:$0xff]  ;;  %v3197_v51 = vld [vmem:[%s4222_s3 + $0x138] sm:$0xff] }
  0x15   : > { %3238 = vmatpush.bf16.msra.mxu3 %v3171_v5  ;;  %638 = vmatpush.bf16.msra.mxu0 %v3171_v5  ;;  %v346_v13 = vmax.f32 %v3357_v10, 0.0  ;;  %378 = vst [vmem:[#allocation2 + $0x30] sm:$0xff] %v3276_v1  ;;  %v347_v14 = vmax.f32 %v3360_v11, 0.0  ;;  %v3403_v28 = vadd.f32 %v3343_v4, %v294_v23  ;;  %v3406_v29 = vadd.f32 %v3343_v4, %v295_v24  ;;  %v237_v52 = vld [vmem:[%s3338_s29 + $0x8] sm:$0xff]  ;;  %v3164_v63 = vld [vmem:[%s4222_s3 + $0x30] sm:$0xff]  ;;  %v3178_v16 = vld [vmem:[%s4222_s3 + $0xa0] sm:$0xff] }
  0x16   : > { %379 = vst [vmem:[#allocation2 + $0x38] sm:$0xff] %v3276_v1  ;;  %v354_v30 = vmax.f32 %v3393_v25, 0.0  ;;  %v355_v31 = vmax.f32 %v3396_v26, 0.0  ;;  %v288_v57 = vmul.f32 %v3329_v3, %v252_v39  ;;  %v289_v58 = vmul.f32 %v3329_v3, %v253_v44  ;;  %v3187_v8 = vld [vmem:[%s4222_s3 + $0xe8] sm:$0xff]  ;;  %v3196_v9 = vld [vmem:[%s4222_s3 + $0x130] sm:$0xff]  ;;  %v3186_v17 = vld [vmem:[%s4222_s3 + $0xe0] sm:$0xff] }
  0x17   : > { %433 = vst [vmem:[#allocation2 + $0x61] sm:$0xff] %v346_v13  ;;  %v362_v33 = vmax.f32 %v3403_v28, 0.0  ;;  %v363_v34 = vmax.f32 %v3406_v29, 0.0  ;;  %v523_v35 = vld [vmem:[#allocation2 + $0x1] sm:$0xff]  ;;  %v3424_v40 = vpack.c.bf16 %v347_v14, %v346_v13  ;;  %v296_v59 = vmul.f32 %v3329_v3, %v260_v47  ;;  %v254_v37 = vld [vmem:[%s3338_s29 + $0x90] sm:$0xff]  ;;  %v3177_v38 = vld [vmem:[%s4222_s3 + $0x98] sm:$0xff] }
  0x18   : > { %3239 = vmatpush.bf16.msra.mxu1 %v3170_v12  ;;  %3240 = vmatpush.bf16.msra.mxu2 %v3170_v12  ;;  %434 = vst [vmem:[#allocation2 + $0x69] sm:$0xff] %v347_v14  ;;  %v524_v36 = vld [vmem:[#allocation2 + $0x9] sm:$0xff]  ;;  %v563_v41 = vpack.c.bf16 %v355_v31, %v354_v30  ;;  %v297_v60 = vmul.f32 %v3329_v3, %v261_v48  ;;  %v3194_v44 = vld [vmem:[%s4222_s3 + $0x120] sm:$0xff]  ;;  %v263_v48 = vld [vmem:[%s3338_s29 + $0xd8] sm:$0xff] }
  0x19   : > { %3241 = vmatpush.bf16.msra.mxu3 %v3170_v12  ;;  %639 = vmatpush.bf16.msra.mxu0 %v3170_v12  ;;  %380 = vst [vmem:[#allocation2 + $0x40] sm:$0x3] %v3276_v1  ;;  %v567_v45 = vpack.c.bf16 %v363_v34, %v362_v33  ;;  %v555_v46 = vpack.c.bf16 %v524_v36, %v523_v35  ;;  %v3163_v14 = vld [vmem:[%s4222_s3 + $0x28] sm:$0xff]  ;;  %v246_v35 = vld [vmem:[%s3338_s29 + $0x50] sm:$0xff]  ;;  %v247_v36 = vld [vmem:[%s3338_s29 + $0x58] sm:$0xff] }
  0x1a   : > { %381 = vst [vmem:[#allocation2 + $0x48] sm:$0xff] %v3276_v1  ;;  %v272_v61 = vmul.f32 %v3329_v3, %v236_v49  ;;  %v273_v62 = vmul.f32 %v3329_v3, %v237_v52  ;;  %v3482_v2 = vadd.f32 %v3343_v4, %v280_v55  ;;  %v3485_v5 = vadd.f32 %v3343_v4, %v281_v56  ;;  %v262_v47 = vld [vmem:[%s3338_s29 + $0xd0] sm:$0xff]  ;;  %v3193_v52 = vld [vmem:[%s4222_s3 + $0x118] sm:$0xff]  ;;  %v3158_v25 = vld [vmem:[%s4222_s3] sm:$0xff] }
  0x1b   : > { %382 = vst [vmem:[#allocation2 + $0x50] sm:$0xff] %v3276_v1  ;;  %v3488_v6 = vadd.f32 %v3343_v4, %v288_v57  ;;  %v3491_v7 = vadd.f32 %v3343_v4, %v289_v58  ;;  %v3501_v10 = vadd.f32 %v3343_v4, %v296_v59  ;;  %v3504_v11 = vadd.f32 %v3343_v4, %v297_v60  ;;  %v238_v49 = vld [vmem:[%s3338_s29 + $0x10] sm:$0xff] }
  0x1c   : > { %3242 = vmatpush.bf16.msra.mxu1 %v3169_v15  ;;  %3243 = vmatpush.bf16.msra.mxu2 %v3169_v15  ;;  %383 = vst [vmem:[#allocation2 + $0x58] sm:$0x3] %v3276_v1  ;;  %v3507_v12 = vadd.f32 %v3343_v4, %v272_v61  ;;  %v3510_v13 = vadd.f32 %v3343_v4, %v273_v62  ;;  %v348_v18 = vmax.f32 %v3482_v2, 0.0  ;;  %v349_v19 = vmax.f32 %v3485_v5, 0.0  ;;  %v3176_v55 = vld [vmem:[%s4222_s3 + $0x90] sm:$0xff]  ;;  %v240_v2 = vld [vmem:[%s3338_s29 + $0x20] sm:$0xff] }
  0x1d   : > { %3244 = vmatpush.bf16.msra.mxu3 %v3169_v15  ;;  %640 = vmatpush.bf16.msra.mxu0 %v3169_v15  ;;  %387 = vst [vmem:[#allocation2 + $0x78] sm:$0xff] %v3276_v1  ;;  %v3195_v15 = vld [vmem:[%s4222_s3 + $0x128] sm:$0xff]  ;;  %v356_v20 = vmax.f32 %v3488_v6, 0.0  ;;  %v357_v21 = vmax.f32 %v3491_v7, 0.0  ;;  %v365_v23 = vmax.f32 %v3504_v11, 0.0  ;;  %v3184_v56 = vld [vmem:[%s4222_s3 + $0xd0] sm:$0xff]  ;;  %v290_v57 = vmul.f32 %v3329_v3, %v254_v37 }
  0x1e   : > { %388 = vst [vmem:[#allocation2 + $0x80] sm:$0xff] %v3276_v1  ;;  %v340_v24 = vmax.f32 %v3507_v12, 0.0  ;;  %v3552_v39 = vpack.c.bf16 %v349_v19, %v348_v18  ;;  %v298_v59 = vmul.f32 %v3329_v3, %v262_v47  ;;  %v299_v60 = vmul.f32 %v3329_v3, %v263_v48 }
  0x1f   : > { %389 = vst [vmem:[#allocation2 + $0x88] sm:$0x3] %v3276_v1  ;;  %v274_v61 = vmul.f32 %v3329_v3, %v238_v49  ;;  %v276_v7 = vmul.f32 %v3329_v3, %v240_v2  ;;  %v3203_v2 = vld [vmem:[%s4222_s3 + $0x168] sm:$0xff] }
  0x20   : > { %3245 = vmatpush.bf16.msra.mxu1 %v3168_v22  ;;  %3246 = vmatpush.bf16.msra.mxu2 %v3168_v22  ;;  %390 = vst [vmem:[#allocation2 + $0x90] sm:$0xff] %v3276_v1 }
  0x21   : > { %3247 = vmatpush.bf16.msra.mxu3 %v3168_v22  ;;  %641 = vmatpush.bf16.msra.mxu0 %v3168_v22  ;;  %391 = vst [vmem:[#allocation2 + $0x98] sm:$0xff] %v3276_v1  ;;  %v364_v22 = vmax.f32 %v3501_v10, 0.0  ;;  %v3205_v10 = vld [vmem:[%s4222_s3 + $0x178] sm:$0xff] }
  0x22   : > { %392 = vst [vmem:[#allocation2 + $0xa0] sm:$0x3] %v3276_v1 }
  0x23   : > { %393 = vst [vmem:[#allocation2 + $0xa8] sm:$0xff] %v3276_v1 }
  0x24   : > { %3248 = vmatpush.bf16.msra.mxu1 %v3167_v27  ;;  %3249 = vmatpush.bf16.msra.mxu2 %v3167_v27  ;;  %394 = vst [vmem:[#allocation2 + $0xb0] sm:$0xff] %v3276_v1 }
  0x25   : > { %3250 = vmatpush.bf16.msra.mxu3 %v3167_v27  ;;  %642 = vmatpush.bf16.msra.mxu0 %v3167_v27  ;;  %395 = vst [vmem:[#allocation2 + $0xb8] sm:$0x3] %v3276_v1  ;;  %v341_v27 = vmax.f32 %v3510_v13, 0.0 }
  0x26   : > { %396 = vst [vmem:[#allocation2 + $0xc0] sm:$0xff] %v3276_v1 }
  0x27   : > { %397 = vst [vmem:[#allocation2 + $0xc8] sm:$0xff] %v3276_v1 }
  0x28   : > { %3251 = vmatpush.bf16.msra.mxu1 %v3166_v32  ;;  %3252 = vmatpush.bf16.msra.mxu2 %v3166_v32  ;;  %398 = vst [vmem:[#allocation2 + $0xd0] sm:$0x3] %v3276_v1 }
  0x29   : > { %3253 = vmatpush.bf16.msra.mxu3 %v3166_v32  ;;  %643 = vmatpush.bf16.msra.mxu0 %v3166_v32  ;;  %399 = vst [vmem:[#allocation2 + $0xd8] sm:$0xff] %v3276_v1  ;;  %v3162_v32 = vld [vmem:[%s4222_s3 + $0x20] sm:$0xff] }
  0x2a   : > { %400 = vst [vmem:[#allocation2 + $0xe0] sm:$0xff] %v3276_v1 }
  0x2b   : > { %664 = vmatmul.bf16.vlgmr.msra.gmra.mxu1 %v3424_v40  ;;  %401 = vst [vmem:[#allocation2 + $0xe8] sm:$0x3] %v3276_v1  ;;  %684 = vmatmul.bf16.vlgmr.msra.gmra.mxu2 %v563_v41  ;;  %v3558_v41 = vpack.c.bf16 %v357_v21, %v356_v20 }
  0x2c   : > { %975 = vmatpush.bf16.msrb.mxu2 %v3181_v42  ;;  %402 = vst [vmem:[#allocation2 + $0xf0] sm:$0xff] %v3276_v1  ;;  %704 = vmatmul.bf16.vlgmr.msra.gmra.mxu3 %v567_v45  ;;  %v255_v42 = vld [vmem:[%s3338_s29 + $0x98] sm:$0xff]  ;;  %v568_v45 = vpack.c.bf16 %v365_v23, %v364_v22 }
  0x2d   : > { %1209 = vmatpush.bf16.msrb.mxu3 %v3189_v43  ;;  %644 = vmatmul.bf16.vlgmr.msra.gmra.mxu0 %v555_v46  ;;  %403 = vst [vmem:[#allocation2 + $0xf8] sm:$0xff] %v3276_v1  ;;  %v3185_v43 = vld [vmem:[%s4222_s3 + $0xd8] sm:$0xff]  ;;  %v3576_v46 = vpack.c.bf16 %v341_v27, %v340_v24  ;;  %v291_v58 = vmul.f32 %v3329_v3, %v255_v42  ;;  %v3191_v42 = vld [vmem:[%s4222_s3 + $0x108] sm:$0xff] }
  0x2e   : > { %773 = vmatpush.bf16.msrb.mxu1 %v3165_v50  ;;  %1443 = vmatpush.bf16.msrb.mxu0 %v3197_v51  ;;  %404 = vst [vmem:[#allocation2 + $0x100] sm:$0x3] %v3276_v1  ;;  %v239_v50 = vld [vmem:[%s3338_s29 + $0x18] sm:$0xff] }
  0x2f   : > { %405 = vst [vmem:[#allocation2 + $0x108] sm:$0xff] %v3276_v1  ;;  %v3161_v51 = vld [vmem:[%s4222_s3 + $0x18] sm:$0xff]  ;;  %v275_v62 = vmul.f32 %v3329_v3, %v239_v50 }
  0x30   : > { %976 = vmatpush.bf16.msrb.mxu2 %v3180_v53  ;;  %406 = vst [vmem:[#allocation2 + $0x110] sm:$0xff] %v3276_v1  ;;  %v282_v53 = vmul.f32 %v3329_v3, %v246_v35  ;;  %v3641_v35 = vadd.f32 %v3343_v4, %v299_v60  ;;  %v3221_v60 = vld [vmem:[%s4222_s3 + $0x1f8] sm:$0xff] }
  0x31   : > { %1210 = vmatpush.bf16.msrb.mxu3 %v3188_v54  ;;  %407 = vst [vmem:[#allocation2 + $0x118] sm:$0x3] %v3276_v1  ;;  %v283_v54 = vmul.f32 %v3329_v3, %v247_v36  ;;  %v3644_v36 = vadd.f32 %v3343_v4, %v274_v61  ;;  %v3647_v37 = vadd.f32 %v3343_v4, %v275_v62 }
  0x32   : > { %774 = vmatpush.bf16.msrb.mxu1 %v3164_v63  ;;  %1444 = vmatpush.bf16.msrb.mxu0 %v3196_v9  ;;  %408 = vst [vmem:[#allocation2 + $0x120] sm:$0xff] %v3276_v1  ;;  %v3160_v63 = vld [vmem:[%s4222_s3 + $0x10] sm:$0xff] }
  0x33   : > { %409 = vst [vmem:[#allocation2 + $0x128] sm:$0xff] %v3276_v1  ;;  %v3622_v9 = vadd.f32 %v3343_v4, %v283_v54  ;;  %v257_v54 = vld [vmem:[%s3338_s29 + $0xa8] sm:$0xff] }
  0x34   : > { %977 = vmatpush.bf16.msrb.mxu2 %v3179_v0  ;;  %410 = vst [vmem:[#allocation2 + $0x130] sm:$0x3] %v3276_v1  ;;  %v3175_v0 = vld [vmem:[%s4222_s3 + $0x88] sm:$0xff] }
  0x35   : > { %1211 = vmatpush.bf16.msrb.mxu3 %v3187_v8  ;;  %411 = vst [vmem:[#allocation2 + $0x138] sm:$0xff] %v3276_v1  ;;  %v3619_v8 = vadd.f32 %v3343_v4, %v282_v53  ;;  %v351_v47 = vmax.f32 %v3622_v9, 0.0  ;;  %v256_v53 = vld [vmem:[%s3338_s29 + $0xa0] sm:$0xff] }
  0x36   : > { %775 = vmatpush.bf16.msrb.mxu1 %v3163_v14  ;;  %1445 = vmatpush.bf16.msrb.mxu0 %v3195_v15  ;;  %412 = vst [vmem:[#allocation2 + $0x140] sm:$0xff] %v3276_v1  ;;  %v3625_v14 = vadd.f32 %v3343_v4, %v290_v57  ;;  %v3628_v15 = vadd.f32 %v3343_v4, %v291_v58 }
  0x37   : > { %413 = vst [vmem:[#allocation2 + $0x148] sm:$0x3] %v3276_v1  ;;  %v292_v5 = vmul.f32 %v3329_v3, %v256_v53 }
  0x38   : > { %978 = vmatpush.bf16.msrb.mxu2 %v3178_v16  ;;  %414 = vst [vmem:[#allocation2 + $0x150] sm:$0xff] %v3276_v1  ;;  %v3183_v16 = vld [vmem:[%s4222_s3 + $0xc8] sm:$0xff]  ;;  %v358_v48 = vmax.f32 %v3625_v14, 0.0  ;;  %v359_v49 = vmax.f32 %v3628_v15, 0.0 }
  0x39   : > { %1212 = vmatpush.bf16.msrb.mxu3 %v3186_v17  ;;  %415 = vst [vmem:[#allocation2 + $0x158] sm:$0xff] %v3276_v1  ;;  %v3192_v17 = vld [vmem:[%s4222_s3 + $0x110] sm:$0xff]  ;;  %v328_v62 = vadd.f32 %v3343_v4, %v292_v5  ;;  %v1102_v5 = vld [vmem:[#allocation2 + $0x60] sm:$0xff] }
  0x3a   : > { %776 = vmatpush.bf16.msrb.mxu1 %v3162_v32  ;;  %1446 = vmatpush.bf16.msrb.mxu0 %v3194_v44  ;;  %416 = vst [vmem:[#allocation2 + $0x160] sm:$0x3] %v3276_v1  ;;  %v3638_v32 = vadd.f32 %v3343_v4, %v298_v59  ;;  %v3182_v44 = vld [vmem:[%s4222_s3 + $0xc0] sm:$0xff]  ;;  %v3696_v28 = vpack.c.bf16 %v359_v49, %v358_v48 }
  0x3b   : > { %417 = vst [vmem:[#allocation2 + $0x168] sm:$0xff] %v3276_v1  ;;  %669 = vmatmul.bf16.gmra.mxu1 %v3552_v39  ;;  %689 = vmatmul.bf16.gmra.mxu2 %v3558_v41 }
  0x3c   : > { %979 = vmatpush.bf16.msrb.mxu2 %v3177_v38  ;;  %418 = vst [vmem:[#allocation2 + $0x170] sm:$0xff] %v3276_v1  ;;  %709 = vmatmul.bf16.gmra.mxu3 %v568_v45  ;;  %v3159_v38 = vld [vmem:[%s4222_s3 + $0x8] sm:$0xff]  ;;  %v350_v45 = vmax.f32 %v3619_v8, 0.0  ;;  %v366_v50 = vmax.f32 %v3638_v32, 0.0 }
  0x3d   : > { %1213 = vmatpush.bf16.msrb.mxu3 %v3185_v43  ;;  %649 = vmatmul.bf16.gmra.mxu0 %v3576_v46  ;;  %419 = vst [vmem:[#allocation2 + $0x178] sm:$0x3] %v3276_v1  ;;  %v3174_v43 = vld [vmem:[%s4222_s3 + $0x80] sm:$0xff] }
  0x3e   : > { %777 = vmatpush.bf16.msrb.mxu1 %v3161_v51  ;;  %1447 = vmatpush.bf16.msrb.mxu0 %v3193_v52  ;;  %420 = vst [vmem:[#allocation2 + $0x180] sm:$0xff] %v3276_v1  ;;  %v367_v51 = vmax.f32 %v3641_v35, 0.0  ;;  %v342_v52 = vmax.f32 %v3644_v36, 0.0  ;;  %v3690_v26 = vpack.c.bf16 %v351_v47, %v350_v45  ;;  %v862_v35 = vld [vmem:[#allocation2 + $0x2] sm:$0xff]  ;;  %v863_v36 = vld [vmem:[#allocation2 + $0xa] sm:$0xff] }
  0x3f   : > { %421 = vst [vmem:[#allocation2 + $0x188] sm:$0xff] %v3276_v1 }
  0x40   : > { %980 = vmatpush.bf16.msrb.mxu2 %v3176_v55  ;;  %422 = vst [vmem:[#allocation2 + $0x190] sm:$0x3] %v3276_v1  ;;  %v569_v29 = vpack.c.bf16 %v367_v51, %v366_v50  ;;  %v264_v55 = vld [vmem:[%s3338_s29 + $0xe0] sm:$0xff] }
  0x41   : > { %1214 = vmatpush.bf16.msrb.mxu3 %v3184_v56  ;;  %423 = vst [vmem:[#allocation2 + $0x198] sm:$0xff] %v3276_v1  ;;  %v265_v56 = vld [vmem:[%s3338_s29 + $0xe8] sm:$0xff]  ;;  %v300_v59 = vmul.f32 %v3329_v3, %v264_v55 }
  0x42   : > { %778 = vmatpush.bf16.msrb.mxu1 %v3160_v63  ;;  %1448 = vmatpush.bf16.msrb.mxu0 %v3192_v17  ;;  %424 = vst [vmem:[#allocation2 + $0x1a0] sm:$0xff] %v3276_v1  ;;  %v301_v6 = vmul.f32 %v3329_v3, %v265_v56  ;;  %v3211_v56 = vld [vmem:[%s4222_s3 + $0x1a8] sm:$0xff] }
  0x43   : > { %425 = vst [vmem:[#allocation2 + $0x1a8] sm:$0x3] %v3276_v1  ;;  %v343_v1 = vmax.f32 %v3647_v37, 0.0  ;;  %v336_v12 = vadd.f32 %v3343_v4, %v300_v59 }
  0x44   : > { %981 = vmatpush.bf16.msrb.mxu2 %v3175_v0  ;;  %441 = vst [vmem:[#allocation2 + $0xc1] sm:$0xff] %v354_v30  ;;  %v3190_v30 = vld [vmem:[%s4222_s3 + $0x100] sm:$0xff]  ;;  %v360_v0 = vmax.f32 %v328_v62, 0.0 }
  0x45   : > { %1215 = vmatpush.bf16.msrb.mxu3 %v3183_v16  ;;  %442 = vst [vmem:[#allocation2 + $0xc9] sm:$0xff] %v355_v31  ;;  %v248_v31 = vld [vmem:[%s3338_s29 + $0x60] sm:$0xff]  ;;  %v368_v16 = vmax.f32 %v336_v12, 0.0 }
  0x46   : > { %779 = vmatpush.bf16.msrb.mxu1 %v3159_v38  ;;  %1449 = vmatpush.bf16.msrb.mxu0 %v3191_v42  ;;  %449 = vst [vmem:[#allocation2 + $0x121] sm:$0xff] %v362_v33  ;;  %v249_v33 = vld [vmem:[%s3338_s29 + $0x68] sm:$0xff]  ;;  %v284_v57 = vmul.f32 %v3329_v3, %v248_v31  ;;  %v3218_v62 = vld [vmem:[%s4222_s3 + $0x1e0] sm:$0xff] }
  0x47   : > { %450 = vst [vmem:[#allocation2 + $0x129] sm:$0xff] %v363_v34  ;;  %v3710_v34 = vpack.c.bf16 %v343_v1, %v342_v52  ;;  %v285_v58 = vmul.f32 %v3329_v3, %v249_v33 }
  0x48   : > { %982 = vmatpush.bf16.msrb.mxu2 %v3174_v43  ;;  %435 = vst [vmem:[#allocation2 + $0x79] sm:$0xff] %v348_v18  ;;  %v241_v18 = vld [vmem:[%s3338_s29 + $0x28] sm:$0xff]  ;;  %v894_v43 = vpack.c.bf16 %v863_v36, %v862_v35 }
  0x49   : > { %1216 = vmatpush.bf16.msrb.mxu3 %v3182_v44  ;;  %436 = vst [vmem:[#allocation2 + $0x81] sm:$0xff] %v349_v19  ;;  %v293_v19 = vmul.f32 %v3329_v3, %v257_v54  ;;  %v321_v61 = vadd.f32 %v3343_v4, %v285_v58 }
  0x4a   : > { %780 = vmatpush.bf16.msrb.mxu1 %v3158_v25  ;;  %1450 = vmatpush.bf16.msrb.mxu0 %v3190_v30  ;;  %443 = vst [vmem:[#allocation2 + $0xd9] sm:$0xff] %v356_v20  ;;  %v277_v20 = vmul.f32 %v3329_v3, %v241_v18  ;;  %v320_v3 = vadd.f32 %v3343_v4, %v284_v57  ;;  %v3227_v18 = vld [vmem:[%s4222_s3 + $0x228] sm:$0xff] }
  0x4b   : > { %444 = vst [vmem:[#allocation2 + $0xe1] sm:$0xff] %v357_v21  ;;  %674 = vmatmul.bf16.gmra.mxu1 %v3690_v26  ;;  %694 = vmatmul.bf16.gmra.mxu2 %v3696_v28  ;;  %v3213_v21 = vld [vmem:[%s4222_s3 + $0x1b8] sm:$0xff]  ;;  %v329_v11 = vadd.f32 %v3343_v4, %v293_v19  ;;  %v353_v63 = vmax.f32 %v321_v61, 0.0  ;;  %v1103_v19 = vld [vmem:[#allocation2 + $0x68] sm:$0xff] }
  0x4c   : > { %451 = vst [vmem:[#allocation2 + $0x139] sm:$0xff] %v364_v22  ;;  %714 = vmatmul.bf16.gmra.mxu3 %v569_v29  ;;  %v3229_v22 = vld [vmem:[%s4222_s3 + $0x238] sm:$0xff]  ;;  %1912 = vmatpush.bf16.msra.mxu2 %v3213_v21  ;;  %v313_v13 = vadd.f32 %v3343_v4, %v277_v20  ;;  %v871_v20 = vld [vmem:[#allocation2 + $0x6a] sm:$0xff] }
  0x4d   : > { %654 = vmatmul.bf16.gmra.mxu0 %v3710_v34  ;;  %452 = vst [vmem:[#allocation2 + $0x141] sm:$0xff] %v365_v23  ;;  %2146 = vmatpush.bf16.msra.mxu3 %v3221_v60  ;;  %v337_v23 = vadd.f32 %v3343_v4, %v301_v6  ;;  %v361_v8 = vmax.f32 %v329_v11, 0.0  ;;  %v1131_v6 = vpack.c.bf16 %v1103_v19, %v1102_v5 }
  0x4e   : > { %427 = vst [vmem:[#allocation2 + $0x19] sm:$0xff] %v340_v24  ;;  %1677 = vmatpush.bf16.msra.mxu1 %v3205_v10  ;;  %2380 = vmatpush.bf16.msra.mxu0 %v3229_v22  ;;  %v312_v24 = vadd.f32 %v3343_v4, %v276_v7  ;;  %v345_v4 = vmax.f32 %v313_v13, 0.0  ;;  %v870_v7 = vld [vmem:[#allocation2 + $0x62] sm:$0xff] }
  0x4f   : > { %428 = vst [vmem:[#allocation2 + $0x21] sm:$0xff] %v341_v27  ;;  %v352_v27 = vmax.f32 %v320_v3, 0.0  ;;  %v369_v17 = vmax.f32 %v337_v23, 0.0  ;;  %v3781_v14 = vpack.c.bf16 %v361_v8, %v360_v0  ;;  %v1104_v21 = vld [vmem:[#allocation2 + $0x78] sm:$0xff]  ;;  %v3825_v10 = vpack.c.bf16 %v871_v20, %v870_v7  ;;  %v3202_v23 = vld [vmem:[%s4222_s3 + $0x160] sm:$0xff] }
  0x50   : > { %437 = vst [vmem:[#allocation2 + $0x91] sm:$0xff] %v350_v45  ;;  %v344_v38 = vmax.f32 %v312_v24, 0.0  ;;  %v3277_v45 = vmov 0.0|0.0   ;;  %v1105_v60 = vld [vmem:[#allocation2 + $0x80] sm:$0xff] }
  0x51   : > { %438 = vst [vmem:[#allocation2 + $0x99] sm:$0xff] %v351_v47  ;;  %v3779_v9 = vpack.c.bf16 %v353_v63, %v352_v27  ;;  %v570_v15 = vpack.c.bf16 %v369_v17, %v368_v16  ;;  %v3212_v47 = vld [vmem:[%s4222_s3 + $0x1b0] sm:$0xff]  ;;  %v1132_v3 = vpack.c.bf16 %v1105_v60, %v1104_v21  ;;  %v3226_v13 = vld [vmem:[%s4222_s3 + $0x220] sm:$0xff] }
  0x52   : > { %445 = vst [vmem:[#allocation2 + $0xf1] sm:$0xff] %v358_v48  ;;  %v558_v32 = vpack.c.bf16 %v345_v4, %v344_v38  ;;  %v3220_v48 = vld [vmem:[%s4222_s3 + $0x1f0] sm:$0xff]  ;;  %1913 = vmatpush.bf16.msra.mxu2 %v3212_v47 }
  0x53   : > { %446 = vst [vmem:[#allocation2 + $0xf9] sm:$0xff] %v359_v49  ;;  %v3204_v49 = vld [vmem:[%s4222_s3 + $0x170] sm:$0xff]  ;;  %2147 = vmatpush.bf16.msra.mxu3 %v3220_v48 }
  0x54   : > { %453 = vst [vmem:[#allocation2 + $0x151] sm:$0xff] %v366_v50  ;;  %v3228_v50 = vld [vmem:[%s4222_s3 + $0x230] sm:$0xff]  ;;  %1678 = vmatpush.bf16.msra.mxu1 %v3204_v49 }
  0x55   : > { %454 = vst [vmem:[#allocation2 + $0x159] sm:$0xff] %v367_v51  ;;  %v1096_v37 = vld [vmem:[#allocation2 + $0x18] sm:$0xff]  ;;  %2381 = vmatpush.bf16.msra.mxu0 %v3228_v50 }
  0x56   : > { %429 = vst [vmem:[#allocation2 + $0x31] sm:$0xff] %v342_v52  ;;  %v1097_v42 = vld [vmem:[#allocation2 + $0x20] sm:$0xff]  ;;  %1914 = vmatpush.bf16.msra.mxu2 %v3211_v56 }
  0x57   : > { %430 = vst [vmem:[#allocation2 + $0x39] sm:$0xff] %v343_v1  ;;  %v1128_v44 = vpack.c.bf16 %v1097_v42, %v1096_v37  ;;  %v865_v51 = vld [vmem:[#allocation2 + $0x22] sm:$0xff] }
  0x58   : > { %439 = vst [vmem:[#allocation2 + $0xa9] sm:$0xff] %v352_v27  ;;  %1679 = vmatpush.bf16.msra.mxu1 %v3203_v2  ;;  %v872_v27 = vld [vmem:[#allocation2 + $0x7a] sm:$0xff] }
  0x59   : > { %440 = vst [vmem:[#allocation2 + $0xb1] sm:$0xff] %v353_v63  ;;  %2382 = vmatpush.bf16.msra.mxu0 %v3227_v18  ;;  %v873_v63 = vld [vmem:[#allocation2 + $0x82] sm:$0xff] }
  0x5a   : > { %447 = vst [vmem:[#allocation2 + $0x109] sm:$0xff] %v360_v0  ;;  %v1106_v0 = vld [vmem:[#allocation2 + $0x90] sm:$0xff]  ;;  %v1110_v2 = vld [vmem:[#allocation2 + $0xc0] sm:$0xff]  ;;  %v1111_v18 = vld [vmem:[#allocation2 + $0xc8] sm:$0xff] }
  0x5b   : > { %679 = vmatmul.bf16.gmra.mxu1 %v3779_v9  ;;  %448 = vst [vmem:[#allocation2 + $0x111] sm:$0xff] %v361_v8  ;;  %699 = vmatmul.bf16.gmra.mxu2 %v3781_v14  ;;  %v1107_v8 = vld [vmem:[#allocation2 + $0x98] sm:$0xff]  ;;  %v1135_v20 = vpack.c.bf16 %v1111_v18, %v1110_v2 }
  0x5c   : > { %455 = vst [vmem:[#allocation2 + $0x169] sm:$0xff] %v368_v16  ;;  %719 = vmatmul.bf16.gmra.mxu3 %v570_v15  ;;  %1680 = vmatpush.bf16.msra.mxu1 %v3202_v23  ;;  %v1133_v15 = vpack.c.bf16 %v1107_v8, %v1106_v0  ;;  %v1113_v0 = vld [vmem:[#allocation2 + $0xe0] sm:$0xff] }
  0x5d   : > { %659 = vmatmul.bf16.gmra.mxu0 %v558_v32  ;;  %456 = vst [vmem:[#allocation2 + $0x171] sm:$0xff] %v369_v17  ;;  %v1098_v52 = vld [vmem:[#allocation2 + $0x30] sm:$0xff] }
  0x5e   : > { %431 = vst [vmem:[#allocation2 + $0x49] sm:$0xff] %v344_v38  ;;  %v1099_v1 = vld [vmem:[#allocation2 + $0x38] sm:$0xff]  ;;  %2383 = vmatpush.bf16.msra.mxu0 %v3226_v13  ;;  %v3857_v38 = vpack.c.bf16 %v873_v63, %v872_v27  ;;  %v878_v13 = vld [vmem:[#allocation2 + $0xc2] sm:$0xff]  ;;  %v879_v27 = vld [vmem:[#allocation2 + $0xca] sm:$0xff] }
  0x5f   : > { %432 = vst [vmem:[#allocation2 + $0x51] sm:$0xff] %v345_v4  ;;  %v3800_v30 = vpack.c.bf16 %v1099_v1, %v1098_v52  ;;  %v866_v31 = vld [vmem:[#allocation2 + $0x32] sm:$0xff]  ;;  %v867_v33 = vld [vmem:[#allocation2 + $0x3a] sm:$0xff] }
  0x60   : > { %v3805_v54 = vpack.c.bf16 %v867_v33, %v866_v31  ;;  %v1109_v47 = vld [vmem:[#allocation2 + $0xb0] sm:$0xff]  ;;  %v3209_v52 = vld [vmem:[%s4222_s3 + $0x198] sm:$0xff] }
  0x61   : > { %v3217_v1 = vld [vmem:[%s4222_s3 + $0x1d8] sm:$0xff]  ;;  %v876_v56 = vld [vmem:[#allocation2 + $0xaa] sm:$0xff] }
  0x62   : > { %v1112_v63 = vld [vmem:[#allocation2 + $0xd8] sm:$0xff] }
  0x65   : > { %v1100_v29 = vld [vmem:[#allocation2 + $0x48] sm:$0xff] }
  0x66   : > { %v1101_v53 = vld [vmem:[#allocation2 + $0x50] sm:$0xff] }
  0x67   : > { %v1130_v55 = vpack.c.bf16 %v1101_v53, %v1100_v29  ;;  %v868_v57 = vld [vmem:[#allocation2 + $0x4a] sm:$0xff]  ;;  %v869_v58 = vld [vmem:[#allocation2 + $0x52] sm:$0xff] }
  0x68   : > { %v3821_v59 = vpack.c.bf16 %v869_v58, %v868_v57  ;;  %v1344_v57 = vld [vmem:[#allocation2 + $0xc1] sm:$0xff]  ;;  %v1345_v58 = vld [vmem:[#allocation2 + $0xc9] sm:$0xff] }
  0x69   : > { %v1369_v21 = vpack.c.bf16 %v1345_v58, %v1344_v57  ;;  %v3224_v57 = vld [vmem:[%s4222_s3 + $0x210] sm:$0xff] }
  0x6b   : > { %781 = vmatmul.bf16.vlgmr.msrb.gmra.mxu1 %v3277_v45  ;;  %983 = vmatmul.bf16.vlgmr.msrb.gmra.mxu2 %v894_v43  ;;  %v874_v43 = vld [vmem:[#allocation2 + $0x92] sm:$0xff]  ;;  %v1108_v45 = vld [vmem:[#allocation2 + $0xa8] sm:$0xff] }
  0x6c   : > { %1217 = vmatmul.bf16.vlgmr.msrb.gmra.mxu3 %v1128_v44 }
  0x6d   : > { %1451 = vmatmul.bf16.vlgmr.msrb.gmra.mxu0 %v3576_v46  ;;  %v864_v46 = vld [vmem:[#allocation2 + $0x1a] sm:$0xff] }
  0x6e   : > { %v3798_v25 = vpack.c.bf16 %v865_v51, %v864_v46 }
  0x7b   : > { %786 = vmatmul.bf16.gmra.mxu1 %v1128_v44  ;;  %988 = vmatmul.bf16.gmra.mxu2 %v3798_v25  ;;  %v875_v44 = vld [vmem:[#allocation2 + $0x9a] sm:$0xff] }
  0x7c   : > { %1222 = vmatmul.bf16.gmra.mxu3 %v3800_v30  ;;  %v3877_v50 = vpack.c.bf16 %v875_v44, %v874_v43  ;;  %v3928_v43 = vpack.c.bf16 %v879_v27, %v878_v13  ;;  %v1114_v13 = vld [vmem:[#allocation2 + $0xf0] sm:$0xff]  ;;  %v1115_v27 = vld [vmem:[#allocation2 + $0xf8] sm:$0xff] }
  0x7d   : > { %1456 = vmatmul.bf16.gmra.mxu0 %v3710_v34  ;;  %v3219_v34 = vld [vmem:[%s4222_s3 + $0x1e8] sm:$0xff] }
  0x7e   : > { %2148 = vmatpush.bf16.msra.mxu3 %v3219_v34  ;;  %v877_v34 = vld [vmem:[#allocation2 + $0xb2] sm:$0xff] }
  0x82   : > { %2149 = vmatpush.bf16.msra.mxu3 %v3218_v62 }
  0x86   : > { %2150 = vmatpush.bf16.msra.mxu3 %v3217_v1  ;;  %v3216_v1 = vld [vmem:[%s4222_s3 + $0x1d0] sm:$0xff] }
  0x8a   : > { %2151 = vmatpush.bf16.msra.mxu3 %v3216_v1 }
  0x8b   : > { %791 = vmatmul.bf16.gmra.mxu1 %v3800_v30  ;;  %993 = vmatmul.bf16.gmra.mxu2 %v3805_v54 }
  0x8c   : > { %1227 = vmatmul.bf16.gmra.mxu3 %v1130_v55 }
  0x8d   : > { %1461 = vmatmul.bf16.gmra.mxu0 %v558_v32 }
  0x9b   : > { %796 = vmatmul.bf16.gmra.mxu1 %v1130_v55  ;;  %998 = vmatmul.bf16.gmra.mxu2 %v3821_v59  ;;  %v3225_v55 = vld [vmem:[%s4222_s3 + $0x218] sm:$0xff] }
  0x9c   : > { %1232 = vmatmul.bf16.gmra.mxu3 %v1131_v6  ;;  %2384 = vmatpush.bf16.msra.mxu0 %v3225_v55 }
  0x9d   : > { %1466 = vmatmul.bf16.gmra.mxu0 %v3424_v40  ;;  %v3210_v40 = vld [vmem:[%s4222_s3 + $0x1a0] sm:$0xff] }
  0x9e   : > { %1915 = vmatpush.bf16.msra.mxu2 %v3210_v40 }
  0xa0   : > { %2385 = vmatpush.bf16.msra.mxu0 %v3224_v57 }
  0xa2   : > { %1916 = vmatpush.bf16.msra.mxu2 %v3209_v52  ;;  %v3208_v52 = vld [vmem:[%s4222_s3 + $0x190] sm:$0xff] }
  0xa6   : > { %1917 = vmatpush.bf16.msra.mxu2 %v3208_v52  ;;  %v3950_v52 = vpack.c.bf16 %v1115_v27, %v1114_v13  ;;  %v1116_v13 = vld [vmem:[#allocation2 + $0x108] sm:$0xff]  ;;  %v1117_v27 = vld [vmem:[#allocation2 + $0x110] sm:$0xff] }
  0xa8   : > { %v3827_v22 = vpop.f32.mrf.mxu1 }
  0xaa   : > { %v3829_v61 = vpop.f32.mrf.mxu0 }
  0xab   : > { %801 = vmatmul.bf16.gmra.mxu1 %v1131_v6  ;;  %1003 = vmatmul.bf16.gmra.mxu2 %v3825_v10  ;;  %v3909_v6 = vpack.c.bf16 %v877_v34, %v876_v56 }
  0xac   : > { %1237 = vmatmul.bf16.gmra.mxu3 %v1132_v3 }
  0xad   : > { %1471 = vmatmul.bf16.gmra.mxu0 %v3552_v39 }
  0xae   : > { %v3839_v11 = vpop.f32.mrf.mxu2 }
  0xaf   : > { %v3841_v12 = vpop.f32.mrf.mxu3 }
  0xb0   : > { %v3846_v24 = vpop.f32.mrf.mxu1 }
  0xb2   : > { %v3848_v39 = vpop.f32.mrf.mxu0 }
  0xb6   : > { %v3853_v16 = vpop.f32.mrf.mxu2 }
  0xb7   : > { %v3855_v17 = vpop.f32.mrf.mxu3 }
  0xb8   : > { %v3859_v4 = vpop.f32.mrf.mxu1 }
  0xba   : > { %v3861_v32 = vpop.f32.mrf.mxu0 }
  0xbb   : > { %806 = vmatmul.bf16.gmra.mxu1 %v1132_v3  ;;  %1008 = vmatmul.bf16.gmra.mxu2 %v3857_v38 }
  0xbc   : > { %1242 = vmatmul.bf16.gmra.mxu3 %v1133_v15 }
  0xbd   : > { %1476 = vmatmul.bf16.gmra.mxu0 %v3690_v26  ;;  %v1134_v26 = vpack.c.bf16 %v1109_v47, %v1108_v45  ;;  %v1136_v45 = vpack.c.bf16 %v1113_v0, %v1112_v63 }
  0xbe   : > { %v3865_v35 = vpop.f32.mrf.mxu2 }
  0xbf   : > { %v3867_v36 = vpop.f32.mrf.mxu3 }
  0xc0   : > { %v3869_v37 = vpop.f32.mrf.mxu1 }
  0xc2   : > { %v3871_v42 = vpop.f32.mrf.mxu0 }
  0xc6   : > { %v3873_v48 = vpop.f32.mrf.mxu2 }
  0xc7   : > { %v3875_v49 = vpop.f32.mrf.mxu3 }
  0xc8   : > { %v3879_v46 = vpop.f32.mrf.mxu1 }
  0xca   : > { %v3881_v51 = vpop.f32.mrf.mxu0 }
  0xcb   : > { %811 = vmatmul.bf16.gmra.mxu1 %v1133_v15  ;;  %1013 = vmatmul.bf16.gmra.mxu2 %v3877_v50 }
  0xcc   : > { %1247 = vmatmul.bf16.gmra.mxu3 %v1134_v26 }
  0xcd   : > { %1481 = vmatmul.bf16.gmra.mxu0 %v3779_v9  ;;  %v3201_v9 = vld [vmem:[%s4222_s3 + $0x158] sm:$0xff] }
  0xce   : > { %v3891_v31 = vpop.f32.mrf.mxu2  ;;  %1681 = vmatpush.bf16.msra.mxu1 %v3201_v9 }
  0xcf   : > { %v3893_v33 = vpop.f32.mrf.mxu3 }
  0xd0   : > { %v3895_v29 = vpop.f32.mrf.mxu1 }
  0xd2   : > { %v3897_v53 = vpop.f32.mrf.mxu0 }
  0xd6   : > { %v3905_v5 = vpop.f32.mrf.mxu2 }
  0xd7   : > { %v3907_v19 = vpop.f32.mrf.mxu3 }
  0xd8   : > { %v3911_v7 = vpop.f32.mrf.mxu1 }
  0xda   : > { %v3913_v60 = vpop.f32.mrf.mxu0 }
  0xdb   : > { %816 = vmatmul.bf16.gmra.mxu1 %v1134_v26  ;;  %1018 = vmatmul.bf16.gmra.mxu2 %v3909_v6 }
  0xdc   : > { %1252 = vmatmul.bf16.gmra.mxu3 %v1135_v20 }
  0xdd   : > { %1486 = vmatmul.bf16.gmra.mxu0 %v1369_v21  ;;  %v881_v21 = vld [vmem:[#allocation2 + $0xe2] sm:$0xff] }
  0xde   : > { %v3916_v3 = vpop.f32.mrf.mxu2 }
  0xdf   : > { %v3918_v40 = vpop.f32.mrf.mxu3 }
  0xe0   : > { %v3920_v62 = vpop.f32.mrf.mxu1 }
  0xe2   : > { %v3922_v23 = vpop.f32.mrf.mxu0 }
  0xe6   : > { %v3924_v8 = vpop.f32.mrf.mxu2 }
  0xe7   : > { %v3926_v15 = vpop.f32.mrf.mxu3 }
  0xe8   : > { %v782_v44 = vpop.f32.mrf.mxu1 }
  0xe9   : > { %v783_v47 = vadd.f32 %v782_v44, %v3829_v61 }
  0xea   : > { %v1452_v26 = vpop.f32.mrf.mxu0 }
  0xeb   : > { %821 = vmatmul.bf16.gmra.mxu1 %v1135_v20  ;;  %1023 = vmatmul.bf16.gmra.mxu2 %v3928_v43  ;;  %v880_v20 = vld [vmem:[#allocation2 + $0xda] sm:$0xff] }
  0xec   : > { %1257 = vmatmul.bf16.gmra.mxu3 %v1136_v45  ;;  %v3948_v44 = vpack.c.bf16 %v881_v21, %v880_v20 }
  0xed   : > { %1491 = vmatmul.bf16.gmra.mxu0 %v3558_v41  ;;  %v3200_v41 = vld [vmem:[%s4222_s3 + $0x150] sm:$0xff] }
  0xee   : > { %v984_v9 = vpop.f32.mrf.mxu2  ;;  %1682 = vmatpush.bf16.msra.mxu1 %v3200_v41 }
  0xef   : > { %v1064_v55 = vadd.f32 %v984_v9, %v783_v47  ;;  %v1218_v61 = vpop.f32.mrf.mxu3 }
  0xf0   : > { %v784_v56 = vpop.f32.mrf.mxu1 }
  0xf1   : > { %v1298_v34 = vadd.f32 %v1218_v61, %v1064_v55  ;;  %v785_v2 = vadd.f32 %v784_v56, %v3848_v39 }
  0xf2   : > { %v1454_v18 = vpop.f32.mrf.mxu0 }
  0xf3   : > { %v3946_v58 = vadd.f32 %v1452_v26, %v1298_v34 }
  0xf6   : > { %v986_v63 = vpop.f32.mrf.mxu2 }
  0xf7   : > { %v1065_v0 = vadd.f32 %v986_v63, %v785_v2  ;;  %v1220_v39 = vpop.f32.mrf.mxu3 }
  0xf8   : > { %v787_v47 = vpop.f32.mrf.mxu1 }
  0xf9   : > { %v1299_v1 = vadd.f32 %v1220_v39, %v1065_v0  ;;  %v788_v9 = vadd.f32 %v787_v47, %v3861_v32  ;;  %v882_v32 = vld [vmem:[#allocation2 + $0xf2] sm:$0xff]  ;;  %v1138_v47 = vpack.c.bf16 %v1117_v27, %v1116_v13  ;;  %v884_v27 = vld [vmem:[#allocation2 + $0x10a] sm:$0xff] }
  0xfa   : > { %v1457_v55 = vpop.f32.mrf.mxu0 }
  0xfb   : > { %826 = vmatmul.bf16.gmra.mxu1 %v1136_v45  ;;  %1028 = vmatmul.bf16.gmra.mxu2 %v3948_v44  ;;  %v3954_v26 = vadd.f32 %v1454_v18, %v1299_v1  ;;  %v883_v45 = vld [vmem:[#allocation2 + $0xfa] sm:$0xff] }
  0xfc   : > { %1262 = vmatmul.bf16.gmra.mxu3 %v3950_v52  ;;  %v3961_v39 = vpack.c.bf16 %v883_v45, %v882_v32  ;;  %v3223_v45 = vld [vmem:[%s4222_s3 + $0x208] sm:$0xff] }
  0xfd   : > { %1496 = vmatmul.bf16.gmra.mxu0 %v3696_v28 }
  0xfe   : > { %v989_v61 = vpop.f32.mrf.mxu2  ;;  %2386 = vmatpush.bf16.msra.mxu0 %v3223_v45 }
  0xff   : > { %v1066_v56 = vadd.f32 %v989_v61, %v788_v9  ;;  %v1223_v34 = vpop.f32.mrf.mxu3 }
 0x100   : > { %v789_v2 = vpop.f32.mrf.mxu1 }
 0x101   : > { %v1300_v41 = vadd.f32 %v1223_v34, %v1066_v56  ;;  %v790_v57 = vadd.f32 %v789_v2, %v3871_v42  ;;  %v3215_v56 = vld [vmem:[%s4222_s3 + $0x1c8] sm:$0xff] }
 0x102   : > { %v1459_v20 = vpop.f32.mrf.mxu0  ;;  %2152 = vmatpush.bf16.msra.mxu3 %v3215_v56 }
 0x103   : > { %v3959_v21 = vadd.f32 %v1457_v55, %v1300_v41  ;;  %v3207_v55 = vld [vmem:[%s4222_s3 + $0x188] sm:$0xff] }
 0x104   : > { %1918 = vmatpush.bf16.msra.mxu2 %v3207_v55 }
 0x106   : > { %v991_v18 = vpop.f32.mrf.mxu2 }
 0x107   : > { %v1067_v63 = vadd.f32 %v991_v18, %v790_v57  ;;  %v1225_v0 = vpop.f32.mrf.mxu3  ;;  %v885_v18 = vld [vmem:[#allocation2 + $0x112] sm:$0xff] }
 0x108   : > { %v792_v28 = vpop.f32.mrf.mxu1  ;;  %v3984_v56 = vpack.c.bf16 %v885_v18, %v884_v27 }
 0x109   : > { %v1301_v1 = vadd.f32 %v1225_v0, %v1067_v63  ;;  %v793_v9 = vadd.f32 %v792_v28, %v3881_v51  ;;  %v1118_v63 = vld [vmem:[#allocation2 + $0x120] sm:$0xff]  ;;  %v1119_v0 = vld [vmem:[#allocation2 + $0x128] sm:$0xff] }
 0x10a   : > { %v1462_v61 = vpop.f32.mrf.mxu0  ;;  %v1352_v28 = vld [vmem:[#allocation2 + $0x121] sm:$0xff] }
 0x10b   : > { %831 = vmatmul.bf16.gmra.mxu1 %v3950_v52  ;;  %1033 = vmatmul.bf16.gmra.mxu2 %v3961_v39  ;;  %v3966_v42 = vadd.f32 %v1459_v20, %v1301_v1  ;;  %v1353_v1 = vld [vmem:[#allocation2 + $0x129] sm:$0xff] }
 0x10c   : > { %1267 = vmatmul.bf16.gmra.mxu3 %v1138_v47 }
 0x10d   : > { %1501 = vmatmul.bf16.gmra.mxu0 %v3781_v14  ;;  %v3199_v14 = vld [vmem:[%s4222_s3 + $0x148] sm:$0xff] }
 0x10e   : > { %v994_v34 = vpop.f32.mrf.mxu2  ;;  %1683 = vmatpush.bf16.msra.mxu1 %v3199_v14 }
 0x10f   : > { %v1068_v51 = vadd.f32 %v994_v34, %v793_v9  ;;  %v1228_v2 = vpop.f32.mrf.mxu3 }
 0x110   : > { %v794_v41 = vpop.f32.mrf.mxu1 }
 0x111   : > { %v1302_v57 = vadd.f32 %v1228_v2, %v1068_v51  ;;  %v795_v20 = vadd.f32 %v794_v41, %v3897_v53  ;;  %v3986_v51 = vpack.c.bf16 %v1119_v0, %v1118_v63  ;;  %v3988_v2 = vpack.c.bf16 %v1353_v1, %v1352_v28 }
 0x112   : > { %v1464_v32 = vpop.f32.mrf.mxu0 }
 0x113   : > { %v3982_v13 = vadd.f32 %v1462_v61, %v1302_v57  ;;  %4231 = vst [vmem:[#allocation4_spill] sm:$0xff] %v3986_v51 }
 0x114   : > { %4232 = vst [vmem:[#allocation5_spill] sm:$0xff] %v3988_v2 }
 0x115   : > { %4230 = vst [vmem:[#allocation3_spill] sm:$0xff] %v3982_v13 }
 0x116   : > { %v996_v53 = vpop.f32.mrf.mxu2 }
 0x117   : > { %v1069_v9 = vadd.f32 %v996_v53, %v795_v20  ;;  %v1230_v55 = vpop.f32.mrf.mxu3  ;;  %v1120_v53 = vld [vmem:[#allocation2 + $0x138] sm:$0xff] }
 0x118   : > { %v797_v34 = vpop.f32.mrf.mxu1 }
 0x119   : > { %v1303_v41 = vadd.f32 %v1230_v55, %v1069_v9  ;;  %v798_v61 = vadd.f32 %v797_v34, %v3913_v60  ;;  %v886_v60 = vld [vmem:[#allocation2 + $0x122] sm:$0xff]  ;;  %v1354_v9 = vld [vmem:[#allocation2 + $0x139] sm:$0xff] }
 0x11a   : > { %v1467_v57 = vpop.f32.mrf.mxu0  ;;  %v1355_v55 = vld [vmem:[#allocation2 + $0x141] sm:$0xff] }
 0x11b   : > { %836 = vmatmul.bf16.gmra.mxu1 %v1138_v47  ;;  %1038 = vmatmul.bf16.gmra.mxu2 %v3984_v56  ;;  %v3992_v14 = vadd.f32 %v1464_v32, %v1303_v41  ;;  %v887_v47 = vld [vmem:[#allocation2 + $0x12a] sm:$0xff]  ;;  %v1121_v32 = vld [vmem:[#allocation2 + $0x140] sm:$0xff] }
 0x11c   : > { %1272 = vmatmul.bf16.gmra.mxu3 %v3986_v51 }
 0x11d   : > { %4233 = vst [vmem:[#allocation6_spill] sm:$0xff] %v3992_v14  ;;  %1506 = vmatmul.bf16.gmra.mxu0 %v3988_v2 }
 0x11e   : > { %v999_v20 = vpop.f32.mrf.mxu2 }
 0x11f   : > { %v1070_v45 = vadd.f32 %v999_v20, %v798_v61  ;;  %v1233_v27 = vpop.f32.mrf.mxu3  ;;  %v3999_v61 = vpack.c.bf16 %v887_v47, %v886_v60  ;;  %v3214_v60 = vld [vmem:[%s4222_s3 + $0x1c0] sm:$0xff]  ;;  %v267_v47 = vld [vmem:[%s3338_s29 + $0xf8] sm:$0xff] }
 0x120   : > { %v799_v18 = vpop.f32.mrf.mxu1  ;;  %2153 = vmatpush.bf16.msra.mxu3 %v3214_v60 }
 0x121   : > { %v1304_v63 = vadd.f32 %v1233_v27, %v1070_v45  ;;  %v800_v0 = vadd.f32 %v799_v18, %v3922_v23  ;;  %4235 = vst [vmem:[#allocation8_spill] sm:$0xff] %v3999_v61  ;;  %v1140_v45 = vpack.c.bf16 %v1121_v32, %v1120_v53  ;;  %v1374_v27 = vpack.c.bf16 %v1355_v55, %v1354_v9  ;;  %v3266_v55 = vld [vmem:[%s4221_s2] ss:$0 sm:$0xff] }
 0x122   : > { %v1469_v28 = vpop.f32.mrf.mxu0 }
 0x123   : > { %v3997_v1 = vadd.f32 %v1467_v57, %v1304_v63  ;;  %v266_v57 = vld [vmem:[%s3338_s29 + $0xf0] sm:$0xff] }
 0x125   : > { %4234 = vst [vmem:[#allocation7_spill] sm:$0xff] %v3997_v1 }
 0x126   : > { %v1001_v34 = vpop.f32.mrf.mxu2 }
 0x127   : > { %v1071_v41 = vadd.f32 %v1001_v34, %v800_v0  ;;  %v1235_v14 = vpop.f32.mrf.mxu3  ;;  %v3206_v0 = vld [vmem:[%s4222_s3 + $0x180] sm:$0xff] }
 0x128   : > { %v802_v20 = vpop.f32.mrf.mxu1  ;;  %1919 = vmatpush.bf16.msra.mxu2 %v3206_v0 }
 0x129   : > { %v1305_v23 = vadd.f32 %v1235_v14, %v1071_v41  ;;  %v3265_v14 = vld [vmem:[%s4220_s1] ss:$0 sm:$0xff]  ;;  %v803_v32 = vadd.f32 %v802_v20, %v3827_v22 }
 0x12a   : > { %v1472_v18 = vpop.f32.mrf.mxu0  ;;  %v302_v53 = vmul.f32 %v3265_v14, %v266_v57  ;;  %v3198_v22 = vld [vmem:[%s4222_s3 + $0x140] sm:$0xff] }
 0x12b   : > { %841 = vmatmul.bf16.gmra.mxu1 %v3986_v51  ;;  %1043 = vmatmul.bf16.gmra.mxu2 %v3999_v61  ;;  %v4004_v63 = vadd.f32 %v1469_v28, %v1305_v23  ;;  %v303_v28 = vmul.f32 %v3265_v14, %v267_v47  ;;  %v3222_v20 = vld [vmem:[%s4222_s3 + $0x200] sm:$0xff] }
 0x12c   : > { %1277 = vmatmul.bf16.gmra.mxu3 %v1140_v45  ;;  %v4020_v34 = vadd.f32 %v3266_v55, %v302_v53  ;;  %1684 = vmatpush.bf16.msra.mxu1 %v3198_v22  ;;  %v888_v47 = vld [vmem:[#allocation2 + $0x13a] sm:$0xff]  ;;  %v889_v14 = vld [vmem:[#allocation2 + $0x142] sm:$0xff]  ;;  %v1122_v53 = vld [vmem:[#allocation2 + $0x150] sm:$0xff] }
 0x12d   : > { %4236 = vst [vmem:[#allocation9_spill] sm:$0xff] %v4004_v63  ;;  %1511 = vmatmul.bf16.gmra.mxu0 %v1374_v27  ;;  %v4022_v23 = vadd.f32 %v3266_v55, %v303_v28  ;;  %v1123_v28 = vld [vmem:[#allocation2 + $0x158] sm:$0xff]  ;;  %v4039_v2 = vpack.c.bf16 %v889_v14, %v888_v47 }
 0x12e   : > { %v1004_v9 = vpop.f32.mrf.mxu2  ;;  %v4227_v1 = vmax.f32 %v4020_v34, 0.0  ;;  %2387 = vmatpush.bf16.msra.mxu0 %v3222_v20  ;;  %v1357_v55 = vld [vmem:[#allocation2 + $0x159] sm:$0xff]  ;;  %v1141_v20 = vpack.c.bf16 %v1123_v28, %v1122_v53  ;;  %v1124_v28 = vld [vmem:[#allocation2 + $0x168] sm:$0xff] }
 0x12f   : > { %v1072_v41 = vadd.f32 %v1004_v9, %v803_v32  ;;  %v1238_v27 = vpop.f32.mrf.mxu3  ;;  %v4229_v0 = vmax.f32 %v4022_v23, 0.0  ;;  %v1356_v9 = vld [vmem:[#allocation2 + $0x151] sm:$0xff] }
 0x130   : > { %v804_v63 = vpop.f32.mrf.mxu1  ;;  %457 = vst [vmem:[#allocation2 + $0x181] sm:$0xff] %v4227_v1  ;;  %v1375_v1 = vpack.c.bf16 %v1357_v55, %v1356_v9  ;;  %v890_v53 = vld [vmem:[#allocation2 + $0x152] sm:$0xff] }
 0x131   : > { %v1306_v57 = vadd.f32 %v1238_v27, %v1072_v41  ;;  %458 = vst [vmem:[#allocation2 + $0x189] sm:$0xff] %v4229_v0  ;;  %v805_v32 = vadd.f32 %v804_v63, %v3846_v24  ;;  %v1125_v9 = vld [vmem:[#allocation2 + $0x170] sm:$0xff] }
 0x132   : > { %v1474_v13 = vpop.f32.mrf.mxu0 }
 0x133   : > { %v4036_v60 = vadd.f32 %v1472_v18, %v1306_v57 }
 0x135   : > { %4237 = vst [vmem:[#allocation10_spill] sm:$0xff] %v4036_v60 }
 0x136   : > { %v1006_v41 = vpop.f32.mrf.mxu2 }
 0x137   : > { %v1073_v27 = vadd.f32 %v1006_v41, %v805_v32  ;;  %v1240_v61 = vpop.f32.mrf.mxu3 }
 0x138   : > { %v807_v22 = vpop.f32.mrf.mxu1 }
 0x139   : > { %v1307_v51 = vadd.f32 %v1240_v61, %v1073_v27  ;;  %v808_v24 = vadd.f32 %v807_v22, %v3859_v4  ;;  %v891_v61 = vld [vmem:[#allocation2 + $0x15a] sm:$0xff] }
 0x13a   : > { %v1477_v0 = vpop.f32.mrf.mxu0  ;;  %v4048_v4 = vpack.c.bf16 %v891_v61, %v890_v53 }
 0x13b   : > { %846 = vmatmul.bf16.gmra.mxu1 %v1140_v45  ;;  %1048 = vmatmul.bf16.gmra.mxu2 %v4039_v2  ;;  %v4042_v18 = vadd.f32 %v1474_v13, %v1307_v51  ;;  %v1358_v13 = vld [vmem:[#allocation2 + $0x169] sm:$0xff]  ;;  %v1359_v51 = vld [vmem:[#allocation2 + $0x171] sm:$0xff] }
 0x13c   : > { %1282 = vmatmul.bf16.gmra.mxu3 %v1141_v20 }
 0x13d   : > { %1516 = vmatmul.bf16.gmra.mxu0 %v1375_v1 }
 0x13e   : > { %v1009_v63 = vpop.f32.mrf.mxu2 }
 0x13f   : > { %v1074_v57 = vadd.f32 %v1009_v63, %v808_v24  ;;  %v1243_v32 = vpop.f32.mrf.mxu3  ;;  %v1142_v24 = vpack.c.bf16 %v1125_v9, %v1124_v28  ;;  %v1376_v63 = vpack.c.bf16 %v1359_v51, %v1358_v13  ;;  %v892_v28 = vld [vmem:[#allocation2 + $0x16a] sm:$0xff]  ;;  %v893_v9 = vld [vmem:[#allocation2 + $0x172] sm:$0xff]  ;;  %v1126_v13 = vld [vmem:[#allocation2 + $0x180] sm:$0xff] }
 0x140   : > { %v809_v41 = vpop.f32.mrf.mxu1  ;;  %v1127_v51 = vld [vmem:[#allocation2 + $0x188] sm:$0xff] }
 0x141   : > { %v1308_v47 = vadd.f32 %v1243_v32, %v1074_v57  ;;  %v810_v45 = vadd.f32 %v809_v41, %v3869_v37 }
 0x142   : > { %v1479_v14 = vpop.f32.mrf.mxu0 }
 0x143   : > { %v4045_v60 = vadd.f32 %v1477_v0, %v1308_v47 }
 0x145   : > { %4238 = vst [vmem:[#allocation11_spill] sm:$0xff] %v4045_v60 }
 0x146   : > { %v1011_v55 = vpop.f32.mrf.mxu2 }
 0x147   : > { %v1075_v1 = vadd.f32 %v1011_v55, %v810_v45  ;;  %v1245_v27 = vpop.f32.mrf.mxu3 }
 0x148   : > { %v812_v22 = vpop.f32.mrf.mxu1 }
 0x149   : > { %v1309_v57 = vadd.f32 %v1245_v27, %v1075_v1  ;;  %v813_v37 = vadd.f32 %v812_v22, %v3879_v46  ;;  %v1143_v22 = vpack.c.bf16 %v1127_v51, %v1126_v13  ;;  %v2033_v51 = vld [vmem:[#allocation2 + $0x31] sm:$0xff] }
 0x14a   : > { %v1482_v32 = vpop.f32.mrf.mxu0 }
 0x14b   : > { %851 = vmatmul.bf16.gmra.mxu1 %v1141_v20  ;;  %1053 = vmatmul.bf16.gmra.mxu2 %v4048_v4  ;;  %v4051_v0 = vadd.f32 %v1479_v14, %v1309_v57  ;;  %v4239_v57 = vmax.f32 %v4020_v34, 0.0 }
 0x14c   : > { %1287 = vmatmul.bf16.gmra.mxu3 %v1142_v24 }
 0x14d   : > { %1521 = vmatmul.bf16.gmra.mxu0 %v1376_v63  ;;  %v4057_v63 = vpack.c.bf16 %v893_v9, %v892_v28 }
 0x14e   : > { %v1014_v41 = vpop.f32.mrf.mxu2 }
 0x14f   : > { %v1076_v47 = vadd.f32 %v1014_v41, %v813_v37  ;;  %v1248_v45 = vpop.f32.mrf.mxu3  ;;  %v4240_v37 = vmax.f32 %v4022_v23, 0.0 }
 0x150   : > { %v814_v55 = vpop.f32.mrf.mxu1 }
 0x151   : > { %v1310_v53 = vadd.f32 %v1248_v45, %v1076_v47  ;;  %v815_v20 = vadd.f32 %v814_v55, %v3895_v29  ;;  %v1377_v41 = vpack.c.bf16 %v4240_v37, %v4239_v57 }
 0x152   : > { %v1484_v61 = vpop.f32.mrf.mxu0 }
 0x153   : > { %v4054_v60 = vadd.f32 %v1482_v32, %v1310_v53 }
 0x156   : > { %v1016_v14 = vpop.f32.mrf.mxu2 }
 0x157   : > { %v1077_v1 = vadd.f32 %v1016_v14, %v815_v20  ;;  %v1250_v27 = vpop.f32.mrf.mxu3 }
 0x158   : > { %v817_v46 = vpop.f32.mrf.mxu1 }
 0x159   : > { %v1311_v32 = vadd.f32 %v1250_v27, %v1077_v1  ;;  %v818_v45 = vadd.f32 %v817_v46, %v3911_v7 }
 0x15a   : > { %v1487_v47 = vpop.f32.mrf.mxu0 }
 0x15b   : > { %856 = vmatmul.bf16.gmra.mxu1 %v1142_v24  ;;  %1058 = vmatmul.bf16.gmra.mxu2 %v4057_v63  ;;  %v4064_v29 = vadd.f32 %v1484_v61, %v1311_v32  ;;  %v2034_v24 = vld [vmem:[#allocation2 + $0x39] sm:$0xff] }
 0x15c   : > { %1292 = vmatmul.bf16.gmra.mxu3 %v1143_v22  ;;  %v2065_v22 = vpack.c.bf16 %v2034_v24, %v2033_v51 }
 0x15d   : > { %1526 = vmatmul.bf16.gmra.mxu0 %v1377_v41 }
 0x15e   : > { %v1019_v55 = vpop.f32.mrf.mxu2 }
 0x15f   : > { %v1078_v53 = vadd.f32 %v1019_v55, %v818_v45  ;;  %v1253_v28 = vpop.f32.mrf.mxu3 }
 0x160   : > { %v819_v9 = vpop.f32.mrf.mxu1 }
 0x161   : > { %v1312_v20 = vadd.f32 %v1253_v28, %v1078_v53  ;;  %v820_v23 = vadd.f32 %v819_v9, %v3920_v62  ;;  %v1566_v53 = vld [vmem:[#allocation2 + $0x32] sm:$0xff]  ;;  %v1567_v9 = vld [vmem:[#allocation2 + $0x3a] sm:$0xff] }
 0x162   : > { %v1489_v34 = vpop.f32.mrf.mxu0 }
 0x163   : > { %v4067_v13 = vadd.f32 %v1487_v47, %v1312_v20  ;;  %v1802_v20 = vld [vmem:[#allocation2 + $0x50] sm:$0xff] }
 0x166   : > { %v1021_v14 = vpop.f32.mrf.mxu2 }
 0x167   : > { %v1079_v1 = vadd.f32 %v1021_v14, %v820_v23  ;;  %v1255_v61 = vpop.f32.mrf.mxu3  ;;  %v2036_v23 = vld [vmem:[#allocation2 + $0x51] sm:$0xff] }
 0x168   : > { %v822_v27 = vpop.f32.mrf.mxu1 }
 0x169   : > { %v1313_v57 = vadd.f32 %v1255_v61, %v1079_v1  ;;  %v823_v62 = vadd.f32 %v822_v27, %v3839_v11  ;;  %v1597_v11 = vpack.c.bf16 %v1567_v9, %v1566_v53  ;;  %v1569_v9 = vld [vmem:[#allocation2 + $0x52] sm:$0xff] }
 0x16a   : > { %v1492_v37 = vpop.f32.mrf.mxu0 }
 0x16b   : > { %1685 = vmatmul.bf16.vlgmr.msra.gmra.mxu1 %v3798_v25  ;;  %1920 = vmatmul.bf16.vlgmr.msra.gmra.mxu2 %v3800_v30  ;;  %v4072_v7 = vadd.f32 %v1489_v34, %v1313_v57  ;;  %v1801_v25 = vld [vmem:[#allocation2 + $0x48] sm:$0xff] }
 0x16c   : > { %2154 = vmatmul.bf16.vlgmr.msra.gmra.mxu3 %v2065_v22  ;;  %v2035_v34 = vld [vmem:[#allocation2 + $0x49] sm:$0xff]  ;;  %v1832_v14 = vpack.c.bf16 %v1802_v20, %v1801_v25  ;;  %v1803_v25 = vld [vmem:[#allocation2 + $0x60] sm:$0xff] }
 0x16d   : > { %2388 = vmatmul.bf16.vlgmr.msra.gmra.mxu0 %v3805_v54  ;;  %v2066_v61 = vpack.c.bf16 %v2036_v23, %v2035_v34  ;;  %v1804_v20 = vld [vmem:[#allocation2 + $0x68] sm:$0xff] }
 0x16e   : > { %v1024_v46 = vpop.f32.mrf.mxu2  ;;  %v2038_v34 = vld [vmem:[#allocation2 + $0x69] sm:$0xff] }
 0x16f   : > { %v1080_v41 = vadd.f32 %v1024_v46, %v823_v62  ;;  %v1258_v32 = vpop.f32.mrf.mxu3 }
 0x170   : > { %v824_v47 = vpop.f32.mrf.mxu1 }
 0x171   : > { %v1314_v45 = vadd.f32 %v1258_v32, %v1080_v41  ;;  %v825_v30 = vadd.f32 %v824_v47, %v3853_v16 }
 0x172   : > { %v1494_v55 = vpop.f32.mrf.mxu0 }
 0x173   : > { %v4076_v28 = vadd.f32 %v1492_v37, %v1314_v45  ;;  %v1568_v45 = vld [vmem:[#allocation2 + $0x4a] sm:$0xff] }
 0x176   : > { %v1026_v51 = vpop.f32.mrf.mxu2 }
 0x177   : > { %v1081_v54 = vadd.f32 %v1026_v51, %v825_v30  ;;  %v1260_v24 = vpop.f32.mrf.mxu3  ;;  %v2037_v30 = vld [vmem:[#allocation2 + $0x61] sm:$0xff] }
 0x178   : > { %v827_v1 = vpop.f32.mrf.mxu1 }
 0x179   : > { %v1315_v27 = vadd.f32 %v1260_v24, %v1081_v54  ;;  %v828_v16 = vadd.f32 %v827_v1, %v3865_v35  ;;  %v1598_v35 = vpack.c.bf16 %v1569_v9, %v1568_v45  ;;  %v1833_v54 = vpack.c.bf16 %v1804_v20, %v1803_v25  ;;  %v1571_v45 = vld [vmem:[#allocation2 + $0x6a] sm:$0xff]  ;;  %v1805_v9 = vld [vmem:[#allocation2 + $0x78] sm:$0xff]  ;;  %v1806_v25 = vld [vmem:[#allocation2 + $0x80] sm:$0xff] }
 0x17a   : > { %v1497_v22 = vpop.f32.mrf.mxu0  ;;  %v2039_v20 = vld [vmem:[#allocation2 + $0x79] sm:$0xff] }
 0x17b   : > { %1690 = vmatmul.bf16.gmra.mxu1 %v1597_v11  ;;  %1925 = vmatmul.bf16.gmra.mxu2 %v1832_v14  ;;  %v4079_v57 = vadd.f32 %v1494_v55, %v1315_v27  ;;  %v2067_v11 = vpack.c.bf16 %v2038_v34, %v2037_v30 }
 0x17c   : > { %2159 = vmatmul.bf16.gmra.mxu3 %v2066_v61 }
 0x17d   : > { %2393 = vmatmul.bf16.gmra.mxu0 %v3821_v59 }
 0x17e   : > { %v1029_v37 = vpop.f32.mrf.mxu2 }
 0x17f   : > { %v1082_v62 = vadd.f32 %v1029_v37, %v828_v16  ;;  %v1263_v46 = vpop.f32.mrf.mxu3 }
 0x180   : > { %v829_v41 = vpop.f32.mrf.mxu1 }
 0x181   : > { %v1316_v32 = vadd.f32 %v1263_v46, %v1082_v62  ;;  %v830_v55 = vadd.f32 %v829_v41, %v3873_v48  ;;  %v1570_v41 = vld [vmem:[#allocation2 + $0x62] sm:$0xff] }
 0x182   : > { %v1499_v47 = vpop.f32.mrf.mxu0 }
 0x183   : > { %v4083_v53 = vadd.f32 %v1497_v22, %v1316_v32 }
 0x186   : > { %v1031_v23 = vpop.f32.mrf.mxu2 }
 0x187   : > { %v1083_v59 = vadd.f32 %v1031_v23, %v830_v55  ;;  %v1265_v51 = vpop.f32.mrf.mxu3  ;;  %v2040_v55 = vld [vmem:[#allocation2 + $0x81] sm:$0xff]  ;;  %v1834_v23 = vpack.c.bf16 %v1806_v25, %v1805_v9  ;;  %v2041_v9 = vld [vmem:[#allocation2 + $0x91] sm:$0xff]  ;;  %v2042_v25 = vld [vmem:[#allocation2 + $0x99] sm:$0xff] }
 0x188   : > { %v832_v24 = vpop.f32.mrf.mxu1 }
 0x189   : > { %v1317_v14 = vadd.f32 %v1265_v51, %v1083_v59  ;;  %v833_v48 = vadd.f32 %v832_v24, %v3891_v31  ;;  %v1599_v31 = vpack.c.bf16 %v1571_v45, %v1570_v41  ;;  %v2068_v51 = vpack.c.bf16 %v2040_v55, %v2039_v20  ;;  %v1807_v41 = vld [vmem:[#allocation2 + $0x90] sm:$0xff]  ;;  %v1808_v45 = vld [vmem:[#allocation2 + $0x98] sm:$0xff] }
 0x18a   : > { %v1502_v1 = vpop.f32.mrf.mxu0  ;;  %v1835_v55 = vpack.c.bf16 %v1808_v45, %v1807_v41  ;;  %v2044_v41 = vld [vmem:[#allocation2 + $0xb1] sm:$0xff] }
 0x18b   : > { %1695 = vmatmul.bf16.gmra.mxu1 %v1598_v35  ;;  %1930 = vmatmul.bf16.gmra.mxu2 %v1833_v54  ;;  %v4086_v61 = vadd.f32 %v1499_v47, %v1317_v14 }
 0x18c   : > { %2164 = vmatmul.bf16.gmra.mxu3 %v2067_v11 }
 0x18d   : > { %2398 = vmatmul.bf16.gmra.mxu0 %v3825_v10 }
 0x18e   : > { %v1034_v27 = vpop.f32.mrf.mxu2 }
 0x18f   : > { %v1084_v22 = vadd.f32 %v1034_v27, %v833_v48  ;;  %v1268_v16 = vpop.f32.mrf.mxu3 }
 0x190   : > { %v834_v37 = vpop.f32.mrf.mxu1 }
 0x191   : > { %v1318_v62 = vadd.f32 %v1268_v16, %v1084_v22  ;;  %v835_v47 = vadd.f32 %v834_v37, %v3905_v5  ;;  %v1572_v16 = vld [vmem:[#allocation2 + $0x7a] sm:$0xff] }
 0x192   : > { %v1504_v46 = vpop.f32.mrf.mxu0 }
 0x193   : > { %v4090_v32 = vadd.f32 %v1502_v1, %v1318_v62  ;;  %v1573_v62 = vld [vmem:[#allocation2 + $0x82] sm:$0xff] }
 0x196   : > { %v1036_v30 = vpop.f32.mrf.mxu2 }
 0x197   : > { %v1085_v10 = vadd.f32 %v1036_v30, %v835_v47  ;;  %v1270_v34 = vpop.f32.mrf.mxu3 }
 0x198   : > { %v837_v59 = vpop.f32.mrf.mxu1 }
 0x199   : > { %v1319_v35 = vadd.f32 %v1270_v34, %v1085_v10  ;;  %v838_v5 = vadd.f32 %v837_v59, %v3916_v3  ;;  %v1600_v3 = vpack.c.bf16 %v1573_v62, %v1572_v16  ;;  %v2069_v10 = vpack.c.bf16 %v2042_v25, %v2041_v9  ;;  %v1810_v16 = vld [vmem:[#allocation2 + $0xb0] sm:$0xff] }
 0x19a   : > { %v1507_v54 = vpop.f32.mrf.mxu0  ;;  %v2043_v62 = vld [vmem:[#allocation2 + $0xa9] sm:$0xff] }
 0x19b   : > { %1700 = vmatmul.bf16.gmra.mxu1 %v1599_v31  ;;  %1935 = vmatmul.bf16.gmra.mxu2 %v1834_v23  ;;  %v4093_v24 = vadd.f32 %v1504_v46, %v1319_v35 }
 0x19c   : > { %2169 = vmatmul.bf16.gmra.mxu3 %v2068_v51 }
 0x19d   : > { %2403 = vmatmul.bf16.gmra.mxu0 %v3857_v38 }
 0x19e   : > { %v1039_v11 = vpop.f32.mrf.mxu2 }
 0x19f   : > { %v1086_v14 = vadd.f32 %v1039_v11, %v838_v5  ;;  %v1273_v1 = vpop.f32.mrf.mxu3 }
 0x1a0   : > { %v839_v48 = vpop.f32.mrf.mxu1 }
 0x1a1   : > { %v1320_v27 = vadd.f32 %v1273_v1, %v1086_v14  ;;  %v840_v46 = vadd.f32 %v839_v48, %v3924_v8  ;;  %v1574_v14 = vld [vmem:[#allocation2 + $0x92] sm:$0xff]  ;;  %v1575_v48 = vld [vmem:[#allocation2 + $0x9a] sm:$0xff] }
 0x1a2   : > { %v1509_v22 = vpop.f32.mrf.mxu0 }
 0x1a3   : > { %v4097_v37 = vadd.f32 %v1507_v54, %v1320_v27  ;;  %v1809_v27 = vld [vmem:[#allocation2 + $0xa8] sm:$0xff] }
 0x1a4   : > { %v1836_v9 = vpack.c.bf16 %v1810_v16, %v1809_v27 }
 0x1a6   : > { %v1041_v47 = vpop.f32.mrf.mxu2 }
 0x1a7   : > { %v1087_v38 = vadd.f32 %v1041_v47, %v840_v46  ;;  %v1275_v20 = vpop.f32.mrf.mxu3  ;;  %v2070_v47 = vpack.c.bf16 %v2044_v41, %v2043_v62 }
 0x1a8   : > { %v842_v30 = vpop.f32.mrf.mxu1 }
 0x1a9   : > { %v1321_v34 = vadd.f32 %v1275_v20, %v1087_v38  ;;  %v843_v8 = vadd.f32 %v842_v30, %v3841_v12  ;;  %v1601_v12 = vpack.c.bf16 %v1575_v48, %v1574_v14  ;;  %v2045_v14 = vld [vmem:[#allocation2 + $0xc1] sm:$0xff]  ;;  %v2046_v48 = vld [vmem:[#allocation2 + $0xc9] sm:$0xff] }
 0x1aa   : > { %v1512_v31 = vpop.f32.mrf.mxu0  ;;  %v2071_v41 = vpack.c.bf16 %v2046_v48, %v2045_v14 }
 0x1ab   : > { %1705 = vmatmul.bf16.gmra.mxu1 %v1600_v3  ;;  %1940 = vmatmul.bf16.gmra.mxu2 %v1835_v55  ;;  %v4100_v23 = vadd.f32 %v1509_v22, %v1321_v34 }
 0x1ac   : > { %2174 = vmatmul.bf16.gmra.mxu3 %v2069_v10 }
 0x1ad   : > { %2408 = vmatmul.bf16.gmra.mxu0 %v3877_v50 }
 0x1ae   : > { %v1044_v59 = vpop.f32.mrf.mxu2 }
 0x1af   : > { %v1088_v51 = vadd.f32 %v1044_v59, %v843_v8  ;;  %v1278_v35 = vpop.f32.mrf.mxu3  ;;  %v1576_v59 = vld [vmem:[#allocation2 + $0xaa] sm:$0xff] }
 0x1b0   : > { %v844_v54 = vpop.f32.mrf.mxu1 }
 0x1b1   : > { %v1322_v5 = vadd.f32 %v1278_v35, %v1088_v51  ;;  %v845_v22 = vadd.f32 %v844_v54, %v3855_v17  ;;  %v1577_v35 = vld [vmem:[#allocation2 + $0xb2] sm:$0xff]  ;;  %v1811_v54 = vld [vmem:[#allocation2 + $0xc0] sm:$0xff] }
 0x1b2   : > { %v1514_v11 = vpop.f32.mrf.mxu0 }
 0x1b3   : > { %v4104_v1 = vadd.f32 %v1512_v31, %v1322_v5  ;;  %v1812_v5 = vld [vmem:[#allocation2 + $0xc8] sm:$0xff] }
 0x1b6   : > { %v1046_v45 = vpop.f32.mrf.mxu2 }
 0x1b7   : > { %v1089_v50 = vadd.f32 %v1046_v45, %v845_v22  ;;  %v1280_v46 = vpop.f32.mrf.mxu3  ;;  %v1837_v22 = vpack.c.bf16 %v1812_v5, %v1811_v54 }
 0x1b8   : > { %v847_v25 = vpop.f32.mrf.mxu1 }
 0x1b9   : > { %v1323_v38 = vadd.f32 %v1280_v46, %v1089_v50  ;;  %v848_v17 = vadd.f32 %v847_v25, %v3867_v36  ;;  %v1602_v36 = vpack.c.bf16 %v1577_v35, %v1576_v59  ;;  %v2048_v59 = vld [vmem:[#allocation2 + $0xe1] sm:$0xff] }
 0x1ba   : > { %v1517_v20 = vpop.f32.mrf.mxu0 }
 0x1bb   : > { %1710 = vmatmul.bf16.gmra.mxu1 %v1601_v12  ;;  %1945 = vmatmul.bf16.gmra.mxu2 %v1836_v9  ;;  %v4107_v3 = vadd.f32 %v1514_v11, %v1323_v38 }
 0x1bc   : > { %2179 = vmatmul.bf16.gmra.mxu3 %v2070_v47 }
 0x1bd   : > { %2413 = vmatmul.bf16.gmra.mxu0 %v3909_v6 }
 0x1be   : > { %v1049_v55 = vpop.f32.mrf.mxu2 }
 0x1bf   : > { %v1090_v30 = vadd.f32 %v1049_v55, %v848_v17  ;;  %v1283_v10 = vpop.f32.mrf.mxu3  ;;  %v1578_v17 = vld [vmem:[#allocation2 + $0xc2] sm:$0xff] }
 0x1c0   : > { %v849_v34 = vpop.f32.mrf.mxu1 }
 0x1c1   : > { %v1324_v31 = vadd.f32 %v1283_v10, %v1090_v30  ;;  %v850_v11 = vadd.f32 %v849_v34, %v3875_v49  ;;  %v1579_v30 = vld [vmem:[#allocation2 + $0xca] sm:$0xff]  ;;  %v1813_v10 = vld [vmem:[#allocation2 + $0xd8] sm:$0xff]  ;;  %v1814_v34 = vld [vmem:[#allocation2 + $0xe0] sm:$0xff] }
 0x1c2   : > { %v1519_v8 = vpop.f32.mrf.mxu0  ;;  %v1838_v5 = vpack.c.bf16 %v1814_v34, %v1813_v10 }
 0x1c3   : > { %v4111_v51 = vadd.f32 %v1517_v20, %v1324_v31 }
 0x1c6   : > { %v1051_v27 = vpop.f32.mrf.mxu2 }
 0x1c7   : > { %v1091_v6 = vadd.f32 %v1051_v27, %v850_v11  ;;  %v1285_v16 = vpop.f32.mrf.mxu3 }
 0x1c8   : > { %v852_v62 = vpop.f32.mrf.mxu1 }
 0x1c9   : > { %v1325_v45 = vadd.f32 %v1285_v16, %v1091_v6  ;;  %v853_v49 = vadd.f32 %v852_v62, %v3893_v33  ;;  %v1603_v33 = vpack.c.bf16 %v1579_v30, %v1578_v17 }
 0x1ca   : > { %v1522_v50 = vpop.f32.mrf.mxu0 }
 0x1cb   : > { %1715 = vmatmul.bf16.gmra.mxu1 %v1602_v36  ;;  %1950 = vmatmul.bf16.gmra.mxu2 %v1837_v22  ;;  %v4114_v46 = vadd.f32 %v1519_v8, %v1325_v45  ;;  %v2047_v8 = vld [vmem:[#allocation2 + $0xd9] sm:$0xff] }
 0x1cc   : > { %2184 = vmatmul.bf16.gmra.mxu3 %v2071_v41  ;;  %v2072_v14 = vpack.c.bf16 %v2048_v59, %v2047_v8 }
 0x1cd   : > { %2418 = vmatmul.bf16.gmra.mxu0 %v3928_v43 }
 0x1ce   : > { %v1054_v12 = vpop.f32.mrf.mxu2 }
 0x1cf   : > { %v1092_v9 = vadd.f32 %v1054_v12, %v853_v49  ;;  %v1288_v25 = vpop.f32.mrf.mxu3  ;;  %v2049_v12 = vld [vmem:[#allocation2 + $0xf1] sm:$0xff] }
 0x1d0   : > { %v854_v47 = vpop.f32.mrf.mxu1 }
 0x1d1   : > { %v1326_v38 = vadd.f32 %v1288_v25, %v1092_v9  ;;  %v855_v31 = vadd.f32 %v854_v47, %v3907_v19  ;;  %v2050_v9 = vld [vmem:[#allocation2 + $0xf9] sm:$0xff] }
 0x1d2   : > { %v1524_v20 = vpop.f32.mrf.mxu0  ;;  %v2073_v17 = vpack.c.bf16 %v2050_v9, %v2049_v12 }
 0x1d3   : > { %v4118_v55 = vadd.f32 %v1522_v50, %v1326_v38 }
 0x1d6   : > { %v1056_v35 = vpop.f32.mrf.mxu2 }
 0x1d7   : > { %v1093_v43 = vadd.f32 %v1056_v35, %v855_v31  ;;  %v1290_v54 = vpop.f32.mrf.mxu3 }
 0x1d8   : > { %v857_v11 = vpop.f32.mrf.mxu1 }
 0x1d9   : > { %v1327_v48 = vadd.f32 %v1290_v54, %v1093_v43  ;;  %v858_v19 = vadd.f32 %v857_v11, %v3918_v40  ;;  %v1583_v54 = vld [vmem:[#allocation2 + $0xfa] sm:$0xff]  ;;  %v2052_v11 = vld [vmem:[#allocation2 + $0x111] sm:$0xff] }
 0x1da   : > { %v1527_v27 = vpop.f32.mrf.mxu0 }
 0x1db   : > { %1720 = vmatmul.bf16.gmra.mxu1 %v1603_v33  ;;  %1955 = vmatmul.bf16.gmra.mxu2 %v1838_v5  ;;  %v4121_v6 = vadd.f32 %v1524_v20, %v1327_v48  ;;  %v1817_v33 = vld [vmem:[#allocation2 + $0x108] sm:$0xff] }
 0x1dc   : > { %2189 = vmatmul.bf16.gmra.mxu3 %v2072_v14  ;;  %v2051_v5 = vld [vmem:[#allocation2 + $0x109] sm:$0xff] }
 0x1dd   : > { %2423 = vmatmul.bf16.gmra.mxu0 %v3948_v44 }
 0x1de   : > { %v1059_v16 = vpop.f32.mrf.mxu2 }
 0x1df   : > { %v1094_v36 = vadd.f32 %v1059_v16, %v858_v19  ;;  %v1293_v22 = vpop.f32.mrf.mxu3 }
 0x1e0   : > { %v859_v62 = vpop.f32.mrf.mxu1 }
 0x1e1   : > { %v1328_v41 = vadd.f32 %v1293_v22, %v1094_v36  ;;  %v860_v49 = vadd.f32 %v859_v62, %v3926_v15  ;;  %v2074_v22 = vpack.c.bf16 %v2052_v11, %v2051_v5  ;;  %v4243_v5 = vld [vmem:[#allocation8_spill] sm:$0xff] }
 0x1e2   : > { %v1529_v45 = vpop.f32.mrf.mxu0 }
 0x1e3   : > { %v4125_v50 = vadd.f32 %v1527_v27, %v1328_v41 }
 0x1e6   : > { %v1061_v25 = vpop.f32.mrf.mxu2 }
 0x1e7   : > { %v1095_v47 = vadd.f32 %v1061_v25, %v860_v49  ;;  %v1295_v38 = vpop.f32.mrf.mxu3 }
 0x1e8   : > { %v1686_v20 = vpop.f32.mrf.mxu1 }
 0x1e9   : > { %v1329_v30 = vadd.f32 %v1295_v38, %v1095_v47  ;;  %v1766_v15 = vadd.f32 %v1686_v20, %v3946_v58 }
 0x1ea   : > { %v2389_v40 = vpop.f32.mrf.mxu0 }
 0x1eb   : > { %1725 = vmatmul.bf16.gmra.mxu1 %v3948_v44  ;;  %1960 = vmatmul.bf16.gmra.mxu2 %v3950_v52  ;;  %v4130_v10 = vadd.f32 %v1529_v45, %v1329_v30  ;;  %v1582_v52 = vld [vmem:[#allocation2 + $0xf2] sm:$0xff] }
 0x1ec   : > { %2194 = vmatmul.bf16.gmra.mxu3 %v2073_v17  ;;  %v1605_v19 = vpack.c.bf16 %v1583_v54, %v1582_v52 }
 0x1ed   : > { %2428 = vmatmul.bf16.gmra.mxu0 %v3961_v39  ;;  %v1818_v39 = vld [vmem:[#allocation2 + $0x110] sm:$0xff] }
 0x1ee   : > { %v1921_v34 = vpop.f32.mrf.mxu2  ;;  %v1840_v16 = vpack.c.bf16 %v1818_v39, %v1817_v33  ;;  %v4241_v39 = vld [vmem:[#allocation4_spill] sm:$0xff] }
 0x1ef   : > { %v2001_v31 = vadd.f32 %v1921_v34, %v1766_v15  ;;  %v2155_v8 = vpop.f32.mrf.mxu3 }
 0x1f0   : > { %v1688_v59 = vpop.f32.mrf.mxu1 }
 0x1f1   : > { %v2235_v35 = vadd.f32 %v2155_v8, %v2001_v31  ;;  %v1767_v58 = vadd.f32 %v1688_v59, %v3954_v26 }
 0x1f2   : > { %v2391_v43 = vpop.f32.mrf.mxu0 }
 0x1f3   : > { %v2469_v44 = vadd.f32 %v2389_v40, %v2235_v35 }
 0x1f5   : > { %2501 = vst [vmem:[%s4139_s30] sm:$0xff] %v2469_v44  ;;  %v2570_v26 = vmul.f32 %v2469_v44, %v2469_v44 }
 0x1f6   : > { %v1923_v14 = vpop.f32.mrf.mxu2 }
 0x1f7   : > { %v2002_v48 = vadd.f32 %v1923_v14, %v1767_v58  ;;  %v2157_v27 = vpop.f32.mrf.mxu3  ;;  %v4242_v58 = vld [vmem:[#allocation5_spill] sm:$0xff]  ;;  %v4244_v14 = vld [vmem:[#allocation3_spill] sm:$0xff] }
 0x1f8   : > { %v1691_v36 = vpop.f32.mrf.mxu1 }
 0x1f9   : > { %v2236_v62 = vadd.f32 %v2157_v27, %v2002_v48  ;;  %v1768_v9 = vadd.f32 %v1691_v36, %v3959_v21 }
 0x1fa   : > { %v2394_v41 = vpop.f32.mrf.mxu0 }
 0x1fb   : > { %v2470_v45 = vadd.f32 %v2391_v43, %v2236_v62  ;;  %1730 = vmatmul.bf16.gmra.mxu1 %v1605_v19  ;;  %1965 = vmatmul.bf16.gmra.mxu2 %v1840_v16 }
 0x1fc   : > { %2199 = vmatmul.bf16.gmra.mxu3 %v2074_v22 }
 0x1fd   : > { %2433 = vmatmul.bf16.gmra.mxu0 %v3984_v56  ;;  %2502 = vst [vmem:[%s4139_s30 + $0x8] sm:$0xff] %v2470_v45  ;;  %v2533_v49 = vadd.f32 %v2470_v45, %v2469_v44  ;;  %v2571_v12 = vmul.f32 %v2470_v45, %v2470_v45  ;;  %v1586_v45 = vld [vmem:[#allocation2 + $0x122] sm:$0xff] }
 0x1fe   : > { %v1926_v25 = vpop.f32.mrf.mxu2 }
 0x1ff   : > { %v2602_v47 = vadd.f32 %v2571_v12, %v2570_v26  ;;  %v2003_v38 = vadd.f32 %v1926_v25, %v1768_v9  ;;  %v2160_v20 = vpop.f32.mrf.mxu3  ;;  %v1587_v26 = vld [vmem:[#allocation2 + $0x12a] sm:$0xff]  ;;  %v1822_v12 = vld [vmem:[#allocation2 + $0x140] sm:$0xff] }
 0x200   : > { %v1693_v17 = vpop.f32.mrf.mxu1 }
 0x201   : > { %v2237_v30 = vadd.f32 %v2160_v20, %v2003_v38  ;;  %v1769_v8 = vadd.f32 %v1693_v17, %v3966_v42  ;;  %v2055_v20 = vld [vmem:[#allocation2 + $0x139] sm:$0xff]  ;;  %v2056_v17 = vld [vmem:[#allocation2 + $0x141] sm:$0xff] }
 0x202   : > { %v2396_v40 = vpop.f32.mrf.mxu0 }
 0x203   : > { %v2471_v15 = vadd.f32 %v2394_v41, %v2237_v30 }
 0x205   : > { %2503 = vst [vmem:[%s4139_s30 + $0x10] sm:$0xff] %v2471_v15  ;;  %v2534_v34 = vadd.f32 %v2533_v49, %v2471_v15  ;;  %v2572_v31 = vmul.f32 %v2471_v15, %v2471_v15  ;;  %v1821_v49 = vld [vmem:[#allocation2 + $0x138] sm:$0xff] }
 0x206   : > { %v1928_v59 = vpop.f32.mrf.mxu2 }
 0x207   : > { %v2603_v35 = vadd.f32 %v2602_v47, %v2572_v31  ;;  %v2004_v43 = vadd.f32 %v1928_v59, %v1769_v8  ;;  %v2162_v44 = vpop.f32.mrf.mxu3  ;;  %v4245_v47 = vld [vmem:[#allocation6_spill] sm:$0xff]  ;;  %v1607_v31 = vpack.c.bf16 %v1587_v26, %v1586_v45  ;;  %v1842_v8 = vpack.c.bf16 %v1822_v12, %v1821_v49  ;;  %v2057_v26 = vld [vmem:[#allocation2 + $0x151] sm:$0xff]  ;;  %v2058_v49 = vld [vmem:[#allocation2 + $0x159] sm:$0xff] }
 0x208   : > { %v1696_v52 = vpop.f32.mrf.mxu1 }
 0x209   : > { %v2238_v21 = vadd.f32 %v2162_v44, %v2004_v43  ;;  %v1770_v48 = vadd.f32 %v1696_v52, %v4244_v14 }
 0x20a   : > { %v2399_v54 = vpop.f32.mrf.mxu0 }
 0x20b   : > { %v2472_v33 = vadd.f32 %v2396_v40, %v2238_v21  ;;  %1735 = vmatmul.bf16.gmra.mxu1 %v3984_v56  ;;  %1970 = vmatmul.bf16.gmra.mxu2 %v4241_v39 }
 0x20c   : > { %2204 = vmatmul.bf16.gmra.mxu3 %v4242_v58 }
 0x20d   : > { %2438 = vmatmul.bf16.gmra.mxu0 %v4243_v5  ;;  %2504 = vst [vmem:[%s4139_s30 + $0x18] sm:$0xff] %v2472_v33  ;;  %v2535_v11 = vadd.f32 %v2534_v34, %v2472_v33  ;;  %v2573_v42 = vmul.f32 %v2472_v33, %v2472_v33  ;;  %v4246_v33 = vld [vmem:[#allocation7_spill] sm:$0xff] }
 0x20e   : > { %v1931_v27 = vpop.f32.mrf.mxu2 }
 0x20f   : > { %v2604_v19 = vadd.f32 %v2603_v35, %v2573_v42  ;;  %v2005_v16 = vadd.f32 %v1931_v27, %v1770_v48  ;;  %v2165_v36 = vpop.f32.mrf.mxu3  ;;  %v2076_v35 = vpack.c.bf16 %v2056_v17, %v2055_v20 }
 0x210   : > { %v1698_v22 = vpop.f32.mrf.mxu1 }
 0x211   : > { %v2239_v62 = vadd.f32 %v2165_v36, %v2005_v16  ;;  %v1771_v38 = vadd.f32 %v1698_v22, %v4245_v47  ;;  %v1588_v16 = vld [vmem:[#allocation2 + $0x13a] sm:$0xff]  ;;  %v1589_v36 = vld [vmem:[#allocation2 + $0x142] sm:$0xff]  ;;  %v1823_v22 = vld [vmem:[#allocation2 + $0x150] sm:$0xff] }
 0x212   : > { %v2401_v41 = vpop.f32.mrf.mxu0 }
 0x213   : > { %v2473_v56 = vadd.f32 %v2399_v54, %v2239_v62  ;;  %v1824_v62 = vld [vmem:[#allocation2 + $0x158] sm:$0xff] }
 0x214   : > { %v1843_v20 = vpack.c.bf16 %v1824_v62, %v1823_v22 }
 0x215   : > { %2505 = vst [vmem:[%s4139_s30 + $0x20] sm:$0xff] %v2473_v56  ;;  %v2536_v9 = vadd.f32 %v2535_v11, %v2473_v56  ;;  %v2574_v25 = vmul.f32 %v2473_v56, %v2473_v56  ;;  %v4247_v56 = vld [vmem:[#allocation9_spill] sm:$0xff] }
 0x216   : > { %v1933_v30 = vpop.f32.mrf.mxu2 }
 0x217   : > { %v2605_v40 = vadd.f32 %v2604_v19, %v2574_v25  ;;  %v2006_v15 = vadd.f32 %v1933_v30, %v1771_v38  ;;  %v2167_v34 = vpop.f32.mrf.mxu3  ;;  %v1608_v38 = vpack.c.bf16 %v1589_v36, %v1588_v16  ;;  %v2077_v30 = vpack.c.bf16 %v2058_v49, %v2057_v26  ;;  %v2060_v16 = vld [vmem:[#allocation2 + $0x171] sm:$0xff] }
 0x218   : > { %v1701_v59 = vpop.f32.mrf.mxu1 }
 0x219   : > { %v2240_v43 = vadd.f32 %v2167_v34, %v2006_v15  ;;  %v1772_v39 = vadd.f32 %v1701_v59, %v4246_v33  ;;  %v4248_v59 = vld [vmem:[#allocation10_spill] sm:$0xff] }
 0x21a   : > { %v2404_v44 = vpop.f32.mrf.mxu0 }
 0x21b   : > { %v2474_v52 = vadd.f32 %v2401_v41, %v2240_v43  ;;  %1740 = vmatmul.bf16.gmra.mxu1 %v1607_v31  ;;  %1975 = vmatmul.bf16.gmra.mxu2 %v1842_v8 }
 0x21c   : > { %2209 = vmatmul.bf16.gmra.mxu3 %v2076_v35 }
 0x21d   : > { %2443 = vmatmul.bf16.gmra.mxu0 %v4039_v2  ;;  %2506 = vst [vmem:[%s4139_s30 + $0x28] sm:$0xff] %v2474_v52  ;;  %v2537_v21 = vadd.f32 %v2536_v9, %v2474_v52  ;;  %v2575_v54 = vmul.f32 %v2474_v52, %v2474_v52 }
 0x21e   : > { %v1936_v58 = vpop.f32.mrf.mxu2 }
 0x21f   : > { %v2606_v5 = vadd.f32 %v2605_v40, %v2575_v54  ;;  %v2007_v11 = vadd.f32 %v1936_v58, %v1772_v39  ;;  %v2170_v42 = vpop.f32.mrf.mxu3 }
 0x220   : > { %v1703_v14 = vpop.f32.mrf.mxu1 }
 0x221   : > { %v2241_v48 = vadd.f32 %v2170_v42, %v2007_v11  ;;  %v1773_v45 = vadd.f32 %v1703_v14, %v4247_v56  ;;  %v1591_v11 = vld [vmem:[#allocation2 + $0x15a] sm:$0xff]  ;;  %v1825_v42 = vld [vmem:[#allocation2 + $0x168] sm:$0xff]  ;;  %v1826_v14 = vld [vmem:[#allocation2 + $0x170] sm:$0xff] }
 0x222   : > { %v2406_v27 = vpop.f32.mrf.mxu0  ;;  %v1844_v56 = vpack.c.bf16 %v1826_v14, %v1825_v42 }
 0x223   : > { %v2475_v19 = vadd.f32 %v2404_v44, %v2241_v48 }
 0x225   : > { %2507 = vst [vmem:[%s4139_s30 + $0x30] sm:$0xff] %v2475_v19  ;;  %v2538_v2 = vadd.f32 %v2537_v21, %v2475_v19  ;;  %v2576_v41 = vmul.f32 %v2475_v19, %v2475_v19  ;;  %v2059_v19 = vld [vmem:[#allocation2 + $0x169] sm:$0xff] }
 0x226   : > { %v1938_v12 = vpop.f32.mrf.mxu2  ;;  %v2078_v26 = vpack.c.bf16 %v2060_v16, %v2059_v19 }
 0x227   : > { %v2607_v9 = vadd.f32 %v2606_v5, %v2576_v41  ;;  %v2008_v25 = vadd.f32 %v1938_v12, %v1773_v45  ;;  %v2172_v47 = vpop.f32.mrf.mxu3  ;;  %v1590_v5 = vld [vmem:[#allocation2 + $0x152] sm:$0xff] }
 0x228   : > { %v1706_v17 = vpop.f32.mrf.mxu1  ;;  %v1609_v41 = vpack.c.bf16 %v1591_v11, %v1590_v5 }
 0x229   : > { %v2242_v40 = vadd.f32 %v2172_v47, %v2008_v25  ;;  %v1774_v35 = vadd.f32 %v1706_v17, %v4248_v59  ;;  %v4249_v47 = vld [vmem:[#allocation11_spill] sm:$0xff] }
 0x22a   : > { %v2409_v15 = vpop.f32.mrf.mxu0  ;;  %v1592_v59 = vld [vmem:[#allocation2 + $0x16a] sm:$0xff] }
 0x22b   : > { %v2476_v34 = vadd.f32 %v2406_v27, %v2242_v40  ;;  %1745 = vmatmul.bf16.gmra.mxu1 %v1608_v38  ;;  %1980 = vmatmul.bf16.gmra.mxu2 %v1843_v20 }
 0x22c   : > { %2214 = vmatmul.bf16.gmra.mxu3 %v2077_v30 }
 0x22d   : > { %2448 = vmatmul.bf16.gmra.mxu0 %v4048_v4  ;;  %2508 = vst [vmem:[%s4139_s30 + $0x38] sm:$0xff] %v2476_v34  ;;  %v2539_v31 = vadd.f32 %v2538_v2, %v2476_v34  ;;  %v2577_v8 = vmul.f32 %v2476_v34, %v2476_v34 }
 0x22e   : > { %v1941_v43 = vpop.f32.mrf.mxu2 }
 0x22f   : > { %v2608_v44 = vadd.f32 %v2607_v9, %v2577_v8  ;;  %v2009_v52 = vadd.f32 %v1941_v43, %v1774_v35  ;;  %v2175_v21 = vpop.f32.mrf.mxu3  ;;  %v1593_v35 = vld [vmem:[#allocation2 + $0x172] sm:$0xff]  ;;  %v1827_v43 = vld [vmem:[#allocation2 + $0x180] sm:$0xff] }
 0x230   : > { %v1708_v54 = vpop.f32.mrf.mxu1 }
 0x231   : > { %v2243_v33 = vadd.f32 %v2175_v21, %v2009_v52  ;;  %v1775_v27 = vadd.f32 %v1708_v54, %v4042_v18  ;;  %v2061_v52 = vld [vmem:[#allocation2 + $0x181] sm:$0xff] }
 0x232   : > { %v2411_v39 = vpop.f32.mrf.mxu0 }
 0x233   : > { %v2477_v58 = vadd.f32 %v2409_v15, %v2243_v33  ;;  %v2062_v33 = vld [vmem:[#allocation2 + $0x189] sm:$0xff] }
 0x234   : > { %v2079_v19 = vpack.c.bf16 %v2062_v33, %v2061_v52 }
 0x235   : > { %2509 = vst [vmem:[%s4139_s30 + $0x40] sm:$0xff] %v2477_v58  ;;  %v2540_v4 = vadd.f32 %v2539_v31, %v2477_v58  ;;  %v2578_v48 = vmul.f32 %v2477_v58, %v2477_v58  ;;  %v2296_v58 = vld [vmem:[#allocation2 + $0x18a] sm:$0xff] }
 0x236   : > { %v1943_v36 = vpop.f32.mrf.mxu2 }
 0x237   : > { %v2609_v22 = vadd.f32 %v2608_v44, %v2578_v48  ;;  %v2010_v62 = vadd.f32 %v1943_v36, %v1775_v27  ;;  %v2177_v2 = vpop.f32.mrf.mxu3  ;;  %v1828_v44 = vld [vmem:[#allocation2 + $0x188] sm:$0xff] }
 0x238   : > { %v1711_v45 = vpop.f32.mrf.mxu1  ;;  %v1845_v48 = vpack.c.bf16 %v1828_v44, %v1827_v43 }
 0x239   : > { %v2244_v49 = vadd.f32 %v2177_v2, %v2010_v62  ;;  %v1776_v38 = vadd.f32 %v1711_v45, %v4249_v47  ;;  %v2063_v47 = vld [vmem:[#allocation2 + $0x199] sm:$0xff] }
 0x23a   : > { %v2414_v12 = vpop.f32.mrf.mxu0 }
 0x23b   : > { %v2478_v9 = vadd.f32 %v2411_v39, %v2244_v49  ;;  %1750 = vmatmul.bf16.gmra.mxu1 %v1609_v41  ;;  %1985 = vmatmul.bf16.gmra.mxu2 %v1844_v56  ;;  %v2295_v39 = vld [vmem:[#allocation2 + $0x182] sm:$0xff] }
 0x23c   : > { %2219 = vmatmul.bf16.gmra.mxu3 %v2078_v26  ;;  %v2313_v16 = vpack.c.bf16 %v2296_v58, %v2295_v39 }
 0x23d   : > { %2453 = vmatmul.bf16.gmra.mxu0 %v4057_v63  ;;  %2510 = vst [vmem:[%s4139_s30 + $0x48] sm:$0xff] %v2478_v9  ;;  %v2541_v18 = vadd.f32 %v2540_v4, %v2478_v9  ;;  %v2579_v25 = vmul.f32 %v2478_v9, %v2478_v9  ;;  %v1610_v4 = vpack.c.bf16 %v1593_v35, %v1592_v59  ;;  %v3267_v59 = vld [vmem:[#allocation2] sm:$0xff] }
 0x23e   : > { %v1946_v20 = vpop.f32.mrf.mxu2  ;;  %v1846_v35 = vpack.c.bf16 %v3267_v59, %v3267_v59 }
 0x23f   : > { %v2610_v17 = vadd.f32 %v2609_v22, %v2579_v25  ;;  %v2011_v30 = vadd.f32 %v1946_v20, %v1776_v38  ;;  %v2180_v40 = vpop.f32.mrf.mxu3 }
 0x240   : > { %v1713_v15 = vpop.f32.mrf.mxu1 }
 0x241   : > { %v2245_v34 = vadd.f32 %v2180_v40, %v2011_v30  ;;  %v1777_v54 = vadd.f32 %v1713_v15, %v4051_v0  ;;  %v2064_v30 = vld [vmem:[#allocation2 + $0x1a1] sm:$0xff] }
 0x242   : > { %v2416_v31 = vpop.f32.mrf.mxu0  ;;  %v2297_v40 = vld [vmem:[#allocation2 + $0x19a] sm:$0xff]  ;;  %v2298_v15 = vld [vmem:[#allocation2 + $0x1a2] sm:$0xff]  ;;  %v2080_v44 = vpack.c.bf16 %v2064_v30, %v2063_v47 }
 0x243   : > { %v2479_v8 = vadd.f32 %v2414_v12, %v2245_v34  ;;  %v2314_v52 = vpack.c.bf16 %v2298_v15, %v2297_v40 }
 0x245   : > { %2511 = vst [vmem:[%s4139_s30 + $0x50] sm:$0xff] %v2479_v8  ;;  %v2542_v63 = vadd.f32 %v2541_v18, %v2479_v8  ;;  %v2580_v21 = vmul.f32 %v2479_v8, %v2479_v8 }
 0x246   : > { %v1948_v5 = vpop.f32.mrf.mxu2 }
 0x247   : > { %v2611_v11 = vadd.f32 %v2610_v17, %v2580_v21  ;;  %v2012_v42 = vadd.f32 %v1948_v5, %v1777_v54  ;;  %v2182_v14 = vpop.f32.mrf.mxu3 }
 0x248   : > { %v1716_v27 = vpop.f32.mrf.mxu1 }
 0x249   : > { %v2246_v36 = vadd.f32 %v2182_v14, %v2012_v42  ;;  %v1778_v41 = vadd.f32 %v1716_v27, %v4054_v60 }
 0x24a   : > { %v2419_v22 = vpop.f32.mrf.mxu0 }
 0x24b   : > { %v2480_v62 = vadd.f32 %v2416_v31, %v2246_v36  ;;  %1755 = vmatmul.bf16.gmra.mxu1 %v1610_v4  ;;  %1990 = vmatmul.bf16.gmra.mxu2 %v1845_v48 }
 0x24c   : > { %2224 = vmatmul.bf16.gmra.mxu3 %v2079_v19 }
 0x24d   : > { %2458 = vmatmul.bf16.gmra.mxu0 %v2313_v16  ;;  %2512 = vst [vmem:[%s4139_s30 + $0x58] sm:$0xff] %v2480_v62  ;;  %v2543_v0 = vadd.f32 %v2542_v63, %v2480_v62  ;;  %v2581_v2 = vmul.f32 %v2480_v62, %v2480_v62 }
 0x24e   : > { %v1951_v56 = vpop.f32.mrf.mxu2 }
 0x24f   : > { %v2612_v45 = vadd.f32 %v2611_v11, %v2581_v2  ;;  %v2013_v26 = vadd.f32 %v1951_v56, %v1778_v41  ;;  %v2185_v49 = vpop.f32.mrf.mxu3 }
 0x250   : > { %v1718_v12 = vpop.f32.mrf.mxu1 }
 0x251   : > { %v2247_v9 = vadd.f32 %v2185_v49, %v2013_v26  ;;  %v1779_v17 = vadd.f32 %v1718_v12, %v4064_v29 }
 0x252   : > { %v2421_v18 = vpop.f32.mrf.mxu0 }
 0x253   : > { %v2481_v25 = vadd.f32 %v2419_v22, %v2247_v9 }
 0x255   : > { %2513 = vst [vmem:[%s4139_s30 + $0x60] sm:$0xff] %v2481_v25  ;;  %v2544_v38 = vadd.f32 %v2543_v0, %v2481_v25  ;;  %v2582_v20 = vmul.f32 %v2481_v25, %v2481_v25 }
 0x256   : > { %v1953_v34 = vpop.f32.mrf.mxu2 }
 0x257   : > { %v2613_v60 = vadd.f32 %v2612_v45, %v2582_v20  ;;  %v2014_v31 = vadd.f32 %v1953_v34, %v1779_v17  ;;  %v2187_v8 = vpop.f32.mrf.mxu3 }
 0x258   : > { %v1721_v43 = vpop.f32.mrf.mxu1 }
 0x259   : > { %v2248_v63 = vadd.f32 %v2187_v8, %v2014_v31  ;;  %v1780_v39 = vadd.f32 %v1721_v43, %v4067_v13 }
 0x25a   : > { %v2424_v21 = vpop.f32.mrf.mxu0 }
 0x25b   : > { %v2482_v54 = vadd.f32 %v2421_v18, %v2248_v63  ;;  %1760 = vmatmul.bf16.gmra.mxu1 %v2313_v16  ;;  %1995 = vmatmul.bf16.gmra.mxu2 %v1846_v35 }
 0x25c   : > { %2229 = vmatmul.bf16.gmra.mxu3 %v2080_v44 }
 0x25d   : > { %2463 = vmatmul.bf16.gmra.mxu0 %v2314_v52  ;;  %2514 = vst [vmem:[%s4139_s30 + $0x68] sm:$0xff] %v2482_v54  ;;  %v2545_v29 = vadd.f32 %v2544_v38, %v2482_v54  ;;  %v2583_v33 = vmul.f32 %v2482_v54, %v2482_v54 }
 0x25e   : > { %v1956_v58 = vpop.f32.mrf.mxu2 }
 0x25f   : > { %v2614_v5 = vadd.f32 %v2613_v60, %v2583_v33  ;;  %v2015_v11 = vadd.f32 %v1956_v58, %v1780_v39  ;;  %v2190_v42 = vpop.f32.mrf.mxu3 }
 0x260   : > { %v1723_v14 = vpop.f32.mrf.mxu1 }
 0x261   : > { %v2249_v4 = vadd.f32 %v2190_v42, %v2015_v11  ;;  %v1781_v36 = vadd.f32 %v1723_v14, %v4072_v7 }
 0x262   : > { %v2426_v48 = vpop.f32.mrf.mxu0 }
 0x263   : > { %v2483_v27 = vadd.f32 %v2424_v21, %v2249_v4 }
 0x265   : > { %2515 = vst [vmem:[%s4139_s30 + $0x70] sm:$0xff] %v2483_v27  ;;  %v2546_v19 = vadd.f32 %v2545_v29, %v2483_v27  ;;  %v2584_v16 = vmul.f32 %v2483_v27, %v2483_v27 }
 0x266   : > { %v1958_v22 = vpop.f32.mrf.mxu2 }
 0x267   : > { %v2615_v62 = vadd.f32 %v2614_v5, %v2584_v16  ;;  %v2016_v0 = vadd.f32 %v1958_v22, %v1781_v36  ;;  %v2192_v2 = vpop.f32.mrf.mxu3 }
 0x268   : > { %v1726_v41 = vpop.f32.mrf.mxu1 }
 0x269   : > { %v2250_v13 = vadd.f32 %v2192_v2, %v2016_v0  ;;  %v1782_v12 = vadd.f32 %v1726_v41, %v4076_v28 }
 0x26a   : > { %v2429_v56 = vpop.f32.mrf.mxu0 }
 0x26b   : > { %v2484_v45 = vadd.f32 %v2426_v48, %v2250_v13 }
 0x26d   : > { %2516 = vst [vmem:[%s4139_s30 + $0x78] sm:$0xff] %v2484_v45  ;;  %v2547_v26 = vadd.f32 %v2546_v19, %v2484_v45  ;;  %v2585_v49 = vmul.f32 %v2484_v45, %v2484_v45 }
 0x26e   : > { %v1961_v9 = vpop.f32.mrf.mxu2 }
 0x26f   : > { %v2616_v18 = vadd.f32 %v2615_v62, %v2585_v49  ;;  %v2017_v25 = vadd.f32 %v1961_v9, %v1782_v12  ;;  %v2195_v47 = vpop.f32.mrf.mxu3 }
 0x270   : > { %v1728_v38 = vpop.f32.mrf.mxu1 }
 0x271   : > { %v2251_v7 = vadd.f32 %v2195_v47, %v2017_v25  ;;  %v1783_v15 = vadd.f32 %v1728_v38, %v4079_v57 }
 0x272   : > { %v2431_v20 = vpop.f32.mrf.mxu0 }
 0x273   : > { %v2485_v17 = vadd.f32 %v2429_v56, %v2251_v7 }
 0x275   : > { %2517 = vst [vmem:[%s4139_s30 + $0x80] sm:$0xff] %v2485_v17  ;;  %v2548_v30 = vadd.f32 %v2547_v26, %v2485_v17  ;;  %v2586_v40 = vmul.f32 %v2485_v17, %v2485_v17 }
 0x276   : > { %v1963_v34 = vpop.f32.mrf.mxu2 }
 0x277   : > { %v2617_v60 = vadd.f32 %v2616_v18, %v2586_v40  ;;  %v2018_v31 = vadd.f32 %v1963_v34, %v1783_v15  ;;  %v2197_v8 = vpop.f32.mrf.mxu3 }
 0x278   : > { %v1731_v59 = vpop.f32.mrf.mxu1 }
 0x279   : > { %v2252_v28 = vadd.f32 %v2197_v8, %v2018_v31  ;;  %v1784_v63 = vadd.f32 %v1731_v59, %v4083_v53 }
 0x27a   : > { %v2434_v35 = vpop.f32.mrf.mxu0 }
 0x27b   : > { %v2486_v43 = vadd.f32 %v2431_v20, %v2252_v28 }
 0x27d   : > { %2518 = vst [vmem:[%s4139_s30 + $0x88] sm:$0xff] %v2486_v43  ;;  %v2549_v44 = vadd.f32 %v2548_v30, %v2486_v43  ;;  %v2587_v52 = vmul.f32 %v2486_v43, %v2486_v43 }
 0x27e   : > { %v1966_v21 = vpop.f32.mrf.mxu2 }
 0x27f   : > { %v2618_v54 = vadd.f32 %v2617_v60, %v2587_v52  ;;  %v2019_v29 = vadd.f32 %v1966_v21, %v1784_v63  ;;  %v2200_v33 = vpop.f32.mrf.mxu3 }
 0x280   : > { %v1733_v39 = vpop.f32.mrf.mxu1 }
 0x281   : > { %v2253_v57 = vadd.f32 %v2200_v33, %v2019_v29  ;;  %v1785_v14 = vadd.f32 %v1733_v39, %v4086_v61 }
 0x282   : > { %v2436_v58 = vpop.f32.mrf.mxu0 }
 0x283   : > { %v2487_v5 = vadd.f32 %v2434_v35, %v2253_v57 }
 0x285   : > { %2519 = vst [vmem:[%s4139_s30 + $0x90] sm:$0xff] %v2487_v5  ;;  %v2550_v11 = vadd.f32 %v2549_v44, %v2487_v5  ;;  %v2588_v42 = vmul.f32 %v2487_v5, %v2487_v5 }
 0x286   : > { %v1968_v4 = vpop.f32.mrf.mxu2 }
 0x287   : > { %v2619_v48 = vadd.f32 %v2618_v54, %v2588_v42  ;;  %v2020_v27 = vadd.f32 %v1968_v4, %v1785_v14  ;;  %v2202_v19 = vpop.f32.mrf.mxu3 }
 0x288   : > { %v1736_v16 = vpop.f32.mrf.mxu1 }
 0x289   : > { %v2254_v53 = vadd.f32 %v2202_v19, %v2020_v27  ;;  %v1786_v2 = vadd.f32 %v1736_v16, %v4090_v32 }
 0x28a   : > { %v2439_v36 = vpop.f32.mrf.mxu0 }
 0x28b   : > { %v2488_v22 = vadd.f32 %v2436_v58, %v2254_v53 }
 0x28d   : > { %2520 = vst [vmem:[%s4139_s30 + $0x98] sm:$0xff] %v2488_v22  ;;  %v2551_v62 = vadd.f32 %v2550_v11, %v2488_v22  ;;  %v2589_v0 = vmul.f32 %v2488_v22, %v2488_v22 }
 0x28e   : > { %v1971_v41 = vpop.f32.mrf.mxu2 }
 0x28f   : > { %v2620_v13 = vadd.f32 %v2619_v48, %v2589_v0  ;;  %v2021_v56 = vadd.f32 %v1971_v41, %v1786_v2  ;;  %v2205_v45 = vpop.f32.mrf.mxu3 }
 0x290   : > { %v1738_v26 = vpop.f32.mrf.mxu1 }
 0x291   : > { %v2255_v61 = vadd.f32 %v2205_v45, %v2021_v56  ;;  %v1787_v25 = vadd.f32 %v1738_v26, %v4093_v24 }
 0x292   : > { %v2441_v49 = vpop.f32.mrf.mxu0 }
 0x293   : > { %v2489_v12 = vadd.f32 %v2439_v36, %v2255_v61 }
 0x295   : > { %2521 = vst [vmem:[%s4139_s30 + $0xa0] sm:$0xff] %v2489_v12  ;;  %v2552_v9 = vadd.f32 %v2551_v62, %v2489_v12  ;;  %v2590_v18 = vmul.f32 %v2489_v12, %v2489_v12 }
 0x296   : > { %v1973_v47 = vpop.f32.mrf.mxu2 }
 0x297   : > { %v2621_v38 = vadd.f32 %v2620_v13, %v2590_v18  ;;  %v2022_v7 = vadd.f32 %v1973_v47, %v1787_v25  ;;  %v2207_v20 = vpop.f32.mrf.mxu3 }
 0x298   : > { %v1741_v17 = vpop.f32.mrf.mxu1 }
 0x299   : > { %v2256_v32 = vadd.f32 %v2207_v20, %v2022_v7  ;;  %v1788_v60 = vadd.f32 %v1741_v17, %v4097_v37 }
 0x29a   : > { %v2444_v30 = vpop.f32.mrf.mxu0 }
 0x29b   : > { %v2490_v40 = vadd.f32 %v2441_v49, %v2256_v32 }
 0x29d   : > { %2522 = vst [vmem:[%s4139_s30 + $0xa8] sm:$0xff] %v2490_v40  ;;  %v2553_v15 = vadd.f32 %v2552_v9, %v2490_v40  ;;  %v2591_v34 = vmul.f32 %v2490_v40, %v2490_v40 }
 0x29e   : > { %v1976_v31 = vpop.f32.mrf.mxu2 }
 0x29f   : > { %v2622_v8 = vadd.f32 %v2621_v38, %v2591_v34  ;;  %v2023_v59 = vadd.f32 %v1976_v31, %v1788_v60  ;;  %v2210_v28 = vpop.f32.mrf.mxu3 }
 0x2a0   : > { %v1743_v35 = vpop.f32.mrf.mxu1 }
 0x2a1   : > { %v2257_v24 = vadd.f32 %v2210_v28, %v2023_v59  ;;  %v1789_v21 = vadd.f32 %v1743_v35, %v4100_v23 }
 0x2a2   : > { %v2446_v43 = vpop.f32.mrf.mxu0 }
 0x2a3   : > { %v2491_v44 = vadd.f32 %v2444_v30, %v2257_v24 }
 0x2a5   : > { %2523 = vst [vmem:[%s4139_s30 + $0xb0] sm:$0xff] %v2491_v44  ;;  %v2554_v52 = vadd.f32 %v2553_v15, %v2491_v44  ;;  %v2592_v63 = vmul.f32 %v2491_v44, %v2491_v44 }
 0x2a6   : > { %v1978_v54 = vpop.f32.mrf.mxu2 }
 0x2a7   : > { %v2623_v29 = vadd.f32 %v2622_v8, %v2592_v63  ;;  %v2024_v33 = vadd.f32 %v1978_v54, %v1789_v21  ;;  %v2212_v39 = vpop.f32.mrf.mxu3 }
 0x2a8   : > { %v1746_v57 = vpop.f32.mrf.mxu1 }
 0x2a9   : > { %v2258_v37 = vadd.f32 %v2212_v39, %v2024_v33  ;;  %v1790_v14 = vadd.f32 %v1746_v57, %v4104_v1 }
 0x2aa   : > { %v2449_v58 = vpop.f32.mrf.mxu0 }
 0x2ab   : > { %v2492_v5 = vadd.f32 %v2446_v43, %v2258_v37 }
 0x2ad   : > { %2524 = vst [vmem:[%s4139_s30 + $0xb8] sm:$0xff] %v2492_v5  ;;  %v2555_v11 = vadd.f32 %v2554_v52, %v2492_v5  ;;  %v2593_v42 = vmul.f32 %v2492_v5, %v2492_v5 }
 0x2ae   : > { %v1981_v4 = vpop.f32.mrf.mxu2 }
 0x2af   : > { %v2624_v48 = vadd.f32 %v2623_v29, %v2593_v42  ;;  %v2025_v27 = vadd.f32 %v1981_v4, %v1790_v14  ;;  %v2215_v19 = vpop.f32.mrf.mxu3 }
 0x2b0   : > { %v1748_v16 = vpop.f32.mrf.mxu1 }
 0x2b1   : > { %v2259_v23 = vadd.f32 %v2215_v19, %v2025_v27  ;;  %v1791_v0 = vadd.f32 %v1748_v16, %v4107_v3 }
 0x2b2   : > { %v2451_v53 = vpop.f32.mrf.mxu0 }
 0x2b3   : > { %v2493_v36 = vadd.f32 %v2449_v58, %v2259_v23 }
 0x2b5   : > { %2525 = vst [vmem:[%s4139_s30 + $0xc0] sm:$0xff] %v2493_v36  ;;  %v2556_v22 = vadd.f32 %v2555_v11, %v2493_v36  ;;  %v2594_v62 = vmul.f32 %v2493_v36, %v2493_v36 }
 0x2b6   : > { %v1983_v2 = vpop.f32.mrf.mxu2 }
 0x2b7   : > { %v2625_v41 = vadd.f32 %v2624_v48, %v2594_v62  ;;  %v2026_v13 = vadd.f32 %v1983_v2, %v1791_v0  ;;  %v2217_v56 = vpop.f32.mrf.mxu3 }
 0x2b8   : > { %v1751_v45 = vpop.f32.mrf.mxu1 }
 0x2b9   : > { %v2260_v1 = vadd.f32 %v2217_v56, %v2026_v13  ;;  %v1792_v9 = vadd.f32 %v1751_v45, %v4111_v51 }
 0x2ba   : > { %v2454_v26 = vpop.f32.mrf.mxu0 }
 0x2bb   : > { %v2494_v61 = vadd.f32 %v2451_v53, %v2260_v1 }
 0x2bd   : > { %2526 = vst [vmem:[%s4139_s30 + $0xc8] sm:$0xff] %v2494_v61  ;;  %v2557_v49 = vadd.f32 %v2556_v22, %v2494_v61  ;;  %v2595_v12 = vmul.f32 %v2494_v61, %v2494_v61 }
 0x2be   : > { %v1986_v18 = vpop.f32.mrf.mxu2 }
 0x2bf   : > { %v2626_v25 = vadd.f32 %v2625_v41, %v2595_v12  ;;  %v2027_v47 = vadd.f32 %v1986_v18, %v1792_v9  ;;  %v2220_v38 = vpop.f32.mrf.mxu3 }
 0x2c0   : > { %v1753_v7 = vpop.f32.mrf.mxu1 }
 0x2c1   : > { %v2261_v3 = vadd.f32 %v2220_v38, %v2027_v47  ;;  %v1793_v40 = vadd.f32 %v1753_v7, %v4114_v46 }
 0x2c2   : > { %v2456_v20 = vpop.f32.mrf.mxu0 }
 0x2c3   : > { %v2495_v17 = vadd.f32 %v2454_v26, %v2261_v3 }
 0x2c5   : > { %2527 = vst [vmem:[%s4139_s30 + $0xd0] sm:$0xff] %v2495_v17  ;;  %v2558_v32 = vadd.f32 %v2557_v49, %v2495_v17  ;;  %v2596_v30 = vmul.f32 %v2495_v17, %v2495_v17 }
 0x2c6   : > { %v1988_v15 = vpop.f32.mrf.mxu2 }
 0x2c7   : > { %v2627_v34 = vadd.f32 %v2626_v25, %v2596_v30  ;;  %v2028_v60 = vadd.f32 %v1988_v15, %v1793_v40  ;;  %v2222_v31 = vpop.f32.mrf.mxu3 }
 0x2c8   : > { %v1756_v51 = vpop.f32.mrf.mxu1 }
 0x2c9   : > { %v2262_v8 = vadd.f32 %v2222_v31, %v2028_v60  ;;  %v1794_v43 = vadd.f32 %v1756_v51, %v4118_v55 }
 0x2ca   : > { %v2459_v28 = vpop.f32.mrf.mxu0 }
 0x2cb   : > { %v2496_v59 = vadd.f32 %v2456_v20, %v2262_v8 }
 0x2cd   : > { %2528 = vst [vmem:[%s4139_s30 + $0xd8] sm:$0xff] %v2496_v59  ;;  %v2559_v35 = vadd.f32 %v2558_v32, %v2496_v59  ;;  %v2597_v24 = vmul.f32 %v2496_v59, %v2496_v59 }
 0x2ce   : > { %v1991_v44 = vpop.f32.mrf.mxu2 }
 0x2cf   : > { %v2628_v52 = vadd.f32 %v2627_v34, %v2597_v24  ;;  %v2029_v63 = vadd.f32 %v1991_v44, %v1794_v43  ;;  %v2225_v21 = vpop.f32.mrf.mxu3 }
 0x2d0   : > { %v1758_v46 = vpop.f32.mrf.mxu1 }
 0x2d1   : > { %v2263_v54 = vadd.f32 %v2225_v21, %v2029_v63  ;;  %v1795_v57 = vadd.f32 %v1758_v46, %v4121_v6 }
 0x2d2   : > { %v2461_v37 = vpop.f32.mrf.mxu0 }
 0x2d3   : > { %v2497_v29 = vadd.f32 %v2459_v28, %v2263_v54 }
 0x2d5   : > { %2529 = vst [vmem:[%s4139_s30 + $0xe0] sm:$0xff] %v2497_v29  ;;  %v2560_v33 = vadd.f32 %v2559_v35, %v2497_v29  ;;  %v2598_v39 = vmul.f32 %v2497_v29, %v2497_v29 }
 0x2d6   : > { %v1993_v58 = vpop.f32.mrf.mxu2 }
 0x2d7   : > { %v2629_v5 = vadd.f32 %v2628_v52, %v2598_v39  ;;  %v2030_v11 = vadd.f32 %v1993_v58, %v1795_v57  ;;  %v2227_v42 = vpop.f32.mrf.mxu3 }
 0x2d8   : > { %v1761_v55 = vpop.f32.mrf.mxu1 }
 0x2d9   : > { %v2264_v14 = vadd.f32 %v2227_v42, %v2030_v11  ;;  %v1796_v19 = vadd.f32 %v1761_v55, %v4125_v50 }
 0x2da   : > { %v2464_v6 = vpop.f32.mrf.mxu0 }
 0x2db   : > { %v2498_v4 = vadd.f32 %v2461_v37, %v2264_v14 }
 0x2dd   : > { %2530 = vst [vmem:[%s4139_s30 + $0xe8] sm:$0xff] %v2498_v4  ;;  %v2561_v48 = vadd.f32 %v2560_v33, %v2498_v4  ;;  %v2599_v27 = vmul.f32 %v2498_v4, %v2498_v4 }
 0x2de   : > { %v1996_v16 = vpop.f32.mrf.mxu2 }
 0x2df   : > { %v2630_v23 = vadd.f32 %v2629_v5, %v2599_v27  ;;  %v2031_v53 = vadd.f32 %v1996_v16, %v1796_v19  ;;  %v2230_v36 = vpop.f32.mrf.mxu3 }
 0x2e0   : > { %v1763_v62 = vpop.f32.mrf.mxu1 }
 0x2e1   : > { %v2265_v22 = vadd.f32 %v2230_v36, %v2031_v53  ;;  %v1797_v13 = vadd.f32 %v1763_v62, %v4130_v10 }
 0x2e2   : > { %v2466_v50 = vpop.f32.mrf.mxu0 }
 0x2e3   : > { %v2499_v0 = vadd.f32 %v2464_v6, %v2265_v22 }
 0x2e5   : > { %2531 = vst [vmem:[%s4139_s30 + $0xf0] sm:$0xff] %v2499_v0  ;;  %v2562_v2 = vadd.f32 %v2561_v48, %v2499_v0  ;;  %v2600_v41 = vmul.f32 %v2499_v0, %v2499_v0 }
 0x2e6   : > { %v1998_v56 = vpop.f32.mrf.mxu2 }
 0x2e7   : > { %v2631_v45 = vadd.f32 %v2630_v23, %v2600_v41  ;;  %v2032_v1 = vadd.f32 %v1998_v56, %v1797_v13  ;;  %v2232_v26 = vpop.f32.mrf.mxu3 }
 0x2e9   : > { %v2266_v61 = vadd.f32 %v2232_v26, %v2032_v1 }
 0x2eb   : > { %v2500_v49 = vadd.f32 %v2466_v50, %v2266_v61 }
 0x2ed   : > { %2532 = vst [vmem:[%s4139_s30 + $0xf8] sm:$0xff] %v2500_v49  ;;  %v2563_v12 = vadd.f32 %v2562_v2, %v2500_v49  ;;  %v2601_v9 = vmul.f32 %v2500_v49, %v2500_v49 }
 0x2ef   : > { %v2564_v18 = vrot.slane %v2563_v12, 4  ;;  %v2632_v25 = vadd.f32 %v2631_v45, %v2601_v9 }
 0x2f1   : > { %v2565_v47 = vadd.f32 %v2564_v18, %v2563_v12  ;;  %v2633_v38 = vrot.slane %v2632_v25, 4 }
 0x2f3   : > { %v2566_v7 = vrot.slane %v2565_v47, 2  ;;  %v2634_v3 = vadd.f32 %v2633_v38, %v2632_v25 }
 0x2f5   : > { %v2567_v20 = vadd.f32 %v2566_v7, %v2565_v47  ;;  %v2635_v17 = vrot.slane %v2634_v3, 2 }
 0x2f7   : > { %v2568_v10 = vrot.slane %v2567_v20, 1  ;;  %v2636_v32 = vadd.f32 %v2635_v17, %v2634_v3 }
 0x2f9   : > { %v2637_v30 = vrot.slane %v2636_v32, 1  ;;  %v2569_v40 = vadd.f32 %v2568_v10, %v2567_v20 }
 0x2fb   : > { %v2638_v15 = vadd.f32 %v2637_v30, %v2636_v32 }
 0x2fd   : > { %v2640_v34 = vsel %vm2639_vm0, %v2569_v40, %v2638_v15 }
 0x2fe   : > { %2641 = vst [vmem:[%s235_s8] sm:$0x3] %v2640_v34 }
 0x2ff PF: > { %s16_s18 = sadd.s32 1, %s3274_s18  }
 0x300   : > { %p13_p4 = scmp.ge.s32.totalorder %s16_s18, 4  }
 0x302   :  { %15 = sbr.rel (!%p13_p4) target bundleno = 1 (0x1), region = 88 }

</bundles_post_ra>
